<compile_context>
chip_gen: v6e
topology: v6e:2x2x1
jax: 0.10.0
libtpu: 0.0.40
codegen_flags: <defaults>
</compile_context>

<pallas_src>
import functools

import jax
import jax.numpy as jnp
from jax import lax
from jax.experimental import pallas as pl
from jax.experimental.pallas import tpu as pltpu

LANE = 128      # f32 lane tile
SUBLANE = 8     # f32 sublane tile
UNROLL_T = 32   # fully unroll the recurrence up to this many timesteps


def _round_up(x, m):
    return (x + m - 1) // m * m


# ------------------- fused multi-layer LSTM + FC kernel -----------------------
def _make_fused_kernel(num_layers, seq_len, hidden_p):
    L, T, Hp = num_layers, seq_len, hidden_p
    G = 4 * Hp

    def kernel(*refs):
        # inputs : emb (T,Bp,Ep), w_ih[L], w_hh[L], bias[L], fc_w, fc_b
        # outputs: logits (Bp, Cp)
        # scratch: gbuf (T,Bp,4Hp), hseq (T,Bp,Hp)
        emb_ref = refs[0]
        w_ih_refs = refs[1:1 + L]
        w_hh_refs = refs[1 + L:1 + 2 * L]
        b_refs = refs[1 + 2 * L:1 + 3 * L]
        fc_w_ref = refs[1 + 3 * L]
        fc_b_ref = refs[2 + 3 * L]
        out_ref = refs[3 + 3 * L]
        gbuf_ref = refs[4 + 3 * L]
        hseq_ref = refs[5 + 3 * L]

        Bp = out_ref.shape[0]

        def input_projection(x2d, w_ih_ref, b_ref):
            # One large MXU matmul over ALL timesteps, hoisted out of the
            # serial recurrence (gate order i, f, g, o; bias = b_ih + b_hh).
            g = jnp.dot(x2d, w_ih_ref[...], preferred_element_type=jnp.float32)
            gbuf_ref[...] = (g + b_ref[...]).reshape(T, Bp, G)

        def run_recurrence(w_hh_ref, store_seq):
            w_hh = w_hh_ref[...]
            h0 = jnp.zeros((Bp, Hp), jnp.float32)
            c0 = jnp.zeros((Bp, Hp), jnp.float32)

            def step(t, h, c):
                g = gbuf_ref[t] + jnp.dot(
                    h, w_hh, preferred_element_type=jnp.float32)
                i_g = jax.nn.sigmoid(g[:, 0:Hp])
                f_g = jax.nn.sigmoid(g[:, Hp:2 * Hp])
                g_g = jnp.tanh(g[:, 2 * Hp:3 * Hp])
                o_g = jax.nn.sigmoid(g[:, 3 * Hp:4 * Hp])
                c = f_g * c + i_g * g_g
                h = o_g * jnp.tanh(c)
                if store_seq:            # static python bool
                    hseq_ref[t] = h
                return h, c

            if T <= UNROLL_T:
                # Fully unrolled: gives the LLO scheduler full visibility.
                h, c = h0, c0
                for t in range(T):
                    h, c = step(t, h, c)
            else:
                # Bounded trace size for long sequences.
                def body(t, carry):
                    return step(t, *carry)
                h, c = lax.fori_loop(0, T, body, (h0, c0))
            return h

        # Layer 0: embeddings -> input gates -> recurrence.
        x2d = emb_ref[...].reshape(T * Bp, emb_ref.shape[-1])
        input_projection(x2d, w_ih_refs[0], b_refs[0])
        h_last = run_recurrence(w_hh_refs[0], store_seq=(L > 1))

        # Layers 1..L-1 consume the previous layer's hidden sequence from VMEM.
        # TODO(synk): nn.LSTM inter-layer dropout is train-only; eval-mode
        # forward semantics need none.
        for l in range(1, L):
            x2d = hseq_ref[...].reshape(T * Bp, Hp)
            input_projection(x2d, w_ih_refs[l], b_refs[l])
            h_last = run_recurrence(w_hh_refs[l], store_seq=(l < L - 1))

        # Fused classifier on the final timestep only (== lstm_out[:, -1, :]).
        logits = jnp.dot(h_last, fc_w_ref[...],
                         preferred_element_type=jnp.float32) + fc_b_ref[...]
        out_ref[...] = logits.astype(out_ref.dtype)

    return kernel


def lstm_stack_fc(emb_tm, lstm_params, fc_w, fc_b):
    """emb_tm: (T, Bp, Ep) padded time-major embeddings -> (Bp, Cp) logits."""
    T, Bp, _ = emb_tm.shape
    L = len(lstm_params)
    Hp = lstm_params[0]["w_hh"].shape[0]
    Cp = fc_w.shape[1]
    inputs = [emb_tm]
    inputs += [p["w_ih"] for p in lstm_params]
    inputs += [p["w_hh"] for p in lstm_params]
    inputs += [p["bias"] for p in lstm_params]
    inputs += [fc_w, fc_b]
    # No grid: single invocation, whole arrays resident in VMEM, everything
    # (all layers + FC) fused so no intermediate HBM traffic.
    return pl.pallas_call(
        _make_fused_kernel(L, T, Hp),
        out_shape=jax.ShapeDtypeStruct((Bp, Cp), jnp.float32),
        scratch_shapes=[
            pltpu.VMEM((T, Bp, 4 * Hp), jnp.float32),   # per-layer input gates
            pltpu.VMEM((T, Bp, Hp), jnp.float32),       # per-layer hidden seq
        ],
    )(*inputs)


# ------------------------------ full forward ----------------------------------
def lstm_classifier_forward(text, params, num_class):
    """text: (B, T) int32 token ids; params: output of pad_params."""
    B, T = text.shape
    Bp = _round_up(max(B, SUBLANE), SUBLANE)
    # Pad the batch with token 0 (the padding_idx row of the embedding).
    text_p = jnp.pad(text, ((0, Bp - B), (0, 0)))
    # Gather directly in time-major order: transpose the tiny index array, not
    # the (B, T, E) activation tensor.
    emb_tm = jnp.take(params["embedding"], text_p.T, axis=0)     # (T, Bp, Ep)
    logits_p = lstm_stack_fc(emb_tm, params["lstm"],
                             params["fc_w"], params["fc_b"])     # (Bp, Cp)
    return logits_p[:B, :num_class]


# --------------------------- parameter handling --------------------------------
def init_params(key, vocab_size, embed_dim, hidden_dim, num_layers, num_class):
    """Logical (unpadded) params. Same conventions as nn.LSTM: gate order
    (i, f, g, o), weights stored transposed, b_ih + b_hh combined."""
    keys = jax.random.split(key, 3 + 4 * num_layers)
    emb = jax.random.normal(keys[0], (vocab_size, embed_dim), jnp.float32)
    emb = emb.at[0].set(0.0)                      # padding_idx=0 row is zero
    k = float(1.0 / (hidden_dim ** 0.5))
    lstm = []
    for layer in range(num_layers):
        in_dim = embed_dim if layer == 0 else hidden_dim
        kw = keys[1 + 4 * layer: 5 + 4 * layer]
        w_ih = jax.random.uniform(kw[0], (in_dim, 4 * hidden_dim), jnp.float32, -k, k)
        w_hh = jax.random.uniform(kw[1], (hidden_dim, 4 * hidden_dim), jnp.float32, -k, k)
        b_ih = jax.random.uniform(kw[2], (4 * hidden_dim,), jnp.float32, -k, k)
        b_hh = jax.random.uniform(kw[3], (4 * hidden_dim,), jnp.float32, -k, k)
        lstm.append({"w_ih": w_ih, "w_hh": w_hh, "bias": (b_ih + b_hh)[None, :]})
    fc_w = jax.random.uniform(keys[-2], (hidden_dim, num_class), jnp.float32, -k, k)
    fc_b = jax.random.uniform(keys[-1], (1, num_class), jnp.float32, -k, k)
    return {"embedding": emb, "lstm": lstm, "fc_w": fc_w, "fc_b": fc_b}


def _pad_gate_matrix(w, in_pad, h_pad):
    in_dim, four_h = w.shape
    h = four_h // 4
    w = w.reshape(in_dim, 4, h)                          # pad each gate block
    w = jnp.pad(w, ((0, in_pad - in_dim), (0, 0), (0, h_pad - h)))
    return w.reshape(in_pad, 4 * h_pad)


def _pad_gate_bias(b, h_pad):
    h = b.shape[-1] // 4
    b = b.reshape(4, h)
    b = jnp.pad(b, ((0, 0), (0, h_pad - h)))
    return b.reshape(1, 4 * h_pad)


def pad_params(params, embed_dim, hidden_dim, num_class):
    """Zero-pad all lane dims to multiples of 128 (done once, outside jit)."""
    Ep = _round_up(embed_dim, LANE)
    Hp = _round_up(hidden_dim, LANE)
    Cp = _round_up(num_class, LANE)
    emb = jnp.pad(params["embedding"], ((0, 0), (0, Ep - embed_dim)))
    lstm = []
    for l, p in enumerate(params["lstm"]):
        in_dim = embed_dim if l == 0 else hidden_dim
        in_pad = Ep if l == 0 else Hp
        lstm.append({
            "w_ih": _pad_gate_matrix(p["w_ih"], in_pad, Hp),
            "w_hh": _pad_gate_matrix(p["w_hh"], Hp, Hp),
            "bias": _pad_gate_bias(p["bias"], Hp),
        })
    fc_w = jnp.pad(params["fc_w"], ((0, Hp - hidden_dim), (0, Cp - num_class)))
    fc_b = jnp.pad(params["fc_b"], ((0, 0), (0, Cp - num_class)))
    return {"embedding": emb, "lstm": lstm, "fc_w": fc_w, "fc_b": fc_b}


if __name__ == "__main__":
    vocab_size, embed_dim, hidden_dim = 16, 32, 32
    num_layers, num_class = 2, 4
    B, T = 2, 8

    key = jax.random.PRNGKey(0)
    pkey, tkey = jax.random.split(key)
    params = init_params(pkey, vocab_size, embed_dim, hidden_dim,
                         num_layers, num_class)
    padded = pad_params(params, embed_dim, hidden_dim, num_class)
    text = jax.random.randint(tkey, (B, T), 0, vocab_size, dtype=jnp.int32)

    fwd = jax.jit(functools.partial(lstm_classifier_forward, num_class=num_class))
    logits = jax.block_until_ready(fwd(text, padded))
    assert logits.shape == (B, num_class), logits.shape
    assert logits.dtype == jnp.float32
    assert bool(jnp.all(jnp.isfinite(logits)))
    print("KERNEL_OK")
</pallas_src>

<mosaic_0001>
module attributes {stable_mosaic.version = 11 : i64} {
  func.func @kernel(%arg0: memref<8x8x128xf32, #tpu.memory_space<vmem>>, %arg1: memref<128x512xf32, #tpu.memory_space<vmem>>, %arg2: memref<128x512xf32, #tpu.memory_space<vmem>>, %arg3: memref<128x512xf32, #tpu.memory_space<vmem>>, %arg4: memref<128x512xf32, #tpu.memory_space<vmem>>, %arg5: memref<1x512xf32, #tpu.memory_space<vmem>>, %arg6: memref<1x512xf32, #tpu.memory_space<vmem>>, %arg7: memref<128x128xf32, #tpu.memory_space<vmem>>, %arg8: memref<1x128xf32, #tpu.memory_space<vmem>>, %arg9: memref<8x128xf32, #tpu.memory_space<vmem>>, %arg10: memref<8x8x512xf32, #tpu.memory_space<vmem>>, %arg11: memref<8x8x128xf32, #tpu.memory_space<vmem>>) attributes {dimension_semantics = [], scalar_prefetch = 0 : i64, scratch_operands = 2 : i64, tpu.core_type = #tpu.core_type<tc>} {
    %c0 = arith.constant 0 : index
    %c0_0 = arith.constant 0 : index
    %c0_1 = arith.constant 0 : index
    %0 = vector.load %arg0[%c0, %c0_0, %c0_1] : memref<8x8x128xf32, #tpu.memory_space<vmem>>, vector<8x8x128xf32>
    %1 = vector.shape_cast %0 : vector<8x8x128xf32> to vector<64x128xf32>
    %c0_2 = arith.constant 0 : index
    %c0_3 = arith.constant 0 : index
    %2 = vector.load %arg1[%c0_2, %c0_3] : memref<128x512xf32, #tpu.memory_space<vmem>>, vector<128x512xf32>
    %cst = arith.constant dense<0.000000e+00> : vector<64x512xf32>
    %3 = tpu.matmul %1, %2, %cst {dimension_numbers = #tpu.dot_dimension_numbers<[1], [0], [0], [1], [0, 0, 1, 1], [], []>} : vector<64x128xf32>, vector<128x512xf32>, vector<64x512xf32> -> vector<64x512xf32>
    %c0_4 = arith.constant 0 : index
    %c0_5 = arith.constant 0 : index
    %4 = vector.load %arg5[%c0_4, %c0_5] : memref<1x512xf32, #tpu.memory_space<vmem>>, vector<1x512xf32>
    %5 = vector.broadcast %4 : vector<1x512xf32> to vector<64x512xf32>
    %6 = arith.addf %3, %5 : vector<64x512xf32>
    %7 = vector.shape_cast %6 : vector<64x512xf32> to vector<8x8x512xf32>
    %c0_6 = arith.constant 0 : index
    %c0_7 = arith.constant 0 : index
    %c0_8 = arith.constant 0 : index
    %8 = vector.load %arg10[%c0_6, %c0_7, %c0_8] : memref<8x8x512xf32, #tpu.memory_space<vmem>>, vector<8x8x512xf32>
    tpu.vector_store %arg10[%c0_6, %c0_7, %c0_8], %7 {strides = array<i32>} : memref<8x8x512xf32, #tpu.memory_space<vmem>>, vector<8x8x512xf32>,
    %c0_9 = arith.constant 0 : index
    %c0_10 = arith.constant 0 : index
    %9 = vector.load %arg3[%c0_9, %c0_10] : memref<128x512xf32, #tpu.memory_space<vmem>>, vector<128x512xf32>
    %cst_11 = arith.constant 0.000000e+00 : f32
    %10 = vector.broadcast %cst_11 : f32 to vector<8x128xf32>
    %cst_12 = arith.constant 0.000000e+00 : f32
    %11 = vector.broadcast %cst_12 : f32 to vector<8x128xf32>
    %c0_13 = arith.constant 0 : index
    %c0_14 = arith.constant 0 : index
    %c0_15 = arith.constant 0 : index
    %12 = vector.load %arg10[%c0_13, %c0_14, %c0_15] : memref<8x8x512xf32, #tpu.memory_space<vmem>>, vector<1x8x512xf32>
    %13 = vector.shape_cast %12 : vector<1x8x512xf32> to vector<8x512xf32>
    %cst_16 = arith.constant dense<0.000000e+00> : vector<8x512xf32>
    %14 = tpu.matmul %10, %9, %cst_16 {dimension_numbers = #tpu.dot_dimension_numbers<[1], [0], [0], [1], [0, 0, 1, 1], [], []>} : vector<8x128xf32>, vector<128x512xf32>, vector<8x512xf32> -> vector<8x512xf32>
    %15 = arith.addf %13, %14 : vector<8x512xf32>
    %16 = vector.extract_strided_slice %15 {offsets = [0, 0], sizes = [8, 128], strides = [1, 1]} : vector<8x512xf32> to vector<8x128xf32>
    %17 = arith.negf %16 : vector<8x128xf32>
    %18 = math.exp %17 : vector<8x128xf32>
    %cst_17 = arith.constant 1.000000e+00 : f32
    %19 = vector.broadcast %cst_17 : f32 to vector<8x128xf32>
    %20 = arith.addf %19, %18 : vector<8x128xf32>
    %21 = arith.divf %19, %20 : vector<8x128xf32>
    %22 = vector.extract_strided_slice %15 {offsets = [0, 128], sizes = [8, 128], strides = [1, 1]} : vector<8x512xf32> to vector<8x128xf32>
    %23 = arith.negf %22 : vector<8x128xf32>
    %24 = math.exp %23 : vector<8x128xf32>
    %cst_18 = arith.constant 1.000000e+00 : f32
    %25 = vector.broadcast %cst_18 : f32 to vector<8x128xf32>
    %26 = arith.addf %25, %24 : vector<8x128xf32>
    %27 = arith.divf %25, %26 : vector<8x128xf32>
    %28 = vector.extract_strided_slice %15 {offsets = [0, 256], sizes = [8, 128], strides = [1, 1]} : vector<8x512xf32> to vector<8x128xf32>
    %29 = math.tanh %28 : vector<8x128xf32>
    %30 = vector.extract_strided_slice %15 {offsets = [0, 384], sizes = [8, 128], strides = [1, 1]} : vector<8x512xf32> to vector<8x128xf32>
    %31 = arith.negf %30 : vector<8x128xf32>
    %32 = math.exp %31 : vector<8x128xf32>
    %cst_19 = arith.constant 1.000000e+00 : f32
    %33 = vector.broadcast %cst_19 : f32 to vector<8x128xf32>
    %34 = arith.addf %33, %32 : vector<8x128xf32>
    %35 = arith.divf %33, %34 : vector<8x128xf32>
    %36 = arith.mulf %27, %11 : vector<8x128xf32>
    %37 = arith.mulf %21, %29 : vector<8x128xf32>
    %38 = arith.addf %36, %37 : vector<8x128xf32>
    %39 = math.tanh %38 : vector<8x128xf32>
    %40 = arith.mulf %35, %39 : vector<8x128xf32>
    %c0_20 = arith.constant 0 : index
    %c0_21 = arith.constant 0 : index
    %c0_22 = arith.constant 0 : index
    %41 = vector.load %arg11[%c0_20, %c0_21, %c0_22] : memref<8x8x128xf32, #tpu.memory_space<vmem>>, vector<1x8x128xf32>
    %42 = vector.shape_cast %41 : vector<1x8x128xf32> to vector<8x128xf32>
    %43 = vector.shape_cast %40 : vector<8x128xf32> to vector<1x8x128xf32>
    tpu.vector_store %arg11[%c0_20, %c0_21, %c0_22], %43 {strides = array<i32>} : memref<8x8x128xf32, #tpu.memory_space<vmem>>, vector<1x8x128xf32>,
    %c1 = arith.constant 1 : index
    %c0_23 = arith.constant 0 : index
    %c0_24 = arith.constant 0 : index
    %44 = vector.load %arg10[%c1, %c0_23, %c0_24] : memref<8x8x512xf32, #tpu.memory_space<vmem>>, vector<1x8x512xf32>
    %45 = vector.shape_cast %44 : vector<1x8x512xf32> to vector<8x512xf32>
    %cst_25 = arith.constant dense<0.000000e+00> : vector<8x512xf32>
    %46 = tpu.matmul %40, %9, %cst_25 {dimension_numbers = #tpu.dot_dimension_numbers<[1], [0], [0], [1], [0, 0, 1, 1], [], []>} : vector<8x128xf32>, vector<128x512xf32>, vector<8x512xf32> -> vector<8x512xf32>
    %47 = arith.addf %45, %46 : vector<8x512xf32>
    %48 = vector.extract_strided_slice %47 {offsets = [0, 0], sizes = [8, 128], strides = [1, 1]} : vector<8x512xf32> to vector<8x128xf32>
    %49 = arith.negf %48 : vector<8x128xf32>
    %50 = math.exp %49 : vector<8x128xf32>
    %cst_26 = arith.constant 1.000000e+00 : f32
    %51 = vector.broadcast %cst_26 : f32 to vector<8x128xf32>
    %52 = arith.addf %51, %50 : vector<8x128xf32>
    %53 = arith.divf %51, %52 : vector<8x128xf32>
    %54 = vector.extract_strided_slice %47 {offsets = [0, 128], sizes = [8, 128], strides = [1, 1]} : vector<8x512xf32> to vector<8x128xf32>
    %55 = arith.negf %54 : vector<8x128xf32>
    %56 = math.exp %55 : vector<8x128xf32>
    %cst_27 = arith.constant 1.000000e+00 : f32
    %57 = vector.broadcast %cst_27 : f32 to vector<8x128xf32>
    %58 = arith.addf %57, %56 : vector<8x128xf32>
    %59 = arith.divf %57, %58 : vector<8x128xf32>
    %60 = vector.extract_strided_slice %47 {offsets = [0, 256], sizes = [8, 128], strides = [1, 1]} : vector<8x512xf32> to vector<8x128xf32>
    %61 = math.tanh %60 : vector<8x128xf32>
    %62 = vector.extract_strided_slice %47 {offsets = [0, 384], sizes = [8, 128], strides = [1, 1]} : vector<8x512xf32> to vector<8x128xf32>
    %63 = arith.negf %62 : vector<8x128xf32>
    %64 = math.exp %63 : vector<8x128xf32>
    %cst_28 = arith.constant 1.000000e+00 : f32
    %65 = vector.broadcast %cst_28 : f32 to vector<8x128xf32>
    %66 = arith.addf %65, %64 : vector<8x128xf32>
    %67 = arith.divf %65, %66 : vector<8x128xf32>
    %68 = arith.mulf %59, %38 : vector<8x128xf32>
    %69 = arith.mulf %53, %61 : vector<8x128xf32>
    %70 = arith.addf %68, %69 : vector<8x128xf32>
    %71 = math.tanh %70 : vector<8x128xf32>
    %72 = arith.mulf %67, %71 : vector<8x128xf32>
    %c1_29 = arith.constant 1 : index
    %c0_30 = arith.constant 0 : index
    %c0_31 = arith.constant 0 : index
    %73 = vector.load %arg11[%c1_29, %c0_30, %c0_31] : memref<8x8x128xf32, #tpu.memory_space<vmem>>, vector<1x8x128xf32>
    %74 = vector.shape_cast %73 : vector<1x8x128xf32> to vector<8x128xf32>
    %75 = vector.shape_cast %72 : vector<8x128xf32> to vector<1x8x128xf32>
    tpu.vector_store %arg11[%c1_29, %c0_30, %c0_31], %75 {strides = array<i32>} : memref<8x8x128xf32, #tpu.memory_space<vmem>>, vector<1x8x128xf32>,
    %c2 = arith.constant 2 : index
    %c0_32 = arith.constant 0 : index
    %c0_33 = arith.constant 0 : index
    %76 = vector.load %arg10[%c2, %c0_32, %c0_33] : memref<8x8x512xf32, #tpu.memory_space<vmem>>, vector<1x8x512xf32>
    %77 = vector.shape_cast %76 : vector<1x8x512xf32> to vector<8x512xf32>
    %cst_34 = arith.constant dense<0.000000e+00> : vector<8x512xf32>
    %78 = tpu.matmul %72, %9, %cst_34 {dimension_numbers = #tpu.dot_dimension_numbers<[1], [0], [0], [1], [0, 0, 1, 1], [], []>} : vector<8x128xf32>, vector<128x512xf32>, vector<8x512xf32> -> vector<8x512xf32>
    %79 = arith.addf %77, %78 : vector<8x512xf32>
    %80 = vector.extract_strided_slice %79 {offsets = [0, 0], sizes = [8, 128], strides = [1, 1]} : vector<8x512xf32> to vector<8x128xf32>
    %81 = arith.negf %80 : vector<8x128xf32>
    %82 = math.exp %81 : vector<8x128xf32>
    %cst_35 = arith.constant 1.000000e+00 : f32
    %83 = vector.broadcast %cst_35 : f32 to vector<8x128xf32>
    %84 = arith.addf %83, %82 : vector<8x128xf32>
    %85 = arith.divf %83, %84 : vector<8x128xf32>
    %86 = vector.extract_strided_slice %79 {offsets = [0, 128], sizes = [8, 128], strides = [1, 1]} : vector<8x512xf32> to vector<8x128xf32>
    %87 = arith.negf %86 : vector<8x128xf32>
    %88 = math.exp %87 : vector<8x128xf32>
    %cst_36 = arith.constant 1.000000e+00 : f32
    %89 = vector.broadcast %cst_36 : f32 to vector<8x128xf32>
    %90 = arith.addf %89, %88 : vector<8x128xf32>
    %91 = arith.divf %89, %90 : vector<8x128xf32>
    %92 = vector.extract_strided_slice %79 {offsets = [0, 256], sizes = [8, 128], strides = [1, 1]} : vector<8x512xf32> to vector<8x128xf32>
    %93 = math.tanh %92 : vector<8x128xf32>
    %94 = vector.extract_strided_slice %79 {offsets = [0, 384], sizes = [8, 128], strides = [1, 1]} : vector<8x512xf32> to vector<8x128xf32>
    %95 = arith.negf %94 : vector<8x128xf32>
    %96 = math.exp %95 : vector<8x128xf32>
    %cst_37 = arith.constant 1.000000e+00 : f32
    %97 = vector.broadcast %cst_37 : f32 to vector<8x128xf32>
    %98 = arith.addf %97, %96 : vector<8x128xf32>
    %99 = arith.divf %97, %98 : vector<8x128xf32>
    %100 = arith.mulf %91, %70 : vector<8x128xf32>
    %101 = arith.mulf %85, %93 : vector<8x128xf32>
    %102 = arith.addf %100, %101 : vector<8x128xf32>
    %103 = math.tanh %102 : vector<8x128xf32>
    %104 = arith.mulf %99, %103 : vector<8x128xf32>
    %c2_38 = arith.constant 2 : index
    %c0_39 = arith.constant 0 : index
    %c0_40 = arith.constant 0 : index
    %105 = vector.load %arg11[%c2_38, %c0_39, %c0_40] : memref<8x8x128xf32, #tpu.memory_space<vmem>>, vector<1x8x128xf32>
    %106 = vector.shape_cast %105 : vector<1x8x128xf32> to vector<8x128xf32>
    %107 = vector.shape_cast %104 : vector<8x128xf32> to vector<1x8x128xf32>
    tpu.vector_store %arg11[%c2_38, %c0_39, %c0_40], %107 {strides = array<i32>} : memref<8x8x128xf32, #tpu.memory_space<vmem>>, vector<1x8x128xf32>,
    %c3 = arith.constant 3 : index
    %c0_41 = arith.constant 0 : index
    %c0_42 = arith.constant 0 : index
    %108 = vector.load %arg10[%c3, %c0_41, %c0_42] : memref<8x8x512xf32, #tpu.memory_space<vmem>>, vector<1x8x512xf32>
    %109 = vector.shape_cast %108 : vector<1x8x512xf32> to vector<8x512xf32>
    %cst_43 = arith.constant dense<0.000000e+00> : vector<8x512xf32>
    %110 = tpu.matmul %104, %9, %cst_43 {dimension_numbers = #tpu.dot_dimension_numbers<[1], [0], [0], [1], [0, 0, 1, 1], [], []>} : vector<8x128xf32>, vector<128x512xf32>, vector<8x512xf32> -> vector<8x512xf32>
    %111 = arith.addf %109, %110 : vector<8x512xf32>
    %112 = vector.extract_strided_slice %111 {offsets = [0, 0], sizes = [8, 128], strides = [1, 1]} : vector<8x512xf32> to vector<8x128xf32>
    %113 = arith.negf %112 : vector<8x128xf32>
    %114 = math.exp %113 : vector<8x128xf32>
    %cst_44 = arith.constant 1.000000e+00 : f32
    %115 = vector.broadcast %cst_44 : f32 to vector<8x128xf32>
    %116 = arith.addf %115, %114 : vector<8x128xf32>
    %117 = arith.divf %115, %116 : vector<8x128xf32>
    %118 = vector.extract_strided_slice %111 {offsets = [0, 128], sizes = [8, 128], strides = [1, 1]} : vector<8x512xf32> to vector<8x128xf32>
    %119 = arith.negf %118 : vector<8x128xf32>
    %120 = math.exp %119 : vector<8x128xf32>
    %cst_45 = arith.constant 1.000000e+00 : f32
    %121 = vector.broadcast %cst_45 : f32 to vector<8x128xf32>
    %122 = arith.addf %121, %120 : vector<8x128xf32>
    %123 = arith.divf %121, %122 : vector<8x128xf32>
    %124 = vector.extract_strided_slice %111 {offsets = [0, 256], sizes = [8, 128], strides = [1, 1]} : vector<8x512xf32> to vector<8x128xf32>
    %125 = math.tanh %124 : vector<8x128xf32>
    %126 = vector.extract_strided_slice %111 {offsets = [0, 384], sizes = [8, 128], strides = [1, 1]} : vector<8x512xf32> to vector<8x128xf32>
    %127 = arith.negf %126 : vector<8x128xf32>
    %128 = math.exp %127 : vector<8x128xf32>
    %cst_46 = arith.constant 1.000000e+00 : f32
    %129 = vector.broadcast %cst_46 : f32 to vector<8x128xf32>
    %130 = arith.addf %129, %128 : vector<8x128xf32>
    %131 = arith.divf %129, %130 : vector<8x128xf32>
    %132 = arith.mulf %123, %102 : vector<8x128xf32>
    %133 = arith.mulf %117, %125 : vector<8x128xf32>
    %134 = arith.addf %132, %133 : vector<8x128xf32>
    %135 = math.tanh %134 : vector<8x128xf32>
    %136 = arith.mulf %131, %135 : vector<8x128xf32>
    %c3_47 = arith.constant 3 : index
    %c0_48 = arith.constant 0 : index
    %c0_49 = arith.constant 0 : index
    %137 = vector.load %arg11[%c3_47, %c0_48, %c0_49] : memref<8x8x128xf32, #tpu.memory_space<vmem>>, vector<1x8x128xf32>
    %138 = vector.shape_cast %137 : vector<1x8x128xf32> to vector<8x128xf32>
    %139 = vector.shape_cast %136 : vector<8x128xf32> to vector<1x8x128xf32>
    tpu.vector_store %arg11[%c3_47, %c0_48, %c0_49], %139 {strides = array<i32>} : memref<8x8x128xf32, #tpu.memory_space<vmem>>, vector<1x8x128xf32>,
    %c4 = arith.constant 4 : index
    %c0_50 = arith.constant 0 : index
    %c0_51 = arith.constant 0 : index
    %140 = vector.load %arg10[%c4, %c0_50, %c0_51] : memref<8x8x512xf32, #tpu.memory_space<vmem>>, vector<1x8x512xf32>
    %141 = vector.shape_cast %140 : vector<1x8x512xf32> to vector<8x512xf32>
    %cst_52 = arith.constant dense<0.000000e+00> : vector<8x512xf32>
    %142 = tpu.matmul %136, %9, %cst_52 {dimension_numbers = #tpu.dot_dimension_numbers<[1], [0], [0], [1], [0, 0, 1, 1], [], []>} : vector<8x128xf32>, vector<128x512xf32>, vector<8x512xf32> -> vector<8x512xf32>
    %143 = arith.addf %141, %142 : vector<8x512xf32>
    %144 = vector.extract_strided_slice %143 {offsets = [0, 0], sizes = [8, 128], strides = [1, 1]} : vector<8x512xf32> to vector<8x128xf32>
    %145 = arith.negf %144 : vector<8x128xf32>
    %146 = math.exp %145 : vector<8x128xf32>
    %cst_53 = arith.constant 1.000000e+00 : f32
    %147 = vector.broadcast %cst_53 : f32 to vector<8x128xf32>
    %148 = arith.addf %147, %146 : vector<8x128xf32>
    %149 = arith.divf %147, %148 : vector<8x128xf32>
    %150 = vector.extract_strided_slice %143 {offsets = [0, 128], sizes = [8, 128], strides = [1, 1]} : vector<8x512xf32> to vector<8x128xf32>
    %151 = arith.negf %150 : vector<8x128xf32>
    %152 = math.exp %151 : vector<8x128xf32>
    %cst_54 = arith.constant 1.000000e+00 : f32
    %153 = vector.broadcast %cst_54 : f32 to vector<8x128xf32>
    %154 = arith.addf %153, %152 : vector<8x128xf32>
    %155 = arith.divf %153, %154 : vector<8x128xf32>
    %156 = vector.extract_strided_slice %143 {offsets = [0, 256], sizes = [8, 128], strides = [1, 1]} : vector<8x512xf32> to vector<8x128xf32>
    %157 = math.tanh %156 : vector<8x128xf32>
    %158 = vector.extract_strided_slice %143 {offsets = [0, 384], sizes = [8, 128], strides = [1, 1]} : vector<8x512xf32> to vector<8x128xf32>
    %159 = arith.negf %158 : vector<8x128xf32>
    %160 = math.exp %159 : vector<8x128xf32>
    %cst_55 = arith.constant 1.000000e+00 : f32
    %161 = vector.broadcast %cst_55 : f32 to vector<8x128xf32>
    %162 = arith.addf %161, %160 : vector<8x128xf32>
    %163 = arith.divf %161, %162 : vector<8x128xf32>
    %164 = arith.mulf %155, %134 : vector<8x128xf32>
    %165 = arith.mulf %149, %157 : vector<8x128xf32>
    %166 = arith.addf %164, %165 : vector<8x128xf32>
    %167 = math.tanh %166 : vector<8x128xf32>
    %168 = arith.mulf %163, %167 : vector<8x128xf32>
    %c4_56 = arith.constant 4 : index
    %c0_57 = arith.constant 0 : index
    %c0_58 = arith.constant 0 : index
    %169 = vector.load %arg11[%c4_56, %c0_57, %c0_58] : memref<8x8x128xf32, #tpu.memory_space<vmem>>, vector<1x8x128xf32>
    %170 = vector.shape_cast %169 : vector<1x8x128xf32> to vector<8x128xf32>
    %171 = vector.shape_cast %168 : vector<8x128xf32> to vector<1x8x128xf32>
    tpu.vector_store %arg11[%c4_56, %c0_57, %c0_58], %171 {strides = array<i32>} : memref<8x8x128xf32, #tpu.memory_space<vmem>>, vector<1x8x128xf32>,
    %c5 = arith.constant 5 : index
    %c0_59 = arith.constant 0 : index
    %c0_60 = arith.constant 0 : index
    %172 = vector.load %arg10[%c5, %c0_59, %c0_60] : memref<8x8x512xf32, #tpu.memory_space<vmem>>, vector<1x8x512xf32>
    %173 = vector.shape_cast %172 : vector<1x8x512xf32> to vector<8x512xf32>
    %cst_61 = arith.constant dense<0.000000e+00> : vector<8x512xf32>
    %174 = tpu.matmul %168, %9, %cst_61 {dimension_numbers = #tpu.dot_dimension_numbers<[1], [0], [0], [1], [0, 0, 1, 1], [], []>} : vector<8x128xf32>, vector<128x512xf32>, vector<8x512xf32> -> vector<8x512xf32>
    %175 = arith.addf %173, %174 : vector<8x512xf32>
    %176 = vector.extract_strided_slice %175 {offsets = [0, 0], sizes = [8, 128], strides = [1, 1]} : vector<8x512xf32> to vector<8x128xf32>
    %177 = arith.negf %176 : vector<8x128xf32>
    %178 = math.exp %177 : vector<8x128xf32>
    %cst_62 = arith.constant 1.000000e+00 : f32
    %179 = vector.broadcast %cst_62 : f32 to vector<8x128xf32>
    %180 = arith.addf %179, %178 : vector<8x128xf32>
    %181 = arith.divf %179, %180 : vector<8x128xf32>
    %182 = vector.extract_strided_slice %175 {offsets = [0, 128], sizes = [8, 128], strides = [1, 1]} : vector<8x512xf32> to vector<8x128xf32>
    %183 = arith.negf %182 : vector<8x128xf32>
    %184 = math.exp %183 : vector<8x128xf32>
    %cst_63 = arith.constant 1.000000e+00 : f32
    %185 = vector.broadcast %cst_63 : f32 to vector<8x128xf32>
    %186 = arith.addf %185, %184 : vector<8x128xf32>
    %187 = arith.divf %185, %186 : vector<8x128xf32>
    %188 = vector.extract_strided_slice %175 {offsets = [0, 256], sizes = [8, 128], strides = [1, 1]} : vector<8x512xf32> to vector<8x128xf32>
    %189 = math.tanh %188 : vector<8x128xf32>
    %190 = vector.extract_strided_slice %175 {offsets = [0, 384], sizes = [8, 128], strides = [1, 1]} : vector<8x512xf32> to vector<8x128xf32>
    %191 = arith.negf %190 : vector<8x128xf32>
    %192 = math.exp %191 : vector<8x128xf32>
    %cst_64 = arith.constant 1.000000e+00 : f32
    %193 = vector.broadcast %cst_64 : f32 to vector<8x128xf32>
    %194 = arith.addf %193, %192 : vector<8x128xf32>
    %195 = arith.divf %193, %194 : vector<8x128xf32>
    %196 = arith.mulf %187, %166 : vector<8x128xf32>
    %197 = arith.mulf %181, %189 : vector<8x128xf32>
    %198 = arith.addf %196, %197 : vector<8x128xf32>
    %199 = math.tanh %198 : vector<8x128xf32>
    %200 = arith.mulf %195, %199 : vector<8x128xf32>
    %c5_65 = arith.constant 5 : index
    %c0_66 = arith.constant 0 : index
    %c0_67 = arith.constant 0 : index
    %201 = vector.load %arg11[%c5_65, %c0_66, %c0_67] : memref<8x8x128xf32, #tpu.memory_space<vmem>>, vector<1x8x128xf32>
    %202 = vector.shape_cast %201 : vector<1x8x128xf32> to vector<8x128xf32>
    %203 = vector.shape_cast %200 : vector<8x128xf32> to vector<1x8x128xf32>
    tpu.vector_store %arg11[%c5_65, %c0_66, %c0_67], %203 {strides = array<i32>} : memref<8x8x128xf32, #tpu.memory_space<vmem>>, vector<1x8x128xf32>,
    %c6 = arith.constant 6 : index
    %c0_68 = arith.constant 0 : index
    %c0_69 = arith.constant 0 : index
    %204 = vector.load %arg10[%c6, %c0_68, %c0_69] : memref<8x8x512xf32, #tpu.memory_space<vmem>>, vector<1x8x512xf32>
    %205 = vector.shape_cast %204 : vector<1x8x512xf32> to vector<8x512xf32>
    %cst_70 = arith.constant dense<0.000000e+00> : vector<8x512xf32>
    %206 = tpu.matmul %200, %9, %cst_70 {dimension_numbers = #tpu.dot_dimension_numbers<[1], [0], [0], [1], [0, 0, 1, 1], [], []>} : vector<8x128xf32>, vector<128x512xf32>, vector<8x512xf32> -> vector<8x512xf32>
    %207 = arith.addf %205, %206 : vector<8x512xf32>
    %208 = vector.extract_strided_slice %207 {offsets = [0, 0], sizes = [8, 128], strides = [1, 1]} : vector<8x512xf32> to vector<8x128xf32>
    %209 = arith.negf %208 : vector<8x128xf32>
    %210 = math.exp %209 : vector<8x128xf32>
    %cst_71 = arith.constant 1.000000e+00 : f32
    %211 = vector.broadcast %cst_71 : f32 to vector<8x128xf32>
    %212 = arith.addf %211, %210 : vector<8x128xf32>
    %213 = arith.divf %211, %212 : vector<8x128xf32>
    %214 = vector.extract_strided_slice %207 {offsets = [0, 128], sizes = [8, 128], strides = [1, 1]} : vector<8x512xf32> to vector<8x128xf32>
    %215 = arith.negf %214 : vector<8x128xf32>
    %216 = math.exp %215 : vector<8x128xf32>
    %cst_72 = arith.constant 1.000000e+00 : f32
    %217 = vector.broadcast %cst_72 : f32 to vector<8x128xf32>
    %218 = arith.addf %217, %216 : vector<8x128xf32>
    %219 = arith.divf %217, %218 : vector<8x128xf32>
    %220 = vector.extract_strided_slice %207 {offsets = [0, 256], sizes = [8, 128], strides = [1, 1]} : vector<8x512xf32> to vector<8x128xf32>
    %221 = math.tanh %220 : vector<8x128xf32>
    %222 = vector.extract_strided_slice %207 {offsets = [0, 384], sizes = [8, 128], strides = [1, 1]} : vector<8x512xf32> to vector<8x128xf32>
    %223 = arith.negf %222 : vector<8x128xf32>
    %224 = math.exp %223 : vector<8x128xf32>
    %cst_73 = arith.constant 1.000000e+00 : f32
    %225 = vector.broadcast %cst_73 : f32 to vector<8x128xf32>
    %226 = arith.addf %225, %224 : vector<8x128xf32>
    %227 = arith.divf %225, %226 : vector<8x128xf32>
    %228 = arith.mulf %219, %198 : vector<8x128xf32>
    %229 = arith.mulf %213, %221 : vector<8x128xf32>
    %230 = arith.addf %228, %229 : vector<8x128xf32>
    %231 = math.tanh %230 : vector<8x128xf32>
    %232 = arith.mulf %227, %231 : vector<8x128xf32>
    %c6_74 = arith.constant 6 : index
    %c0_75 = arith.constant 0 : index
    %c0_76 = arith.constant 0 : index
    %233 = vector.load %arg11[%c6_74, %c0_75, %c0_76] : memref<8x8x128xf32, #tpu.memory_space<vmem>>, vector<1x8x128xf32>
    %234 = vector.shape_cast %233 : vector<1x8x128xf32> to vector<8x128xf32>
    %235 = vector.shape_cast %232 : vector<8x128xf32> to vector<1x8x128xf32>
    tpu.vector_store %arg11[%c6_74, %c0_75, %c0_76], %235 {strides = array<i32>} : memref<8x8x128xf32, #tpu.memory_space<vmem>>, vector<1x8x128xf32>,
    %c7 = arith.constant 7 : index
    %c0_77 = arith.constant 0 : index
    %c0_78 = arith.constant 0 : index
    %236 = vector.load %arg10[%c7, %c0_77, %c0_78] : memref<8x8x512xf32, #tpu.memory_space<vmem>>, vector<1x8x512xf32>
    %237 = vector.shape_cast %236 : vector<1x8x512xf32> to vector<8x512xf32>
    %cst_79 = arith.constant dense<0.000000e+00> : vector<8x512xf32>
    %238 = tpu.matmul %232, %9, %cst_79 {dimension_numbers = #tpu.dot_dimension_numbers<[1], [0], [0], [1], [0, 0, 1, 1], [], []>} : vector<8x128xf32>, vector<128x512xf32>, vector<8x512xf32> -> vector<8x512xf32>
    %239 = arith.addf %237, %238 : vector<8x512xf32>
    %240 = vector.extract_strided_slice %239 {offsets = [0, 0], sizes = [8, 128], strides = [1, 1]} : vector<8x512xf32> to vector<8x128xf32>
    %241 = arith.negf %240 : vector<8x128xf32>
    %242 = math.exp %241 : vector<8x128xf32>
    %cst_80 = arith.constant 1.000000e+00 : f32
    %243 = vector.broadcast %cst_80 : f32 to vector<8x128xf32>
    %244 = arith.addf %243, %242 : vector<8x128xf32>
    %245 = arith.divf %243, %244 : vector<8x128xf32>
    %246 = vector.extract_strided_slice %239 {offsets = [0, 128], sizes = [8, 128], strides = [1, 1]} : vector<8x512xf32> to vector<8x128xf32>
    %247 = arith.negf %246 : vector<8x128xf32>
    %248 = math.exp %247 : vector<8x128xf32>
    %cst_81 = arith.constant 1.000000e+00 : f32
    %249 = vector.broadcast %cst_81 : f32 to vector<8x128xf32>
    %250 = arith.addf %249, %248 : vector<8x128xf32>
    %251 = arith.divf %249, %250 : vector<8x128xf32>
    %252 = vector.extract_strided_slice %239 {offsets = [0, 256], sizes = [8, 128], strides = [1, 1]} : vector<8x512xf32> to vector<8x128xf32>
    %253 = math.tanh %252 : vector<8x128xf32>
    %254 = vector.extract_strided_slice %239 {offsets = [0, 384], sizes = [8, 128], strides = [1, 1]} : vector<8x512xf32> to vector<8x128xf32>
    %255 = arith.negf %254 : vector<8x128xf32>
    %256 = math.exp %255 : vector<8x128xf32>
    %cst_82 = arith.constant 1.000000e+00 : f32
    %257 = vector.broadcast %cst_82 : f32 to vector<8x128xf32>
    %258 = arith.addf %257, %256 : vector<8x128xf32>
    %259 = arith.divf %257, %258 : vector<8x128xf32>
    %260 = arith.mulf %251, %230 : vector<8x128xf32>
    %261 = arith.mulf %245, %253 : vector<8x128xf32>
    %262 = arith.addf %260, %261 : vector<8x128xf32>
    %263 = math.tanh %262 : vector<8x128xf32>
    %264 = arith.mulf %259, %263 : vector<8x128xf32>
    %c7_83 = arith.constant 7 : index
    %c0_84 = arith.constant 0 : index
    %c0_85 = arith.constant 0 : index
    %265 = vector.load %arg11[%c7_83, %c0_84, %c0_85] : memref<8x8x128xf32, #tpu.memory_space<vmem>>, vector<1x8x128xf32>
    %266 = vector.shape_cast %265 : vector<1x8x128xf32> to vector<8x128xf32>
    %267 = vector.shape_cast %264 : vector<8x128xf32> to vector<1x8x128xf32>
    tpu.vector_store %arg11[%c7_83, %c0_84, %c0_85], %267 {strides = array<i32>} : memref<8x8x128xf32, #tpu.memory_space<vmem>>, vector<1x8x128xf32>,
    %c0_86 = arith.constant 0 : index
    %c0_87 = arith.constant 0 : index
    %c0_88 = arith.constant 0 : index
    %268 = vector.load %arg11[%c0_86, %c0_87, %c0_88] : memref<8x8x128xf32, #tpu.memory_space<vmem>>, vector<8x8x128xf32>
    %269 = vector.shape_cast %268 : vector<8x8x128xf32> to vector<64x128xf32>
    %c0_89 = arith.constant 0 : index
    %c0_90 = arith.constant 0 : index
    %270 = vector.load %arg2[%c0_89, %c0_90] : memref<128x512xf32, #tpu.memory_space<vmem>>, vector<128x512xf32>
    %cst_91 = arith.constant dense<0.000000e+00> : vector<64x512xf32>
    %271 = tpu.matmul %269, %270, %cst_91 {dimension_numbers = #tpu.dot_dimension_numbers<[1], [0], [0], [1], [0, 0, 1, 1], [], []>} : vector<64x128xf32>, vector<128x512xf32>, vector<64x512xf32> -> vector<64x512xf32>
    %c0_92 = arith.constant 0 : index
    %c0_93 = arith.constant 0 : index
    %272 = vector.load %arg6[%c0_92, %c0_93] : memref<1x512xf32, #tpu.memory_space<vmem>>, vector<1x512xf32>
    %273 = vector.broadcast %272 : vector<1x512xf32> to vector<64x512xf32>
    %274 = arith.addf %271, %273 : vector<64x512xf32>
    %275 = vector.shape_cast %274 : vector<64x512xf32> to vector<8x8x512xf32>
    %c0_94 = arith.constant 0 : index
    %c0_95 = arith.constant 0 : index
    %c0_96 = arith.constant 0 : index
    %276 = vector.load %arg10[%c0_94, %c0_95, %c0_96] : memref<8x8x512xf32, #tpu.memory_space<vmem>>, vector<8x8x512xf32>
    tpu.vector_store %arg10[%c0_94, %c0_95, %c0_96], %275 {strides = array<i32>} : memref<8x8x512xf32, #tpu.memory_space<vmem>>, vector<8x8x512xf32>,
    %c0_97 = arith.constant 0 : index
    %c0_98 = arith.constant 0 : index
    %277 = vector.load %arg4[%c0_97, %c0_98] : memref<128x512xf32, #tpu.memory_space<vmem>>, vector<128x512xf32>
    %cst_99 = arith.constant 0.000000e+00 : f32
    %278 = vector.broadcast %cst_99 : f32 to vector<8x128xf32>
    %cst_100 = arith.constant 0.000000e+00 : f32
    %279 = vector.broadcast %cst_100 : f32 to vector<8x128xf32>
    %c0_101 = arith.constant 0 : index
    %c0_102 = arith.constant 0 : index
    %c0_103 = arith.constant 0 : index
    %280 = vector.load %arg10[%c0_101, %c0_102, %c0_103] : memref<8x8x512xf32, #tpu.memory_space<vmem>>, vector<1x8x512xf32>
    %281 = vector.shape_cast %280 : vector<1x8x512xf32> to vector<8x512xf32>
    %cst_104 = arith.constant dense<0.000000e+00> : vector<8x512xf32>
    %282 = tpu.matmul %278, %277, %cst_104 {dimension_numbers = #tpu.dot_dimension_numbers<[1], [0], [0], [1], [0, 0, 1, 1], [], []>} : vector<8x128xf32>, vector<128x512xf32>, vector<8x512xf32> -> vector<8x512xf32>
    %283 = arith.addf %281, %282 : vector<8x512xf32>
    %284 = vector.extract_strided_slice %283 {offsets = [0, 0], sizes = [8, 128], strides = [1, 1]} : vector<8x512xf32> to vector<8x128xf32>
    %285 = arith.negf %284 : vector<8x128xf32>
    %286 = math.exp %285 : vector<8x128xf32>
    %cst_105 = arith.constant 1.000000e+00 : f32
    %287 = vector.broadcast %cst_105 : f32 to vector<8x128xf32>
    %288 = arith.addf %287, %286 : vector<8x128xf32>
    %289 = arith.divf %287, %288 : vector<8x128xf32>
    %290 = vector.extract_strided_slice %283 {offsets = [0, 128], sizes = [8, 128], strides = [1, 1]} : vector<8x512xf32> to vector<8x128xf32>
    %291 = arith.negf %290 : vector<8x128xf32>
    %292 = math.exp %291 : vector<8x128xf32>
    %cst_106 = arith.constant 1.000000e+00 : f32
    %293 = vector.broadcast %cst_106 : f32 to vector<8x128xf32>
    %294 = arith.addf %293, %292 : vector<8x128xf32>
    %295 = arith.divf %293, %294 : vector<8x128xf32>
    %296 = vector.extract_strided_slice %283 {offsets = [0, 256], sizes = [8, 128], strides = [1, 1]} : vector<8x512xf32> to vector<8x128xf32>
    %297 = math.tanh %296 : vector<8x128xf32>
    %298 = vector.extract_strided_slice %283 {offsets = [0, 384], sizes = [8, 128], strides = [1, 1]} : vector<8x512xf32> to vector<8x128xf32>
    %299 = arith.negf %298 : vector<8x128xf32>
    %300 = math.exp %299 : vector<8x128xf32>
    %cst_107 = arith.constant 1.000000e+00 : f32
    %301 = vector.broadcast %cst_107 : f32 to vector<8x128xf32>
    %302 = arith.addf %301, %300 : vector<8x128xf32>
    %303 = arith.divf %301, %302 : vector<8x128xf32>
    %304 = arith.mulf %295, %279 : vector<8x128xf32>
    %305 = arith.mulf %289, %297 : vector<8x128xf32>
    %306 = arith.addf %304, %305 : vector<8x128xf32>
    %307 = math.tanh %306 : vector<8x128xf32>
    %308 = arith.mulf %303, %307 : vector<8x128xf32>
    %c1_108 = arith.constant 1 : index
    %c0_109 = arith.constant 0 : index
    %c0_110 = arith.constant 0 : index
    %309 = vector.load %arg10[%c1_108, %c0_109, %c0_110] : memref<8x8x512xf32, #tpu.memory_space<vmem>>, vector<1x8x512xf32>
    %310 = vector.shape_cast %309 : vector<1x8x512xf32> to vector<8x512xf32>
    %cst_111 = arith.constant dense<0.000000e+00> : vector<8x512xf32>
    %311 = tpu.matmul %308, %277, %cst_111 {dimension_numbers = #tpu.dot_dimension_numbers<[1], [0], [0], [1], [0, 0, 1, 1], [], []>} : vector<8x128xf32>, vector<128x512xf32>, vector<8x512xf32> -> vector<8x512xf32>
    %312 = arith.addf %310, %311 : vector<8x512xf32>
    %313 = vector.extract_strided_slice %312 {offsets = [0, 0], sizes = [8, 128], strides = [1, 1]} : vector<8x512xf32> to vector<8x128xf32>
    %314 = arith.negf %313 : vector<8x128xf32>
    %315 = math.exp %314 : vector<8x128xf32>
    %cst_112 = arith.constant 1.000000e+00 : f32
    %316 = vector.broadcast %cst_112 : f32 to vector<8x128xf32>
    %317 = arith.addf %316, %315 : vector<8x128xf32>
    %318 = arith.divf %316, %317 : vector<8x128xf32>
    %319 = vector.extract_strided_slice %312 {offsets = [0, 128], sizes = [8, 128], strides = [1, 1]} : vector<8x512xf32> to vector<8x128xf32>
    %320 = arith.negf %319 : vector<8x128xf32>
    %321 = math.exp %320 : vector<8x128xf32>
    %cst_113 = arith.constant 1.000000e+00 : f32
    %322 = vector.broadcast %cst_113 : f32 to vector<8x128xf32>
    %323 = arith.addf %322, %321 : vector<8x128xf32>
    %324 = arith.divf %322, %323 : vector<8x128xf32>
    %325 = vector.extract_strided_slice %312 {offsets = [0, 256], sizes = [8, 128], strides = [1, 1]} : vector<8x512xf32> to vector<8x128xf32>
    %326 = math.tanh %325 : vector<8x128xf32>
    %327 = vector.extract_strided_slice %312 {offsets = [0, 384], sizes = [8, 128], strides = [1, 1]} : vector<8x512xf32> to vector<8x128xf32>
    %328 = arith.negf %327 : vector<8x128xf32>
    %329 = math.exp %328 : vector<8x128xf32>
    %cst_114 = arith.constant 1.000000e+00 : f32
    %330 = vector.broadcast %cst_114 : f32 to vector<8x128xf32>
    %331 = arith.addf %330, %329 : vector<8x128xf32>
    %332 = arith.divf %330, %331 : vector<8x128xf32>
    %333 = arith.mulf %324, %306 : vector<8x128xf32>
    %334 = arith.mulf %318, %326 : vector<8x128xf32>
    %335 = arith.addf %333, %334 : vector<8x128xf32>
    %336 = math.tanh %335 : vector<8x128xf32>
    %337 = arith.mulf %332, %336 : vector<8x128xf32>
    %c2_115 = arith.constant 2 : index
    %c0_116 = arith.constant 0 : index
    %c0_117 = arith.constant 0 : index
    %338 = vector.load %arg10[%c2_115, %c0_116, %c0_117] : memref<8x8x512xf32, #tpu.memory_space<vmem>>, vector<1x8x512xf32>
    %339 = vector.shape_cast %338 : vector<1x8x512xf32> to vector<8x512xf32>
    %cst_118 = arith.constant dense<0.000000e+00> : vector<8x512xf32>
    %340 = tpu.matmul %337, %277, %cst_118 {dimension_numbers = #tpu.dot_dimension_numbers<[1], [0], [0], [1], [0, 0, 1, 1], [], []>} : vector<8x128xf32>, vector<128x512xf32>, vector<8x512xf32> -> vector<8x512xf32>
    %341 = arith.addf %339, %340 : vector<8x512xf32>
    %342 = vector.extract_strided_slice %341 {offsets = [0, 0], sizes = [8, 128], strides = [1, 1]} : vector<8x512xf32> to vector<8x128xf32>
    %343 = arith.negf %342 : vector<8x128xf32>
    %344 = math.exp %343 : vector<8x128xf32>
    %cst_119 = arith.constant 1.000000e+00 : f32
    %345 = vector.broadcast %cst_119 : f32 to vector<8x128xf32>
    %346 = arith.addf %345, %344 : vector<8x128xf32>
    %347 = arith.divf %345, %346 : vector<8x128xf32>
    %348 = vector.extract_strided_slice %341 {offsets = [0, 128], sizes = [8, 128], strides = [1, 1]} : vector<8x512xf32> to vector<8x128xf32>
    %349 = arith.negf %348 : vector<8x128xf32>
    %350 = math.exp %349 : vector<8x128xf32>
    %cst_120 = arith.constant 1.000000e+00 : f32
    %351 = vector.broadcast %cst_120 : f32 to vector<8x128xf32>
    %352 = arith.addf %351, %350 : vector<8x128xf32>
    %353 = arith.divf %351, %352 : vector<8x128xf32>
    %354 = vector.extract_strided_slice %341 {offsets = [0, 256], sizes = [8, 128], strides = [1, 1]} : vector<8x512xf32> to vector<8x128xf32>
    %355 = math.tanh %354 : vector<8x128xf32>
    %356 = vector.extract_strided_slice %341 {offsets = [0, 384], sizes = [8, 128], strides = [1, 1]} : vector<8x512xf32> to vector<8x128xf32>
    %357 = arith.negf %356 : vector<8x128xf32>
    %358 = math.exp %357 : vector<8x128xf32>
    %cst_121 = arith.constant 1.000000e+00 : f32
    %359 = vector.broadcast %cst_121 : f32 to vector<8x128xf32>
    %360 = arith.addf %359, %358 : vector<8x128xf32>
    %361 = arith.divf %359, %360 : vector<8x128xf32>
    %362 = arith.mulf %353, %335 : vector<8x128xf32>
    %363 = arith.mulf %347, %355 : vector<8x128xf32>
    %364 = arith.addf %362, %363 : vector<8x128xf32>
    %365 = math.tanh %364 : vector<8x128xf32>
    %366 = arith.mulf %361, %365 : vector<8x128xf32>
    %c3_122 = arith.constant 3 : index
    %c0_123 = arith.constant 0 : index
    %c0_124 = arith.constant 0 : index
    %367 = vector.load %arg10[%c3_122, %c0_123, %c0_124] : memref<8x8x512xf32, #tpu.memory_space<vmem>>, vector<1x8x512xf32>
    %368 = vector.shape_cast %367 : vector<1x8x512xf32> to vector<8x512xf32>
    %cst_125 = arith.constant dense<0.000000e+00> : vector<8x512xf32>
    %369 = tpu.matmul %366, %277, %cst_125 {dimension_numbers = #tpu.dot_dimension_numbers<[1], [0], [0], [1], [0, 0, 1, 1], [], []>} : vector<8x128xf32>, vector<128x512xf32>, vector<8x512xf32> -> vector<8x512xf32>
    %370 = arith.addf %368, %369 : vector<8x512xf32>
    %371 = vector.extract_strided_slice %370 {offsets = [0, 0], sizes = [8, 128], strides = [1, 1]} : vector<8x512xf32> to vector<8x128xf32>
    %372 = arith.negf %371 : vector<8x128xf32>
    %373 = math.exp %372 : vector<8x128xf32>
    %cst_126 = arith.constant 1.000000e+00 : f32
    %374 = vector.broadcast %cst_126 : f32 to vector<8x128xf32>
    %375 = arith.addf %374, %373 : vector<8x128xf32>
    %376 = arith.divf %374, %375 : vector<8x128xf32>
    %377 = vector.extract_strided_slice %370 {offsets = [0, 128], sizes = [8, 128], strides = [1, 1]} : vector<8x512xf32> to vector<8x128xf32>
    %378 = arith.negf %377 : vector<8x128xf32>
    %379 = math.exp %378 : vector<8x128xf32>
    %cst_127 = arith.constant 1.000000e+00 : f32
    %380 = vector.broadcast %cst_127 : f32 to vector<8x128xf32>
    %381 = arith.addf %380, %379 : vector<8x128xf32>
    %382 = arith.divf %380, %381 : vector<8x128xf32>
    %383 = vector.extract_strided_slice %370 {offsets = [0, 256], sizes = [8, 128], strides = [1, 1]} : vector<8x512xf32> to vector<8x128xf32>
    %384 = math.tanh %383 : vector<8x128xf32>
    %385 = vector.extract_strided_slice %370 {offsets = [0, 384], sizes = [8, 128], strides = [1, 1]} : vector<8x512xf32> to vector<8x128xf32>
    %386 = arith.negf %385 : vector<8x128xf32>
    %387 = math.exp %386 : vector<8x128xf32>
    %cst_128 = arith.constant 1.000000e+00 : f32
    %388 = vector.broadcast %cst_128 : f32 to vector<8x128xf32>
    %389 = arith.addf %388, %387 : vector<8x128xf32>
    %390 = arith.divf %388, %389 : vector<8x128xf32>
    %391 = arith.mulf %382, %364 : vector<8x128xf32>
    %392 = arith.mulf %376, %384 : vector<8x128xf32>
    %393 = arith.addf %391, %392 : vector<8x128xf32>
    %394 = math.tanh %393 : vector<8x128xf32>
    %395 = arith.mulf %390, %394 : vector<8x128xf32>
    %c4_129 = arith.constant 4 : index
    %c0_130 = arith.constant 0 : index
    %c0_131 = arith.constant 0 : index
    %396 = vector.load %arg10[%c4_129, %c0_130, %c0_131] : memref<8x8x512xf32, #tpu.memory_space<vmem>>, vector<1x8x512xf32>
    %397 = vector.shape_cast %396 : vector<1x8x512xf32> to vector<8x512xf32>
    %cst_132 = arith.constant dense<0.000000e+00> : vector<8x512xf32>
    %398 = tpu.matmul %395, %277, %cst_132 {dimension_numbers = #tpu.dot_dimension_numbers<[1], [0], [0], [1], [0, 0, 1, 1], [], []>} : vector<8x128xf32>, vector<128x512xf32>, vector<8x512xf32> -> vector<8x512xf32>
    %399 = arith.addf %397, %398 : vector<8x512xf32>
    %400 = vector.extract_strided_slice %399 {offsets = [0, 0], sizes = [8, 128], strides = [1, 1]} : vector<8x512xf32> to vector<8x128xf32>
    %401 = arith.negf %400 : vector<8x128xf32>
    %402 = math.exp %401 : vector<8x128xf32>
    %cst_133 = arith.constant 1.000000e+00 : f32
    %403 = vector.broadcast %cst_133 : f32 to vector<8x128xf32>
    %404 = arith.addf %403, %402 : vector<8x128xf32>
    %405 = arith.divf %403, %404 : vector<8x128xf32>
    %406 = vector.extract_strided_slice %399 {offsets = [0, 128], sizes = [8, 128], strides = [1, 1]} : vector<8x512xf32> to vector<8x128xf32>
    %407 = arith.negf %406 : vector<8x128xf32>
    %408 = math.exp %407 : vector<8x128xf32>
    %cst_134 = arith.constant 1.000000e+00 : f32
    %409 = vector.broadcast %cst_134 : f32 to vector<8x128xf32>
    %410 = arith.addf %409, %408 : vector<8x128xf32>
    %411 = arith.divf %409, %410 : vector<8x128xf32>
    %412 = vector.extract_strided_slice %399 {offsets = [0, 256], sizes = [8, 128], strides = [1, 1]} : vector<8x512xf32> to vector<8x128xf32>
    %413 = math.tanh %412 : vector<8x128xf32>
    %414 = vector.extract_strided_slice %399 {offsets = [0, 384], sizes = [8, 128], strides = [1, 1]} : vector<8x512xf32> to vector<8x128xf32>
    %415 = arith.negf %414 : vector<8x128xf32>
    %416 = math.exp %415 : vector<8x128xf32>
    %cst_135 = arith.constant 1.000000e+00 : f32
    %417 = vector.broadcast %cst_135 : f32 to vector<8x128xf32>
    %418 = arith.addf %417, %416 : vector<8x128xf32>
    %419 = arith.divf %417, %418 : vector<8x128xf32>
    %420 = arith.mulf %411, %393 : vector<8x128xf32>
    %421 = arith.mulf %405, %413 : vector<8x128xf32>
    %422 = arith.addf %420, %421 : vector<8x128xf32>
    %423 = math.tanh %422 : vector<8x128xf32>
    %424 = arith.mulf %419, %423 : vector<8x128xf32>
    %c5_136 = arith.constant 5 : index
    %c0_137 = arith.constant 0 : index
    %c0_138 = arith.constant 0 : index
    %425 = vector.load %arg10[%c5_136, %c0_137, %c0_138] : memref<8x8x512xf32, #tpu.memory_space<vmem>>, vector<1x8x512xf32>
    %426 = vector.shape_cast %425 : vector<1x8x512xf32> to vector<8x512xf32>
    %cst_139 = arith.constant dense<0.000000e+00> : vector<8x512xf32>
    %427 = tpu.matmul %424, %277, %cst_139 {dimension_numbers = #tpu.dot_dimension_numbers<[1], [0], [0], [1], [0, 0, 1, 1], [], []>} : vector<8x128xf32>, vector<128x512xf32>, vector<8x512xf32> -> vector<8x512xf32>
    %428 = arith.addf %426, %427 : vector<8x512xf32>
    %429 = vector.extract_strided_slice %428 {offsets = [0, 0], sizes = [8, 128], strides = [1, 1]} : vector<8x512xf32> to vector<8x128xf32>
    %430 = arith.negf %429 : vector<8x128xf32>
    %431 = math.exp %430 : vector<8x128xf32>
    %cst_140 = arith.constant 1.000000e+00 : f32
    %432 = vector.broadcast %cst_140 : f32 to vector<8x128xf32>
    %433 = arith.addf %432, %431 : vector<8x128xf32>
    %434 = arith.divf %432, %433 : vector<8x128xf32>
    %435 = vector.extract_strided_slice %428 {offsets = [0, 128], sizes = [8, 128], strides = [1, 1]} : vector<8x512xf32> to vector<8x128xf32>
    %436 = arith.negf %435 : vector<8x128xf32>
    %437 = math.exp %436 : vector<8x128xf32>
    %cst_141 = arith.constant 1.000000e+00 : f32
    %438 = vector.broadcast %cst_141 : f32 to vector<8x128xf32>
    %439 = arith.addf %438, %437 : vector<8x128xf32>
    %440 = arith.divf %438, %439 : vector<8x128xf32>
    %441 = vector.extract_strided_slice %428 {offsets = [0, 256], sizes = [8, 128], strides = [1, 1]} : vector<8x512xf32> to vector<8x128xf32>
    %442 = math.tanh %441 : vector<8x128xf32>
    %443 = vector.extract_strided_slice %428 {offsets = [0, 384], sizes = [8, 128], strides = [1, 1]} : vector<8x512xf32> to vector<8x128xf32>
    %444 = arith.negf %443 : vector<8x128xf32>
    %445 = math.exp %444 : vector<8x128xf32>
    %cst_142 = arith.constant 1.000000e+00 : f32
    %446 = vector.broadcast %cst_142 : f32 to vector<8x128xf32>
    %447 = arith.addf %446, %445 : vector<8x128xf32>
    %448 = arith.divf %446, %447 : vector<8x128xf32>
    %449 = arith.mulf %440, %422 : vector<8x128xf32>
    %450 = arith.mulf %434, %442 : vector<8x128xf32>
    %451 = arith.addf %449, %450 : vector<8x128xf32>
    %452 = math.tanh %451 : vector<8x128xf32>
    %453 = arith.mulf %448, %452 : vector<8x128xf32>
    %c6_143 = arith.constant 6 : index
    %c0_144 = arith.constant 0 : index
    %c0_145 = arith.constant 0 : index
    %454 = vector.load %arg10[%c6_143, %c0_144, %c0_145] : memref<8x8x512xf32, #tpu.memory_space<vmem>>, vector<1x8x512xf32>
    %455 = vector.shape_cast %454 : vector<1x8x512xf32> to vector<8x512xf32>
    %cst_146 = arith.constant dense<0.000000e+00> : vector<8x512xf32>
    %456 = tpu.matmul %453, %277, %cst_146 {dimension_numbers = #tpu.dot_dimension_numbers<[1], [0], [0], [1], [0, 0, 1, 1], [], []>} : vector<8x128xf32>, vector<128x512xf32>, vector<8x512xf32> -> vector<8x512xf32>
    %457 = arith.addf %455, %456 : vector<8x512xf32>
    %458 = vector.extract_strided_slice %457 {offsets = [0, 0], sizes = [8, 128], strides = [1, 1]} : vector<8x512xf32> to vector<8x128xf32>
    %459 = arith.negf %458 : vector<8x128xf32>
    %460 = math.exp %459 : vector<8x128xf32>
    %cst_147 = arith.constant 1.000000e+00 : f32
    %461 = vector.broadcast %cst_147 : f32 to vector<8x128xf32>
    %462 = arith.addf %461, %460 : vector<8x128xf32>
    %463 = arith.divf %461, %462 : vector<8x128xf32>
    %464 = vector.extract_strided_slice %457 {offsets = [0, 128], sizes = [8, 128], strides = [1, 1]} : vector<8x512xf32> to vector<8x128xf32>
    %465 = arith.negf %464 : vector<8x128xf32>
    %466 = math.exp %465 : vector<8x128xf32>
    %cst_148 = arith.constant 1.000000e+00 : f32
    %467 = vector.broadcast %cst_148 : f32 to vector<8x128xf32>
    %468 = arith.addf %467, %466 : vector<8x128xf32>
    %469 = arith.divf %467, %468 : vector<8x128xf32>
    %470 = vector.extract_strided_slice %457 {offsets = [0, 256], sizes = [8, 128], strides = [1, 1]} : vector<8x512xf32> to vector<8x128xf32>
    %471 = math.tanh %470 : vector<8x128xf32>
    %472 = vector.extract_strided_slice %457 {offsets = [0, 384], sizes = [8, 128], strides = [1, 1]} : vector<8x512xf32> to vector<8x128xf32>
    %473 = arith.negf %472 : vector<8x128xf32>
    %474 = math.exp %473 : vector<8x128xf32>
    %cst_149 = arith.constant 1.000000e+00 : f32
    %475 = vector.broadcast %cst_149 : f32 to vector<8x128xf32>
    %476 = arith.addf %475, %474 : vector<8x128xf32>
    %477 = arith.divf %475, %476 : vector<8x128xf32>
    %478 = arith.mulf %469, %451 : vector<8x128xf32>
    %479 = arith.mulf %463, %471 : vector<8x128xf32>
    %480 = arith.addf %478, %479 : vector<8x128xf32>
    %481 = math.tanh %480 : vector<8x128xf32>
    %482 = arith.mulf %477, %481 : vector<8x128xf32>
    %c7_150 = arith.constant 7 : index
    %c0_151 = arith.constant 0 : index
    %c0_152 = arith.constant 0 : index
    %483 = vector.load %arg10[%c7_150, %c0_151, %c0_152] : memref<8x8x512xf32, #tpu.memory_space<vmem>>, vector<1x8x512xf32>
    %484 = vector.shape_cast %483 : vector<1x8x512xf32> to vector<8x512xf32>
    %cst_153 = arith.constant dense<0.000000e+00> : vector<8x512xf32>
    %485 = tpu.matmul %482, %277, %cst_153 {dimension_numbers = #tpu.dot_dimension_numbers<[1], [0], [0], [1], [0, 0, 1, 1], [], []>} : vector<8x128xf32>, vector<128x512xf32>, vector<8x512xf32> -> vector<8x512xf32>
    %486 = arith.addf %484, %485 : vector<8x512xf32>
    %487 = vector.extract_strided_slice %486 {offsets = [0, 0], sizes = [8, 128], strides = [1, 1]} : vector<8x512xf32> to vector<8x128xf32>
    %488 = arith.negf %487 : vector<8x128xf32>
    %489 = math.exp %488 : vector<8x128xf32>
    %cst_154 = arith.constant 1.000000e+00 : f32
    %490 = vector.broadcast %cst_154 : f32 to vector<8x128xf32>
    %491 = arith.addf %490, %489 : vector<8x128xf32>
    %492 = arith.divf %490, %491 : vector<8x128xf32>
    %493 = vector.extract_strided_slice %486 {offsets = [0, 128], sizes = [8, 128], strides = [1, 1]} : vector<8x512xf32> to vector<8x128xf32>
    %494 = arith.negf %493 : vector<8x128xf32>
    %495 = math.exp %494 : vector<8x128xf32>
    %cst_155 = arith.constant 1.000000e+00 : f32
    %496 = vector.broadcast %cst_155 : f32 to vector<8x128xf32>
    %497 = arith.addf %496, %495 : vector<8x128xf32>
    %498 = arith.divf %496, %497 : vector<8x128xf32>
    %499 = vector.extract_strided_slice %486 {offsets = [0, 256], sizes = [8, 128], strides = [1, 1]} : vector<8x512xf32> to vector<8x128xf32>
    %500 = math.tanh %499 : vector<8x128xf32>
    %501 = vector.extract_strided_slice %486 {offsets = [0, 384], sizes = [8, 128], strides = [1, 1]} : vector<8x512xf32> to vector<8x128xf32>
    %502 = arith.negf %501 : vector<8x128xf32>
    %503 = math.exp %502 : vector<8x128xf32>
    %cst_156 = arith.constant 1.000000e+00 : f32
    %504 = vector.broadcast %cst_156 : f32 to vector<8x128xf32>
    %505 = arith.addf %504, %503 : vector<8x128xf32>
    %506 = arith.divf %504, %505 : vector<8x128xf32>
    %507 = arith.mulf %498, %480 : vector<8x128xf32>
    %508 = arith.mulf %492, %500 : vector<8x128xf32>
    %509 = arith.addf %507, %508 : vector<8x128xf32>
    %510 = math.tanh %509 : vector<8x128xf32>
    %511 = arith.mulf %506, %510 : vector<8x128xf32>
    %c0_157 = arith.constant 0 : index
    %c0_158 = arith.constant 0 : index
    %512 = vector.load %arg7[%c0_157, %c0_158] : memref<128x128xf32, #tpu.memory_space<vmem>>, vector<128x128xf32>
    %cst_159 = arith.constant dense<0.000000e+00> : vector<8x128xf32>
    %513 = tpu.matmul %511, %512, %cst_159 {dimension_numbers = #tpu.dot_dimension_numbers<[1], [0], [0], [1], [0, 0, 1, 1], [], []>} : vector<8x128xf32>, vector<128x128xf32>, vector<8x128xf32> -> vector<8x128xf32>
    %c0_160 = arith.constant 0 : index
    %c0_161 = arith.constant 0 : index
    %514 = vector.load %arg8[%c0_160, %c0_161] : memref<1x128xf32, #tpu.memory_space<vmem>>, vector<1x128xf32>
    %515 = vector.broadcast %514 : vector<1x128xf32> to vector<8x128xf32>
    %516 = arith.addf %513, %515 : vector<8x128xf32>
    %c0_162 = arith.constant 0 : index
    %c0_163 = arith.constant 0 : index
    %517 = vector.load %arg9[%c0_162, %c0_163] : memref<8x128xf32, #tpu.memory_space<vmem>>, vector<8x128xf32>
    tpu.vector_store %arg9[%c0_162, %c0_163], %516 {strides = array<i32>} : memref<8x128xf32, #tpu.memory_space<vmem>>, vector<8x128xf32>,
    return
  }
}

</mosaic_0001>

<bundles_post_ra>
// kernel: lstm_classifier_forward.1
= control target key start
LH: loop header
LB: loop body
LE: loop exit
PB: predicated region body
PF: predicated region fallthrough
CT: control target
= control target key end

     0   :  { %14 = vsyncpa [#allocation5], 0  ;;  %s6690_s0 = inlined_call_operand.vmem [shape: f32[8,8,128], index: 0, kind: input, shape index: {}]   ;;  %s6691_s1 = inlined_call_operand.vmem [shape: f32[128,512], index: 1, kind: input, shape index: {}]   ;;  %s6692_s2 = inlined_call_operand.hbm [shape: f32[128,512], index: 2, kind: input, shape index: {}]   ;;  %s6693_s3 = inlined_call_operand.hbm [shape: f32[128,512], index: 3, kind: input, shape index: {}]   ;;  %s6694_s4 = inlined_call_operand.hbm [shape: f32[128,512], index: 4, kind: input, shape index: {}]   ;;  %s6695_s5 = inlined_call_operand.vmem [shape: f32[1,512], index: 5, kind: input, shape index: {}]   ;;  %s6696_s6 = inlined_call_operand.vmem [shape: f32[1,512], index: 6, kind: input, shape index: {}]   ;;  %s6697_s7 = inlined_call_operand.vmem [shape: f32[128,128], index: 7, kind: input, shape index: {}]   ;;  %s6698_s8 = inlined_call_operand.vmem [shape: f32[1,128], index: 8, kind: input, shape index: {}]   ;;  %s6699_s9 = inlined_call_operand.vmem [shape: f32[8,128], index: 9, kind: output, shape index: {}]  }
   0x1   :  { %15 = vsyncpa [#allocation7], 0  ;;  %s4367_s30 = smov [#allocation6]   ;;  %s4368_s11 = smov [#allocation4]  }
   0x2   :  { %s37_s10 = sshll.u32 %s4367_s30, 4  ;;  %s25_s12 = sshll.u32 %s4368_s11, 4  ;;  %s38_s10 = int_to_ptr.vmem [resolvable:$true] %s37_s10  ;;  %s26_s12 = int_to_ptr.vmem [resolvable:$true] %s25_s12 }
   0x3   :  { %s4311_s13 = scalar_lea.vmem %s38_s10, 8192  ;;  %p4316_p1 = scmp.lt.s32.totalorder %s38_s10, %s38_s10 }
   0x4   :  { %p4312_p0 = scmp.ne.s32.totalorder %s38_s10, %s4311_s13  ;;  %p4317_p2 = scmp.lt.s32.totalorder %s4311_s13, %s4311_s13 }
   0x6   :  { %p4318_p3 = por %p4317_p2, %p4316_p1 }
   0x8   :  { %p4319_p4 = pnand %p4318_p3, %p4312_p0 }
   0xa   :  { %4322 = shalt.err (!%p4319_p4)
}
   0xb   :  { %s4369_s14 = smov 512   ;;  %s4370_s15 = smov 32  }
   0xc   :  { %43 = dma.hbm_to_vmem [thread:$0]  %s6693_s3, 8192, %s38_s10, [#allocation7], %s4369_s14, %s4369_s14, %s4370_s15  }
   0xd   :  { %s4331_s18 = scalar_lea.vmem %s26_s12, 8192  ;;  %p4336_p6 = scmp.lt.s32.totalorder %s26_s12, %s26_s12 }
   0xe   :  { %p4332_p5 = scmp.ne.s32.totalorder %s26_s12, %s4331_s18  ;;  %p4337_p7 = scmp.lt.s32.totalorder %s4331_s18, %s4331_s18 }
  0x10   :  { %p4338_p8 = por %p4337_p7, %p4336_p6 }
  0x12   :  { %p4339_p9 = pnand %p4338_p8, %p4332_p5 }
  0x14   :  { %4342 = shalt.err (!%p4339_p9)
}
  0x15   :  { %31 = dma.hbm_to_vmem [thread:$0]  %s6692_s2, 8192, %s26_s12, [#allocation5], %s4369_s14, %s4369_s14, %s4370_s15  }
  0x16   :  { %s4371_s21 = smov [#allocation8]  }
  0x17   :  { %s49_s22 = sshll.u32 %s4371_s21, 4  ;;  %s50_s22 = int_to_ptr.vmem [resolvable:$true] %s49_s22 }
  0x18   :  { %s4351_s23 = scalar_lea.vmem %s50_s22, 8192  ;;  %p4356_p11 = scmp.lt.s32.totalorder %s50_s22, %s50_s22 }
  0x19   :  { %p4352_p10 = scmp.ne.s32.totalorder %s50_s22, %s4351_s23  ;;  %p4357_p12 = scmp.lt.s32.totalorder %s4351_s23, %s4351_s23 }
  0x1b   :  { %p4358_p13 = por %p4357_p12, %p4356_p11 }
  0x1d   :  { %p4359_p0 = pnand %p4358_p13, %p4352_p10 }
  0x1f   :  { %4362 = shalt.err (!%p4359_p0)
}
  0x20   :  { %55 = dma.hbm_to_vmem [thread:$0]  %s6694_s4, 8192, %s50_s22, [#allocation7], %s4369_s14, %s4369_s14, %s4370_s15  }
  0x21   :  { %4363 = dma.done.wait [#allocation5], 8192  }
  0x22   :  { %4364 = vsyncadd [#allocation5], 4294959104 }
  0x23   :  { %4365 = dma.done.wait [#allocation7], 16384  }
  0x24   :  { %4366 = vsyncadd [#allocation7], 4294950912  ;;  %v6700_v0 = vmov 0.0   ;;  %v142_v1 = vld [vmem:[%s6691_s1 + $0x1e8] sm:$0xff]  ;;  %v144_v2 = vld [vmem:[%s6691_s1 + $0x1f8] sm:$0xff]  ;;  %vm4373_vm0 = vmmov 0  }
  0x25   :  { %231 = vmatprep.mubr.f32.mxu0 %v6700_v0  ;;  %344 = vmatprep.mubr.f32.mxu1 %v6700_v0  ;;  %v141_v3 = vld [vmem:[%s6691_s1 + $0x1e0] sm:$0xff]  ;;  %v143_v4 = vld [vmem:[%s6691_s1 + $0x1f0] sm:$0xff]  ;;  %v138_v5 = vld [vmem:[%s6691_s1 + $0x1c8] sm:$0xff] }
  0x26   :  { %167 = vmatprep.subr.mxu0 %v142_v1  ;;  %280 = vmatprep.subr.mxu1 %v144_v2  ;;  %v140_v6 = vld [vmem:[%s6691_s1 + $0x1d8] sm:$0xff]  ;;  %v137_v7 = vld [vmem:[%s6691_s1 + $0x1c0] sm:$0xff]  ;;  %v139_v8 = vld [vmem:[%s6691_s1 + $0x1d0] sm:$0xff] }
  0x27   :  { %168 = vmatpush1.msra.mxu0 %v141_v3  ;;  %281 = vmatpush1.msra.mxu1 %v143_v4  ;;  %v134_v9 = vld [vmem:[%s6691_s1 + $0x1a8] sm:$0xff]  ;;  %v136_v10 = vld [vmem:[%s6691_s1 + $0x1b8] sm:$0xff]  ;;  %v133_v11 = vld [vmem:[%s6691_s1 + $0x1a0] sm:$0xff] }
  0x28   :  { %169 = vmatprep.subr.mxu0 %v138_v5  ;;  %282 = vmatprep.subr.mxu1 %v140_v6  ;;  %v135_v12 = vld [vmem:[%s6691_s1 + $0x1b0] sm:$0xff]  ;;  %v130_v13 = vld [vmem:[%s6691_s1 + $0x188] sm:$0xff]  ;;  %v132_v14 = vld [vmem:[%s6691_s1 + $0x198] sm:$0xff] }
  0x29   :  { %170 = vmatpush1.msra.mxu0 %v137_v7  ;;  %283 = vmatpush1.msra.mxu1 %v139_v8  ;;  %v129_v15 = vld [vmem:[%s6691_s1 + $0x180] sm:$0xff]  ;;  %v131_v16 = vld [vmem:[%s6691_s1 + $0x190] sm:$0xff]  ;;  %v126_v17 = vld [vmem:[%s6691_s1 + $0x168] sm:$0xff] }
  0x2a   :  { %171 = vmatprep.subr.mxu0 %v134_v9  ;;  %284 = vmatprep.subr.mxu1 %v136_v10  ;;  %v128_v18 = vld [vmem:[%s6691_s1 + $0x178] sm:$0xff]  ;;  %v125_v19 = vld [vmem:[%s6691_s1 + $0x160] sm:$0xff]  ;;  %v127_v20 = vld [vmem:[%s6691_s1 + $0x170] sm:$0xff] }
  0x2b   :  { %172 = vmatpush1.msra.mxu0 %v133_v11  ;;  %285 = vmatpush1.msra.mxu1 %v135_v12  ;;  %v122_v21 = vld [vmem:[%s6691_s1 + $0x148] sm:$0xff]  ;;  %v124_v22 = vld [vmem:[%s6691_s1 + $0x158] sm:$0xff]  ;;  %v121_v23 = vld [vmem:[%s6691_s1 + $0x140] sm:$0xff] }
  0x2c   :  { %173 = vmatprep.subr.mxu0 %v130_v13  ;;  %286 = vmatprep.subr.mxu1 %v132_v14  ;;  %v123_v24 = vld [vmem:[%s6691_s1 + $0x150] sm:$0xff]  ;;  %v118_v25 = vld [vmem:[%s6691_s1 + $0x128] sm:$0xff]  ;;  %v120_v26 = vld [vmem:[%s6691_s1 + $0x138] sm:$0xff] }
  0x2d   :  { %174 = vmatpush1.msra.mxu0 %v129_v15  ;;  %287 = vmatpush1.msra.mxu1 %v131_v16  ;;  %v117_v27 = vld [vmem:[%s6691_s1 + $0x120] sm:$0xff]  ;;  %v119_v28 = vld [vmem:[%s6691_s1 + $0x130] sm:$0xff]  ;;  %v114_v29 = vld [vmem:[%s6691_s1 + $0x108] sm:$0xff] }
  0x2e   :  { %175 = vmatprep.subr.mxu0 %v126_v17  ;;  %288 = vmatprep.subr.mxu1 %v128_v18  ;;  %v116_v30 = vld [vmem:[%s6691_s1 + $0x118] sm:$0xff]  ;;  %v113_v31 = vld [vmem:[%s6691_s1 + $0x100] sm:$0xff]  ;;  %v115_v32 = vld [vmem:[%s6691_s1 + $0x110] sm:$0xff] }
  0x2f   :  { %176 = vmatpush1.msra.mxu0 %v125_v19  ;;  %289 = vmatpush1.msra.mxu1 %v127_v20  ;;  %v110_v33 = vld [vmem:[%s6691_s1 + $0xe8] sm:$0xff]  ;;  %v112_v34 = vld [vmem:[%s6691_s1 + $0xf8] sm:$0xff]  ;;  %v109_v35 = vld [vmem:[%s6691_s1 + $0xe0] sm:$0xff] }
  0x30   :  { %177 = vmatprep.subr.mxu0 %v122_v21  ;;  %290 = vmatprep.subr.mxu1 %v124_v22  ;;  %v111_v36 = vld [vmem:[%s6691_s1 + $0xf0] sm:$0xff]  ;;  %v106_v37 = vld [vmem:[%s6691_s1 + $0xc8] sm:$0xff]  ;;  %v108_v38 = vld [vmem:[%s6691_s1 + $0xd8] sm:$0xff] }
  0x31   :  { %178 = vmatpush1.msra.mxu0 %v121_v23  ;;  %291 = vmatpush1.msra.mxu1 %v123_v24  ;;  %v105_v39 = vld [vmem:[%s6691_s1 + $0xc0] sm:$0xff]  ;;  %v107_v40 = vld [vmem:[%s6691_s1 + $0xd0] sm:$0xff]  ;;  %v102_v41 = vld [vmem:[%s6691_s1 + $0xa8] sm:$0xff] }
  0x32   :  { %179 = vmatprep.subr.mxu0 %v118_v25  ;;  %292 = vmatprep.subr.mxu1 %v120_v26  ;;  %v104_v42 = vld [vmem:[%s6691_s1 + $0xb8] sm:$0xff]  ;;  %v101_v43 = vld [vmem:[%s6691_s1 + $0xa0] sm:$0xff]  ;;  %v103_v44 = vld [vmem:[%s6691_s1 + $0xb0] sm:$0xff] }
  0x33   :  { %180 = vmatpush1.msra.mxu0 %v117_v27  ;;  %293 = vmatpush1.msra.mxu1 %v119_v28  ;;  %v98_v45 = vld [vmem:[%s6691_s1 + $0x88] sm:$0xff]  ;;  %v100_v46 = vld [vmem:[%s6691_s1 + $0x98] sm:$0xff]  ;;  %v97_v47 = vld [vmem:[%s6691_s1 + $0x80] sm:$0xff] }
  0x34   :  { %181 = vmatprep.subr.mxu0 %v114_v29  ;;  %294 = vmatprep.subr.mxu1 %v116_v30  ;;  %v99_v48 = vld [vmem:[%s6691_s1 + $0x90] sm:$0xff]  ;;  %v94_v49 = vld [vmem:[%s6691_s1 + $0x68] sm:$0xff]  ;;  %v96_v50 = vld [vmem:[%s6691_s1 + $0x78] sm:$0xff] }
  0x35   :  { %182 = vmatpush1.msra.mxu0 %v113_v31  ;;  %295 = vmatpush1.msra.mxu1 %v115_v32  ;;  %v93_v51 = vld [vmem:[%s6691_s1 + $0x60] sm:$0xff]  ;;  %v95_v52 = vld [vmem:[%s6691_s1 + $0x70] sm:$0xff]  ;;  %v90_v53 = vld [vmem:[%s6691_s1 + $0x48] sm:$0xff] }
  0x36   :  { %183 = vmatprep.subr.mxu0 %v110_v33  ;;  %296 = vmatprep.subr.mxu1 %v112_v34  ;;  %v92_v54 = vld [vmem:[%s6691_s1 + $0x58] sm:$0xff]  ;;  %v89_v55 = vld [vmem:[%s6691_s1 + $0x40] sm:$0xff]  ;;  %v91_v56 = vld [vmem:[%s6691_s1 + $0x50] sm:$0xff] }
  0x37   :  { %184 = vmatpush1.msra.mxu0 %v109_v35  ;;  %297 = vmatpush1.msra.mxu1 %v111_v36  ;;  %v86_v57 = vld [vmem:[%s6691_s1 + $0x28] sm:$0xff]  ;;  %v88_v58 = vld [vmem:[%s6691_s1 + $0x38] sm:$0xff]  ;;  %v85_v59 = vld [vmem:[%s6691_s1 + $0x20] sm:$0xff] }
  0x38   :  { %185 = vmatprep.subr.mxu0 %v106_v37  ;;  %298 = vmatprep.subr.mxu1 %v108_v38  ;;  %v87_v60 = vld [vmem:[%s6691_s1 + $0x30] sm:$0xff]  ;;  %v82_v61 = vld [vmem:[%s6691_s1 + $0x8] sm:$0xff]  ;;  %v84_v62 = vld [vmem:[%s6691_s1 + $0x18] sm:$0xff] }
  0x39   :  { %186 = vmatpush1.msra.mxu0 %v105_v39  ;;  %299 = vmatpush1.msra.mxu1 %v107_v40  ;;  %v81_v63 = vld [vmem:[%s6691_s1] sm:$0xff]  ;;  %v83_v1 = vld [vmem:[%s6691_s1 + $0x10] sm:$0xff]  ;;  %v4630_v3 = vld [vmem:[#allocation6 + $0x1e8] sm:$0xff] }
  0x3a   :  { %187 = vmatprep.subr.mxu0 %v102_v41  ;;  %300 = vmatprep.subr.mxu1 %v104_v42  ;;  %v73_v2 = vld [vmem:[%s6690_s0] sm:$0xff]  ;;  %6906 = vst [vmem:[#allocation11_spill] sm:$0xff] %v4630_v3  ;;  %v4632_v4 = vld [vmem:[#allocation6 + $0x1f8] sm:$0xff]  ;;  %v4636_v6 = vld [vmem:[#allocation6 + $0x1f0] sm:$0xff] }
  0x3b   :  { %188 = vmatpush1.msra.mxu0 %v101_v43  ;;  %301 = vmatpush1.msra.mxu1 %v103_v44  ;;  %6907 = vst [vmem:[#allocation12_spill] sm:$0xff] %v4632_v4  ;;  %v4634_v5 = vld [vmem:[#allocation6 + $0x1e0] sm:$0xff]  ;;  %v4638_v7 = vld [vmem:[#allocation6 + $0x1c8] sm:$0xff]  ;;  %v4640_v8 = vld [vmem:[#allocation6 + $0x1d8] sm:$0xff] }
  0x3c   :  { %189 = vmatprep.subr.mxu0 %v98_v45  ;;  %302 = vmatprep.subr.mxu1 %v100_v46  ;;  %v4646_v9 = vld [vmem:[#allocation6 + $0x1c0] sm:$0xff]  ;;  %v4648_v10 = vld [vmem:[#allocation6 + $0x1d0] sm:$0xff]  ;;  %v74_v11 = vld [vmem:[%s6690_s0 + $0x8] sm:$0xff] }
  0x3d   :  { %190 = vmatpush1.msra.mxu0 %v97_v47  ;;  %303 = vmatpush1.msra.mxu1 %v99_v48  ;;  %v4657_v12 = vld [vmem:[#allocation6 + $0x1a8] sm:$0xff]  ;;  %v4659_v13 = vld [vmem:[#allocation6 + $0x1b8] sm:$0xff]  ;;  %v4663_v14 = vld [vmem:[#allocation6 + $0x1a0] sm:$0xff] }
  0x3e   :  { %191 = vmatprep.subr.mxu0 %v94_v49  ;;  %304 = vmatprep.subr.mxu1 %v96_v50  ;;  %v4665_v15 = vld [vmem:[#allocation6 + $0x1b0] sm:$0xff]  ;;  %v4667_v16 = vld [vmem:[#allocation6 + $0x188] sm:$0xff]  ;;  %v4669_v17 = vld [vmem:[#allocation6 + $0x198] sm:$0xff] }
  0x3f   :  { %192 = vmatpush1.msra.mxu0 %v93_v51  ;;  %305 = vmatpush1.msra.mxu1 %v95_v52  ;;  %v4675_v18 = vld [vmem:[#allocation6 + $0x180] sm:$0xff]  ;;  %v4677_v19 = vld [vmem:[#allocation6 + $0x190] sm:$0xff]  ;;  %v4686_v21 = vld [vmem:[#allocation6 + $0x168] sm:$0xff] }
  0x40   :  { %193 = vmatprep.subr.mxu0 %v90_v53  ;;  %306 = vmatprep.subr.mxu1 %v92_v54  ;;  %v75_v20 = vld [vmem:[%s6690_s0 + $0x10] sm:$0xff]  ;;  %v4688_v22 = vld [vmem:[#allocation6 + $0x178] sm:$0xff]  ;;  %v4692_v23 = vld [vmem:[#allocation6 + $0x160] sm:$0xff] }
  0x41   :  { %194 = vmatpush1.msra.mxu0 %v89_v55  ;;  %307 = vmatpush1.msra.mxu1 %v91_v56  ;;  %v4694_v24 = vld [vmem:[#allocation6 + $0x170] sm:$0xff]  ;;  %v4696_v25 = vld [vmem:[#allocation6 + $0x148] sm:$0xff]  ;;  %v4698_v26 = vld [vmem:[#allocation6 + $0x158] sm:$0xff] }
  0x42   :  { %195 = vmatprep.subr.mxu0 %v86_v57  ;;  %308 = vmatprep.subr.mxu1 %v88_v58  ;;  %v4704_v27 = vld [vmem:[#allocation6 + $0x140] sm:$0xff]  ;;  %v4706_v28 = vld [vmem:[#allocation6 + $0x150] sm:$0xff]  ;;  %v76_v29 = vld [vmem:[%s6690_s0 + $0x18] sm:$0xff] }
  0x43   :  { %196 = vmatpush1.msra.mxu0 %v85_v59  ;;  %309 = vmatpush1.msra.mxu1 %v87_v60  ;;  %v4715_v30 = vld [vmem:[#allocation6 + $0x128] sm:$0xff]  ;;  %v4717_v31 = vld [vmem:[#allocation6 + $0x138] sm:$0xff]  ;;  %v4721_v32 = vld [vmem:[#allocation6 + $0x120] sm:$0xff] }
  0x44   :  { %197 = vmatprep.subr.mxu0 %v82_v61  ;;  %310 = vmatprep.subr.mxu1 %v84_v62  ;;  %v4723_v33 = vld [vmem:[#allocation6 + $0x130] sm:$0xff]  ;;  %v4725_v34 = vld [vmem:[#allocation6 + $0x108] sm:$0xff]  ;;  %v4727_v35 = vld [vmem:[#allocation6 + $0x118] sm:$0xff] }
  0x45   :  { %198 = vmatpush1.msra.mxu0 %v81_v63  ;;  %311 = vmatpush1.msra.mxu1 %v83_v1  ;;  %v4733_v36 = vld [vmem:[#allocation6 + $0x100] sm:$0xff]  ;;  %v4735_v37 = vld [vmem:[#allocation6 + $0x110] sm:$0xff]  ;;  %v4744_v39 = vld [vmem:[#allocation6 + $0xe8] sm:$0xff] }
  0x46   :  { %232 = vmatmul.mubr.f32.vlgmr.msra.gmra.mxu0 %v73_v2  ;;  %345 = vmatmul.mubr.f32.vlgmr.msra.gmra.mxu1 %v73_v2  ;;  %v77_v38 = vld [vmem:[%s6690_s0 + $0x20] sm:$0xff]  ;;  %v4746_v40 = vld [vmem:[#allocation6 + $0xf8] sm:$0xff]  ;;  %v4752_v42 = vld [vmem:[#allocation6 + $0xf0] sm:$0xff] }
  0x47   :  { %493 = vmatprep.subr.mxu0 %v4630_v3  ;;  %564 = vmatprep.subr.mxu1 %v4632_v4  ;;  %v4750_v41 = vld [vmem:[#allocation6 + $0xe0] sm:$0xff]  ;;  %v4754_v43 = vld [vmem:[#allocation6 + $0xc8] sm:$0xff]  ;;  %v4756_v44 = vld [vmem:[#allocation6 + $0xd8] sm:$0xff] }
  0x48   :  { %494 = vmatpush1.msra.mxu0 %v4634_v5  ;;  %565 = vmatpush1.msra.mxu1 %v4636_v6  ;;  %v4762_v45 = vld [vmem:[#allocation6 + $0xc0] sm:$0xff]  ;;  %v4764_v46 = vld [vmem:[#allocation6 + $0xd0] sm:$0xff]  ;;  %v78_v47 = vld [vmem:[%s6690_s0 + $0x28] sm:$0xff] }
  0x49   :  { %495 = vmatprep.subr.mxu0 %v4638_v7  ;;  %566 = vmatprep.subr.mxu1 %v4640_v8  ;;  %v4773_v48 = vld [vmem:[#allocation6 + $0xa8] sm:$0xff]  ;;  %v4775_v49 = vld [vmem:[#allocation6 + $0xb8] sm:$0xff]  ;;  %v4779_v50 = vld [vmem:[#allocation6 + $0xa0] sm:$0xff] }
  0x4a   :  { %237 = vmatprep.mubr.f32.mxu0 %v6700_v0  ;;  %350 = vmatprep.mubr.f32.mxu1 %v6700_v0  ;;  %v4781_v51 = vld [vmem:[#allocation6 + $0xb0] sm:$0xff]  ;;  %v4783_v52 = vld [vmem:[#allocation6 + $0x88] sm:$0xff]  ;;  %v4785_v53 = vld [vmem:[#allocation6 + $0x98] sm:$0xff] }
  0x4b   :  { %496 = vmatpush1.msra.mxu0 %v4646_v9  ;;  %567 = vmatpush1.msra.mxu1 %v4648_v10  ;;  %6908 = vst [vmem:[#allocation13_spill] sm:$0xff] %v4781_v51  ;;  %6909 = vst [vmem:[#allocation14_spill] sm:$0xff] %v4783_v52  ;;  %v4791_v54 = vld [vmem:[#allocation6 + $0x80] sm:$0xff]  ;;  %v4793_v55 = vld [vmem:[#allocation6 + $0x90] sm:$0xff] }
  0x4c   :  { %238 = vmatmul.mubr.f32.gmra.mxu0 %v74_v11  ;;  %351 = vmatmul.mubr.f32.gmra.mxu1 %v74_v11  ;;  %6910 = vst [vmem:[#allocation15_spill] sm:$0xff] %v4785_v53  ;;  %6911 = vst [vmem:[#allocation16_spill] sm:$0xff] %v4791_v54  ;;  %v79_v56 = vld [vmem:[%s6690_s0 + $0x30] sm:$0xff]  ;;  %v4802_v57 = vld [vmem:[#allocation6 + $0x68] sm:$0xff] }
  0x4d   :  { %497 = vmatprep.subr.mxu0 %v4657_v12  ;;  %568 = vmatprep.subr.mxu1 %v4659_v13  ;;  %6912 = vst [vmem:[#allocation17_spill] sm:$0xff] %v4793_v55  ;;  %6913 = vst [vmem:[#allocation18_spill] sm:$0xff] %v4802_v57  ;;  %v4804_v58 = vld [vmem:[#allocation6 + $0x78] sm:$0xff]  ;;  %v4808_v59 = vld [vmem:[#allocation6 + $0x60] sm:$0xff] }
  0x4e   :  { %498 = vmatpush1.msra.mxu0 %v4663_v14  ;;  %569 = vmatpush1.msra.mxu1 %v4665_v15  ;;  %6914 = vst [vmem:[#allocation19_spill] sm:$0xff] %v4804_v58  ;;  %6915 = vst [vmem:[#allocation20_spill] sm:$0xff] %v4808_v59  ;;  %v4810_v60 = vld [vmem:[#allocation6 + $0x70] sm:$0xff]  ;;  %v4812_v61 = vld [vmem:[#allocation6 + $0x48] sm:$0xff] }
  0x4f   :  { %499 = vmatprep.subr.mxu0 %v4667_v16  ;;  %570 = vmatprep.subr.mxu1 %v4669_v17  ;;  %6916 = vst [vmem:[#allocation21_spill] sm:$0xff] %v4810_v60  ;;  %6917 = vst [vmem:[#allocation22_spill] sm:$0xff] %v4812_v61  ;;  %v4814_v62 = vld [vmem:[#allocation6 + $0x58] sm:$0xff]  ;;  %v4820_v63 = vld [vmem:[#allocation6 + $0x40] sm:$0xff] }
  0x50   :  { %243 = vmatprep.mubr.f32.mxu0 %v6700_v0  ;;  %356 = vmatprep.mubr.f32.mxu1 %v6700_v0  ;;  %6918 = vst [vmem:[#allocation23_spill] sm:$0xff] %v4814_v62  ;;  %6919 = vst [vmem:[#allocation24_spill] sm:$0xff] %v4820_v63  ;;  %v4822_v1 = vld [vmem:[#allocation6 + $0x50] sm:$0xff]  ;;  %v80_v2 = vld [vmem:[%s6690_s0 + $0x38] sm:$0xff] }
  0x51   :  { %500 = vmatpush1.msra.mxu0 %v4675_v18  ;;  %571 = vmatpush1.msra.mxu1 %v4677_v19  ;;  %6920 = vst [vmem:[#allocation25_spill] sm:$0xff] %v4822_v1  ;;  %v4831_v11 = vld [vmem:[#allocation6 + $0x28] sm:$0xff] }
  0x52   :  { %244 = vmatmul.mubr.f32.gmra.mxu0 %v75_v20  ;;  %357 = vmatmul.mubr.f32.gmra.mxu1 %v75_v20  ;;  %6921 = vst [vmem:[#allocation26_spill] sm:$0xff] %v4831_v11  ;;  %v4833_v20 = vld [vmem:[#allocation6 + $0x38] sm:$0xff] }
  0x53   :  { %501 = vmatprep.subr.mxu0 %v4686_v21  ;;  %572 = vmatprep.subr.mxu1 %v4688_v22  ;;  %6922 = vst [vmem:[#allocation27_spill] sm:$0xff] %v4833_v20 }
  0x54   :  { %502 = vmatpush1.msra.mxu0 %v4692_v23  ;;  %573 = vmatpush1.msra.mxu1 %v4694_v24 }
  0x55   :  { %503 = vmatprep.subr.mxu0 %v4696_v25  ;;  %574 = vmatprep.subr.mxu1 %v4698_v26 }
  0x56   :  { %249 = vmatprep.mubr.f32.mxu0 %v6700_v0  ;;  %362 = vmatprep.mubr.f32.mxu1 %v6700_v0 }
  0x57   :  { %504 = vmatpush1.msra.mxu0 %v4704_v27  ;;  %575 = vmatpush1.msra.mxu1 %v4706_v28 }
  0x58   :  { %250 = vmatmul.mubr.f32.gmra.mxu0 %v76_v29  ;;  %363 = vmatmul.mubr.f32.gmra.mxu1 %v76_v29  ;;  %v4837_v29 = vld [vmem:[#allocation6 + $0x20] sm:$0xff] }
  0x59   :  { %505 = vmatprep.subr.mxu0 %v4715_v30  ;;  %576 = vmatprep.subr.mxu1 %v4717_v31  ;;  %6923 = vst [vmem:[#allocation28_spill] sm:$0xff] %v4837_v29 }
  0x5a   :  { %506 = vmatpush1.msra.mxu0 %v4721_v32  ;;  %577 = vmatpush1.msra.mxu1 %v4723_v33 }
  0x5b   :  { %507 = vmatprep.subr.mxu0 %v4725_v34  ;;  %578 = vmatprep.subr.mxu1 %v4727_v35 }
  0x5c   :  { %255 = vmatprep.mubr.f32.mxu0 %v6700_v0  ;;  %368 = vmatprep.mubr.f32.mxu1 %v6700_v0 }
  0x5d   :  { %508 = vmatpush1.msra.mxu0 %v4733_v36  ;;  %579 = vmatpush1.msra.mxu1 %v4735_v37 }
  0x5e   :  { %256 = vmatmul.mubr.f32.gmra.mxu0 %v77_v38  ;;  %369 = vmatmul.mubr.f32.gmra.mxu1 %v77_v38  ;;  %v4839_v38 = vld [vmem:[#allocation6 + $0x30] sm:$0xff] }
  0x5f   :  { %509 = vmatprep.subr.mxu0 %v4744_v39  ;;  %580 = vmatprep.subr.mxu1 %v4746_v40  ;;  %6924 = vst [vmem:[#allocation29_spill] sm:$0xff] %v4839_v38 }
  0x60   :  { %510 = vmatpush1.msra.mxu0 %v4750_v41  ;;  %581 = vmatpush1.msra.mxu1 %v4752_v42 }
  0x61   :  { %511 = vmatprep.subr.mxu0 %v4754_v43  ;;  %582 = vmatprep.subr.mxu1 %v4756_v44 }
  0x62   :  { %261 = vmatprep.mubr.f32.mxu0 %v6700_v0  ;;  %374 = vmatprep.mubr.f32.mxu1 %v6700_v0 }
  0x63   :  { %512 = vmatpush1.msra.mxu0 %v4762_v45  ;;  %583 = vmatpush1.msra.mxu1 %v4764_v46 }
  0x64   :  { %262 = vmatmul.mubr.f32.gmra.mxu0 %v78_v47  ;;  %375 = vmatmul.mubr.f32.gmra.mxu1 %v78_v47  ;;  %v4841_v47 = vld [vmem:[#allocation6 + $0x8] sm:$0xff] }
  0x65   :  { %513 = vmatprep.subr.mxu0 %v4773_v48  ;;  %584 = vmatprep.subr.mxu1 %v4775_v49  ;;  %6925 = vst [vmem:[#allocation30_spill] sm:$0xff] %v4841_v47 }
  0x66   :  { %514 = vmatpush1.msra.mxu0 %v4779_v50  ;;  %585 = vmatpush1.msra.mxu1 %v4781_v51 }
  0x67   :  { %515 = vmatprep.subr.mxu0 %v4783_v52  ;;  %586 = vmatprep.subr.mxu1 %v4785_v53 }
  0x68   :  { %267 = vmatprep.mubr.f32.mxu0 %v6700_v0  ;;  %380 = vmatprep.mubr.f32.mxu1 %v6700_v0 }
  0x69   :  { %516 = vmatpush1.msra.mxu0 %v4791_v54  ;;  %587 = vmatpush1.msra.mxu1 %v4793_v55 }
  0x6a   :  { %268 = vmatmul.mubr.f32.gmra.mxu0 %v79_v56  ;;  %381 = vmatmul.mubr.f32.gmra.mxu1 %v79_v56  ;;  %v4843_v56 = vld [vmem:[#allocation6 + $0x18] sm:$0xff] }
  0x6b   :  { %517 = vmatprep.subr.mxu0 %v4802_v57  ;;  %588 = vmatprep.subr.mxu1 %v4804_v58  ;;  %6926 = vst [vmem:[#allocation31_spill] sm:$0xff] %v4843_v56 }
  0x6c   :  { %518 = vmatpush1.msra.mxu0 %v4808_v59  ;;  %589 = vmatpush1.msra.mxu1 %v4810_v60 }
  0x6d   :  { %519 = vmatprep.subr.mxu0 %v4812_v61  ;;  %590 = vmatprep.subr.mxu1 %v4814_v62 }
  0x6e   :  { %273 = vmatprep.mubr.f32.mxu0 %v6700_v0  ;;  %386 = vmatprep.mubr.f32.mxu1 %v6700_v0  ;;  %v4847_v0 = vld [vmem:[#allocation6] sm:$0xff] }
  0x6f   :  { %520 = vmatpush1.msra.mxu0 %v4820_v63  ;;  %591 = vmatpush1.msra.mxu1 %v4822_v1  ;;  %6927 = vst [vmem:[#allocation32_spill] sm:$0xff] %v4847_v0  ;;  %v4851_v1 = vld [vmem:[#allocation6 + $0x10] sm:$0xff] }
  0x70   :  { %274 = vmatmul.mubr.f32.gmra.mxu0 %v80_v2  ;;  %387 = vmatmul.mubr.f32.gmra.mxu1 %v80_v2  ;;  %6928 = vst [vmem:[#allocation33_spill] sm:$0xff] %v4851_v1  ;;  %v6929_v2 = vmov 0.0  }
  0x71   :  { %521 = vmatprep.subr.mxu0 %v4831_v11  ;;  %592 = vmatprep.subr.mxu1 %v4833_v20 }
  0x72   :  { %522 = vmatpush1.msra.mxu0 %v4837_v29  ;;  %593 = vmatpush1.msra.mxu1 %v4839_v38 }
  0x73   :  { %523 = vmatprep.subr.mxu0 %v4841_v47  ;;  %594 = vmatprep.subr.mxu1 %v4843_v56 }
  0x74   :  { %524 = vmatpush1.msra.mxu0 %v4847_v0  ;;  %557 = vmatprep.mubr.f32.mxu0 %v6929_v2 }
  0x75   :  { %595 = vmatpush1.msra.mxu1 %v4851_v1  ;;  %628 = vmatprep.mubr.f32.mxu1 %v6929_v2 }
  0x76   :  { %558 = vmatmul.mubr.f32.vlgmr.msra.gmra.mxu0 %v6929_v2  ;;  %629 = vmatmul.mubr.f32.vlgmr.msra.gmra.mxu1 %v6929_v2 }
  0x77   :  { %669 = vmatprep.subr.mxu0 %v4630_v3  ;;  %740 = vmatprep.subr.mxu1 %v4632_v4 }
  0x78   :  { %670 = vmatpush1.msra.mxu0 %v4634_v5  ;;  %741 = vmatpush1.msra.mxu1 %v4636_v6 }
  0x79   :  { %671 = vmatprep.subr.mxu0 %v4638_v7  ;;  %742 = vmatprep.subr.mxu1 %v4640_v8 }
  0x7a   :  { %672 = vmatpush1.msra.mxu0 %v4646_v9  ;;  %743 = vmatpush1.msra.mxu1 %v4648_v10 }
  0x7b   :  { %673 = vmatprep.subr.mxu0 %v4657_v12  ;;  %744 = vmatprep.subr.mxu1 %v4659_v13 }
  0x7c   :  { %674 = vmatpush1.msra.mxu0 %v4663_v14  ;;  %745 = vmatpush1.msra.mxu1 %v4665_v15 }
  0x7d   :  { %675 = vmatprep.subr.mxu0 %v4667_v16  ;;  %746 = vmatprep.subr.mxu1 %v4669_v17 }
  0x7e   :  { %676 = vmatpush1.msra.mxu0 %v4675_v18  ;;  %747 = vmatpush1.msra.mxu1 %v4677_v19 }
  0x7f   :  { %677 = vmatprep.subr.mxu0 %v4686_v21  ;;  %748 = vmatprep.subr.mxu1 %v4688_v22 }
  0x80   :  { %678 = vmatpush1.msra.mxu0 %v4692_v23  ;;  %749 = vmatpush1.msra.mxu1 %v4694_v24 }
  0x81   :  { %679 = vmatprep.subr.mxu0 %v4696_v25  ;;  %750 = vmatprep.subr.mxu1 %v4698_v26 }
  0x82   :  { %680 = vmatpush1.msra.mxu0 %v4704_v27  ;;  %751 = vmatpush1.msra.mxu1 %v4706_v28 }
  0x83   :  { %681 = vmatprep.subr.mxu0 %v4715_v30  ;;  %752 = vmatprep.subr.mxu1 %v4717_v31 }
  0x84   :  { %682 = vmatpush1.msra.mxu0 %v4721_v32  ;;  %753 = vmatpush1.msra.mxu1 %v4723_v33 }
  0x85   :  { %683 = vmatprep.subr.mxu0 %v4725_v34  ;;  %754 = vmatprep.subr.mxu1 %v4727_v35 }
  0x86   :  { %684 = vmatpush1.msra.mxu0 %v4733_v36  ;;  %755 = vmatpush1.msra.mxu1 %v4735_v37 }
  0x87   :  { %685 = vmatprep.subr.mxu0 %v4744_v39  ;;  %756 = vmatprep.subr.mxu1 %v4746_v40 }
  0x88   :  { %686 = vmatpush1.msra.mxu0 %v4750_v41  ;;  %757 = vmatpush1.msra.mxu1 %v4752_v42 }
  0x89   :  { %687 = vmatprep.subr.mxu0 %v4754_v43  ;;  %758 = vmatprep.subr.mxu1 %v4756_v44 }
  0x8a   :  { %688 = vmatpush1.msra.mxu0 %v4762_v45  ;;  %759 = vmatpush1.msra.mxu1 %v4764_v46 }
  0x8b   :  { %689 = vmatprep.subr.mxu0 %v4773_v48  ;;  %760 = vmatprep.subr.mxu1 %v4775_v49 }
  0x8c   :  { %690 = vmatpush1.msra.mxu0 %v4779_v50  ;;  %761 = vmatpush1.msra.mxu1 %v4781_v51 }
  0x8d   :  { %691 = vmatprep.subr.mxu0 %v4783_v52  ;;  %762 = vmatprep.subr.mxu1 %v4785_v53  ;;  %v6930_v52 = vld [vmem:[#allocation25_spill] sm:$0xff] }
  0x8e   :  { %692 = vmatpush1.msra.mxu0 %v4791_v54  ;;  %763 = vmatpush1.msra.mxu1 %v4793_v55 }
  0x8f   :  { %693 = vmatprep.subr.mxu0 %v4802_v57  ;;  %764 = vmatprep.subr.mxu1 %v4804_v58 }
  0x90   :  { %694 = vmatpush1.msra.mxu0 %v4808_v59  ;;  %765 = vmatpush1.msra.mxu1 %v4810_v60 }
  0x91   :  { %695 = vmatprep.subr.mxu0 %v4812_v61  ;;  %766 = vmatprep.subr.mxu1 %v4814_v62 }
  0x92   :  { %696 = vmatpush1.msra.mxu0 %v4820_v63  ;;  %767 = vmatpush1.msra.mxu1 %v6930_v52 }
  0x93   :  { %697 = vmatprep.subr.mxu0 %v4831_v11  ;;  %768 = vmatprep.subr.mxu1 %v4833_v20  ;;  %v147_v20 = vlaneseq }
  0x94   :  { %698 = vmatpush1.msra.mxu0 %v4837_v29  ;;  %769 = vmatpush1.msra.mxu1 %v4839_v38 }
  0x95   :  { %699 = vmatprep.subr.mxu0 %v4841_v47  ;;  %770 = vmatprep.subr.mxu1 %v4843_v56  ;;  %v4929_v29 = vshrl.u32 %v147_v20, 7 }
  0x96   :  { %700 = vmatpush1.msra.mxu0 %v4847_v0  ;;  %733 = vmatprep.mubr.f32.mxu0 %v6929_v2 }
  0x97   :  { %771 = vmatpush1.msra.mxu1 %v4851_v1  ;;  %804 = vmatprep.mubr.f32.mxu1 %v6929_v2  ;;  %6931 = vst [vmem:[#allocation34_spill] sm:$0xff] %v4929_v29  ;;  %v6739_v56 = vsub.s32 0, %v4929_v29  ;;  %v6742_v0 = vsub.s32 2, %v4929_v29  ;;  %v145_v1 = vld [vmem:[%s6695_s5] sm:$0xf]  ;;  %v6750_v20 = vsub.s32 3, %v4929_v29 }
  0x98   :  { %846 = vmatprep.subr.mxu0 %v4630_v3  ;;  %917 = vmatprep.subr.mxu1 %v4632_v4  ;;  %v6749_v4 = vsub.s32 1, %v4929_v29 }
  0x99   :  { %v150_v11 = vrot.slane %v145_v1, %v6739_v56  ;;  %v4950_v52 = vrot.slane %v145_v1, %v6742_v0  ;;  %v4956_v60 = vrot.slane %v145_v1, %v6750_v20 }
  0x9a   :  { %v154_v61 = vrot.slane %v145_v1, %v6749_v4 }
 0x106   :  { %v4931_v38 = vpop.f32.mrf.mxu0  ;;  %v4933_v47 = vpop.f32.mrf.mxu1 }
 0x108   :  { %v4940_v2 = vpop.f32.mrf.mxu0  ;;  %v4942_v3 = vpop.f32.mrf.mxu1 }
 0x10c   :  { %v239_v63 = vpop.f32.mrf.mxu0  ;;  %v352_v62 = vpop.f32.mrf.mxu1 }
 0x10d   :  { %v4958_v59 = vadd.f32 %v239_v63, %v150_v11  ;;  %v4961_v58 = vadd.f32 %v352_v62, %v4950_v52 }
 0x10e   :  { %v241_v57 = vpop.f32.mrf.mxu0  ;;  %v354_v56 = vpop.f32.mrf.mxu1 }
 0x10f   :  { %6932 = vst [vmem:[#allocation35_spill] sm:$0xff] %v4961_v58  ;;  %v4963_v55 = vadd.f32 %v241_v57, %v154_v61  ;;  %v4966_v0 = vadd.f32 %v354_v56, %v4956_v60 }
 0x111   :  { %6933 = vst [vmem:[#allocation36_spill] sm:$0xff] %v4963_v55  ;;  %6934 = vst [vmem:[#allocation37_spill] sm:$0xff] %v4966_v0 }
 0x112   :  { %v245_v54 = vpop.f32.mrf.mxu0  ;;  %v358_v53 = vpop.f32.mrf.mxu1 }
 0x113   :  { %v4968_v51 = vadd.f32 %v245_v54, %v150_v11  ;;  %v4971_v4 = vadd.f32 %v358_v53, %v4950_v52 }
 0x114   :  { %v247_v1 = vpop.f32.mrf.mxu0  ;;  %v360_v63 = vpop.f32.mrf.mxu1 }
 0x115   :  { %6935 = vst [vmem:[#allocation38_spill] sm:$0xff] %v4968_v51  ;;  %6936 = vst [vmem:[#allocation39_spill] sm:$0xff] %v4971_v4  ;;  %v4973_v20 = vadd.f32 %v247_v1, %v154_v61  ;;  %v4976_v62 = vadd.f32 %v360_v63, %v4956_v60 }
 0x117   :  { %6937 = vst [vmem:[#allocation40_spill] sm:$0xff] %v4973_v20  ;;  %6938 = vst [vmem:[#allocation41_spill] sm:$0xff] %v4976_v62 }
 0x118   :  { %v251_v29 = vpop.f32.mrf.mxu0  ;;  %v364_v57 = vpop.f32.mrf.mxu1 }
 0x119   :  { %v4978_v58 = vadd.f32 %v251_v29, %v150_v11  ;;  %v4981_v56 = vadd.f32 %v364_v57, %v4950_v52 }
 0x11a   :  { %v253_v0 = vpop.f32.mrf.mxu0  ;;  %v366_v54 = vpop.f32.mrf.mxu1 }
 0x11b   :  { %6939 = vst [vmem:[#allocation42_spill] sm:$0xff] %v4978_v58  ;;  %6940 = vst [vmem:[#allocation43_spill] sm:$0xff] %v4981_v56  ;;  %v4983_v51 = vadd.f32 %v253_v0, %v154_v61  ;;  %v4986_v53 = vadd.f32 %v366_v54, %v4956_v60 }
 0x11d   :  { %6941 = vst [vmem:[#allocation44_spill] sm:$0xff] %v4983_v51  ;;  %6942 = vst [vmem:[#allocation45_spill] sm:$0xff] %v4986_v53 }
 0x11e   :  { %v257_v4 = vpop.f32.mrf.mxu0  ;;  %v370_v1 = vpop.f32.mrf.mxu1 }
 0x11f   :  { %v4988_v20 = vadd.f32 %v257_v4, %v150_v11  ;;  %v4991_v63 = vadd.f32 %v370_v1, %v4950_v52 }
 0x120   :  { %v259_v62 = vpop.f32.mrf.mxu0  ;;  %v372_v29 = vpop.f32.mrf.mxu1 }
 0x121   :  { %6943 = vst [vmem:[#allocation46_spill] sm:$0xff] %v4988_v20  ;;  %6944 = vst [vmem:[#allocation47_spill] sm:$0xff] %v4991_v63  ;;  %v4993_v58 = vadd.f32 %v259_v62, %v154_v61  ;;  %v4996_v57 = vadd.f32 %v372_v29, %v4956_v60 }
 0x123   :  { %6945 = vst [vmem:[#allocation48_spill] sm:$0xff] %v4993_v58  ;;  %6946 = vst [vmem:[#allocation49_spill] sm:$0xff] %v4996_v57 }
 0x124   :  { %v263_v56 = vpop.f32.mrf.mxu0  ;;  %v376_v0 = vpop.f32.mrf.mxu1 }
 0x125   :  { %v4998_v51 = vadd.f32 %v263_v56, %v150_v11  ;;  %v5001_v54 = vadd.f32 %v376_v0, %v4950_v52 }
 0x126   :  { %v265_v53 = vpop.f32.mrf.mxu0  ;;  %v378_v4 = vpop.f32.mrf.mxu1 }
 0x127   :  { %6947 = vst [vmem:[#allocation50_spill] sm:$0xff] %v4998_v51  ;;  %6948 = vst [vmem:[#allocation51_spill] sm:$0xff] %v5001_v54  ;;  %v5003_v20 = vadd.f32 %v265_v53, %v154_v61  ;;  %v5006_v1 = vadd.f32 %v378_v4, %v4956_v60 }
 0x129   :  { %6949 = vst [vmem:[#allocation52_spill] sm:$0xff] %v5003_v20  ;;  %6950 = vst [vmem:[#allocation53_spill] sm:$0xff] %v5006_v1 }
 0x12a   :  { %v269_v63 = vpop.f32.mrf.mxu0  ;;  %v382_v62 = vpop.f32.mrf.mxu1 }
 0x12b   :  { %v5008_v58 = vadd.f32 %v269_v63, %v150_v11  ;;  %v5011_v29 = vadd.f32 %v382_v62, %v4950_v52 }
 0x12c   :  { %v271_v57 = vpop.f32.mrf.mxu0  ;;  %v384_v56 = vpop.f32.mrf.mxu1 }
 0x12d   :  { %6951 = vst [vmem:[#allocation54_spill] sm:$0xff] %v5008_v58  ;;  %6952 = vst [vmem:[#allocation55_spill] sm:$0xff] %v5011_v29  ;;  %v5013_v51 = vadd.f32 %v271_v57, %v154_v61  ;;  %v5016_v0 = vadd.f32 %v384_v56, %v4956_v60  ;;  %v234_v57 = vadd.f32 %v4931_v38, %v150_v11 }
 0x12e   :  { %v236_v56 = vadd.f32 %v4940_v2, %v154_v61 }
 0x12f   :  { %6953 = vst [vmem:[#allocation56_spill] sm:$0xff] %v5013_v51  ;;  %6954 = vst [vmem:[#allocation57_spill] sm:$0xff] %v5016_v0 }
 0x130   :  { %v275_v54 = vpop.f32.mrf.mxu0  ;;  %v388_v53 = vpop.f32.mrf.mxu1 }
 0x131   :  { %v5018_v20 = vadd.f32 %v275_v54, %v150_v11  ;;  %v5021_v4 = vadd.f32 %v388_v53, %v4950_v52 }
 0x132   :  { %v277_v1 = vpop.f32.mrf.mxu0  ;;  %v390_v63 = vpop.f32.mrf.mxu1 }
 0x133   :  { %6955 = vst [vmem:[#allocation58_spill] sm:$0xff] %v5018_v20  ;;  %6956 = vst [vmem:[#allocation59_spill] sm:$0xff] %v5021_v4  ;;  %v5023_v58 = vadd.f32 %v277_v1, %v154_v61  ;;  %v5026_v62 = vadd.f32 %v390_v63, %v4956_v60  ;;  %v349_v1 = vadd.f32 %v4942_v3, %v4956_v60 }
 0x134   :  { %v347_v63 = vadd.f32 %v4933_v47, %v4950_v52 }
 0x135   :  { %6957 = vst [vmem:[#allocation60_spill] sm:$0xff] %v5023_v58  ;;  %6958 = vst [vmem:[#allocation61_spill] sm:$0xff] %v5026_v62 }
 0x136   :  { %v559_v29 = vpop.f32.mrf.mxu0  ;;  %v630_v20 = vpop.f32.mrf.mxu1 }
 0x137   :  { %v635_v0 = vadd.f32 %v559_v29, %v234_v57  ;;  %v637_v62 = vadd.f32 %v630_v20, %v347_v63  ;;  %v6960_v20 = vld [vmem:[#allocation13_spill] sm:$0xff]  ;;  %v6965_v63 = vld [vmem:[#allocation18_spill] sm:$0xff] }
 0x138   :  { %v561_v51 = vpop.f32.mrf.mxu0  ;;  %v632_v4 = vpop.f32.mrf.mxu1 }
 0x139   :  { %v3811_v55 = vmul.f32 -1.442695, %v635_v0  ;;  %v636_v54 = vadd.f32 %v561_v51, %v236_v56  ;;  %v638_v58 = vadd.f32 %v632_v4, %v349_v1  ;;  %v6964_v1 = vld [vmem:[#allocation17_spill] sm:$0xff] }
 0x13b   :  { %3919 = vpow2.f32 %v3811_v55  ;;  %v3812_v53 = vmul.f32 -1.442695, %v636_v54  ;;  %v3813_v11 = vmul.f32 -1.442695, %v638_v58  ;;  %v6962_v54 = vld [vmem:[#allocation15_spill] sm:$0xff] }
 0x13d   :  { %3921 = vpow2.f32 %v3812_v53  ;;  %v6963_v53 = vld [vmem:[#allocation16_spill] sm:$0xff] }
 0x13e   :  { %3923 = vpow2.f32 %v3813_v11  ;;  %v6966_v11 = vld [vmem:[#allocation19_spill] sm:$0xff] }
 0x148   :  { %v3920_v38 = vpop.eup %3919 }
 0x149   :  { %v642_v61 = vadd.f32 1.0, %v3920_v38  ;;  %v6967_v38 = vld [vmem:[#allocation20_spill] sm:$0xff] }
 0x14a   :  { %v3922_v2 = vpop.eup %3921 }
 0x14b   :  { %3925 = vrcp.f32 %v642_v61  ;;  %v648_v51 = vadd.f32 1.0, %v3922_v2  ;;  %v3924_v55 = vpop.eup %3923  ;;  %v6968_v61 = vld [vmem:[#allocation21_spill] sm:$0xff]  ;;  %v6969_v2 = vld [vmem:[#allocation22_spill] sm:$0xff] }
 0x14c   :  { %3927 = vtanh.f32 %v637_v62  ;;  %v655_v56 = vadd.f32 1.0, %v3924_v55  ;;  %v6961_v62 = vld [vmem:[#allocation14_spill] sm:$0xff]  ;;  %v6971_v55 = vld [vmem:[#allocation24_spill] sm:$0xff] }
 0x14d   :  { %3929 = vrcp.f32 %v648_v51  ;;  %v6970_v51 = vld [vmem:[#allocation23_spill] sm:$0xff] }
 0x14e   :  { %3931 = vrcp.f32 %v655_v56  ;;  %v6975_v56 = vld [vmem:[#allocation28_spill] sm:$0xff] }
 0x158   :  { %v3926_v29 = vpop.eup %3925 }
 0x159   :  { %v3928_v0 = vpop.eup %3927 }
 0x15a   :  { %v3930_v57 = vpop.eup %3929  ;;  %v659_v60 = vmul.f32 %v3928_v0, %v3926_v29  ;;  %v6972_v29 = vld [vmem:[#allocation25_spill] sm:$0xff]  ;;  %v6973_v0 = vld [vmem:[#allocation26_spill] sm:$0xff] }
 0x15b   :  { %v658_v3 = vmul.f32 0.0, %v3930_v57  ;;  %v3932_v52 = vpop.eup %3931  ;;  %v6974_v57 = vld [vmem:[#allocation27_spill] sm:$0xff] }
 0x15d   :  { %v5034_v4 = vadd.f32 %v659_v60, %v658_v3  ;;  %v6976_v3 = vld [vmem:[#allocation29_spill] sm:$0xff]  ;;  %v6977_v60 = vld [vmem:[#allocation30_spill] sm:$0xff] }
 0x15f   :  { %3933 = vtanh.f32 %v5034_v4 }
 0x16c   :  { %v3934_v58 = vpop.eup %3933 }
 0x16d   :  { %v5037_v47 = vmul.f32 %v3934_v58, %v3932_v52  ;;  %v6978_v52 = vld [vmem:[#allocation31_spill] sm:$0xff]  ;;  %v6979_v58 = vld [vmem:[#allocation32_spill] sm:$0xff] }
 0x16f   :  { %6959 = vst [vmem:[#allocation62_spill] sm:$0xff] %v5037_v47  ;;  %734 = vmatmul.mubr.f32.vlgmr.msra.gmra.mxu0 %v5037_v47  ;;  %805 = vmatmul.mubr.f32.vlgmr.msra.gmra.mxu1 %v5037_v47  ;;  %v6980_v47 = vmov 0.0  }
 0x170   :  { %847 = vmatpush1.msra.mxu0 %v4634_v5  ;;  %918 = vmatpush1.msra.mxu1 %v4636_v6 }
 0x171   :  { %848 = vmatprep.subr.mxu0 %v4638_v7  ;;  %919 = vmatprep.subr.mxu1 %v4640_v8 }
 0x172   :  { %849 = vmatpush1.msra.mxu0 %v4646_v9  ;;  %920 = vmatpush1.msra.mxu1 %v4648_v10 }
 0x173   :  { %850 = vmatprep.subr.mxu0 %v4657_v12  ;;  %921 = vmatprep.subr.mxu1 %v4659_v13 }
 0x174   :  { %851 = vmatpush1.msra.mxu0 %v4663_v14  ;;  %922 = vmatpush1.msra.mxu1 %v4665_v15 }
 0x175   :  { %852 = vmatprep.subr.mxu0 %v4667_v16  ;;  %923 = vmatprep.subr.mxu1 %v4669_v17 }
 0x176   :  { %853 = vmatpush1.msra.mxu0 %v4675_v18  ;;  %924 = vmatpush1.msra.mxu1 %v4677_v19 }
 0x177   :  { %854 = vmatprep.subr.mxu0 %v4686_v21  ;;  %925 = vmatprep.subr.mxu1 %v4688_v22 }
 0x178   :  { %855 = vmatpush1.msra.mxu0 %v4692_v23  ;;  %926 = vmatpush1.msra.mxu1 %v4694_v24 }
 0x179   :  { %856 = vmatprep.subr.mxu0 %v4696_v25  ;;  %927 = vmatprep.subr.mxu1 %v4698_v26 }
 0x17a   :  { %857 = vmatpush1.msra.mxu0 %v4704_v27  ;;  %928 = vmatpush1.msra.mxu1 %v4706_v28 }
 0x17b   :  { %858 = vmatprep.subr.mxu0 %v4715_v30  ;;  %929 = vmatprep.subr.mxu1 %v4717_v31 }
 0x17c   :  { %859 = vmatpush1.msra.mxu0 %v4721_v32  ;;  %930 = vmatpush1.msra.mxu1 %v4723_v33 }
 0x17d   :  { %860 = vmatprep.subr.mxu0 %v4725_v34  ;;  %931 = vmatprep.subr.mxu1 %v4727_v35 }
 0x17e   :  { %861 = vmatpush1.msra.mxu0 %v4733_v36  ;;  %932 = vmatpush1.msra.mxu1 %v4735_v37 }
 0x17f   :  { %862 = vmatprep.subr.mxu0 %v4744_v39  ;;  %933 = vmatprep.subr.mxu1 %v4746_v40 }
 0x180   :  { %863 = vmatpush1.msra.mxu0 %v4750_v41  ;;  %934 = vmatpush1.msra.mxu1 %v4752_v42 }
 0x181   :  { %864 = vmatprep.subr.mxu0 %v4754_v43  ;;  %935 = vmatprep.subr.mxu1 %v4756_v44 }
 0x182   :  { %865 = vmatpush1.msra.mxu0 %v4762_v45  ;;  %936 = vmatpush1.msra.mxu1 %v4764_v46 }
 0x183   :  { %866 = vmatprep.subr.mxu0 %v4773_v48  ;;  %937 = vmatprep.subr.mxu1 %v4775_v49 }
 0x184   :  { %867 = vmatpush1.msra.mxu0 %v4779_v50  ;;  %938 = vmatpush1.msra.mxu1 %v6960_v20 }
 0x185   :  { %868 = vmatprep.subr.mxu0 %v6961_v62  ;;  %939 = vmatprep.subr.mxu1 %v6962_v54 }
 0x186   :  { %869 = vmatpush1.msra.mxu0 %v6963_v53  ;;  %940 = vmatpush1.msra.mxu1 %v6964_v1 }
 0x187   :  { %870 = vmatprep.subr.mxu0 %v6965_v63  ;;  %941 = vmatprep.subr.mxu1 %v6966_v11  ;;  %v6986_v11 = vld [vmem:[#allocation35_spill] sm:$0xff] }
 0x188   :  { %871 = vmatpush1.msra.mxu0 %v6967_v38  ;;  %942 = vmatpush1.msra.mxu1 %v6968_v61  ;;  %v6985_v38 = vld [vmem:[#allocation37_spill] sm:$0xff] }
 0x189   :  { %872 = vmatprep.subr.mxu0 %v6969_v2  ;;  %943 = vmatprep.subr.mxu1 %v6970_v51  ;;  %v6981_v51 = vld [vmem:[#allocation33_spill] sm:$0xff] }
 0x18a   :  { %873 = vmatpush1.msra.mxu0 %v6971_v55  ;;  %944 = vmatpush1.msra.mxu1 %v6972_v29  ;;  %v6982_v29 = vld [vmem:[#allocation11_spill] sm:$0xff] }
 0x18b   :  { %874 = vmatprep.subr.mxu0 %v6973_v0  ;;  %945 = vmatprep.subr.mxu1 %v6974_v57  ;;  %v6983_v0 = vld [vmem:[#allocation12_spill] sm:$0xff] }
 0x18c   :  { %875 = vmatpush1.msra.mxu0 %v6975_v56  ;;  %946 = vmatpush1.msra.mxu1 %v6976_v3 }
 0x18d   :  { %876 = vmatprep.subr.mxu0 %v6977_v60  ;;  %947 = vmatprep.subr.mxu1 %v6978_v52  ;;  %v6984_v60 = vld [vmem:[#allocation36_spill] sm:$0xff] }
 0x18e   :  { %877 = vmatpush1.msra.mxu0 %v6979_v58  ;;  %910 = vmatprep.mubr.f32.mxu0 %v6980_v47 }
 0x18f   :  { %948 = vmatpush1.msra.mxu1 %v6981_v51  ;;  %981 = vmatprep.mubr.f32.mxu1 %v6980_v47 }
 0x190   :  { %1023 = vmatprep.subr.mxu0 %v6982_v29  ;;  %1094 = vmatprep.subr.mxu1 %v6983_v0 }
 0x22f   :  { %v735_v57 = vpop.f32.mrf.mxu0  ;;  %v806_v52 = vpop.f32.mrf.mxu1 }
 0x230   :  { %v811_v56 = vadd.f32 %v735_v57, %v4958_v59  ;;  %v813_v47 = vadd.f32 %v806_v52, %v6986_v11 }
 0x231   :  { %v737_v3 = vpop.f32.mrf.mxu0  ;;  %v808_v61 = vpop.f32.mrf.mxu1 }
 0x232   :  { %v3814_v55 = vmul.f32 -1.442695, %v811_v56  ;;  %v812_v2 = vadd.f32 %v737_v3, %v6984_v60  ;;  %v814_v51 = vadd.f32 %v808_v61, %v6985_v38 }
 0x234   :  { %3935 = vpow2.f32 %v3814_v55  ;;  %v3815_v58 = vmul.f32 -1.442695, %v812_v2  ;;  %v3816_v63 = vmul.f32 -1.442695, %v814_v51 }
 0x236   :  { %3937 = vpow2.f32 %v3815_v58 }
 0x237   :  { %3939 = vtanh.f32 %v813_v47 }
 0x238   :  { %3941 = vpow2.f32 %v3816_v63 }
 0x241   :  { %v3936_v29 = vpop.eup %3935 }
 0x242   :  { %v818_v1 = vadd.f32 1.0, %v3936_v29 }
 0x243   :  { %v3938_v0 = vpop.eup %3937 }
 0x244   :  { %3943 = vrcp.f32 %v818_v1  ;;  %v824_v59 = vadd.f32 1.0, %v3938_v0  ;;  %v3940_v57 = vpop.eup %3939  ;;  %v7009_v1 = vld [vmem:[#allocation40_spill] sm:$0xff]  ;;  %v7010_v0 = vld [vmem:[#allocation41_spill] sm:$0xff] }
 0x245   :  { %v3942_v56 = vpop.eup %3941 }
 0x246   :  { %3945 = vrcp.f32 %v824_v59  ;;  %v831_v60 = vadd.f32 1.0, %v3942_v56 }
 0x248   :  { %3947 = vrcp.f32 %v831_v60 }
 0x251   :  { %v3944_v55 = vpop.eup %3943 }
 0x252   :  { %v835_v3 = vmul.f32 %v3944_v55, %v3940_v57  ;;  %v7011_v57 = vld [vmem:[#allocation39_spill] sm:$0xff] }
 0x253   :  { %v3946_v2 = vpop.eup %3945 }
 0x254   :  { %v834_v58 = vmul.f32 %v3946_v2, %v5034_v4 }
 0x255   :  { %v3948_v11 = vpop.eup %3947 }
 0x256   :  { %v5112_v38 = vadd.f32 %v835_v3, %v834_v58 }
 0x258   :  { %3949 = vtanh.f32 %v5112_v38 }
 0x265   :  { %v3950_v47 = vpop.eup %3949 }
 0x266   :  { %v5115_v61 = vmul.f32 %v3950_v47, %v3948_v11 }
 0x268   :  { %6987 = vst [vmem:[#allocation13_spill] sm:$0xff] %v5115_v61  ;;  %911 = vmatmul.mubr.f32.vlgmr.msra.gmra.mxu0 %v5115_v61  ;;  %982 = vmatmul.mubr.f32.vlgmr.msra.gmra.mxu1 %v5115_v61  ;;  %v5264_v61 = vld [vmem:[#allocation6 + $0x150] sm:$0xff] }
 0x269   :  { %1024 = vmatpush1.msra.mxu0 %v4634_v5  ;;  %1095 = vmatpush1.msra.mxu1 %v4636_v6  ;;  %v6988_v5 = vld [vmem:[#allocation17_spill] sm:$0xff]  ;;  %v6989_v6 = vld [vmem:[#allocation18_spill] sm:$0xff] }
 0x26a   :  { %1025 = vmatprep.subr.mxu0 %v4638_v7  ;;  %1096 = vmatprep.subr.mxu1 %v4640_v8  ;;  %v6990_v7 = vld [vmem:[#allocation19_spill] sm:$0xff]  ;;  %v6991_v8 = vld [vmem:[#allocation20_spill] sm:$0xff] }
 0x26b   :  { %1026 = vmatpush1.msra.mxu0 %v4646_v9  ;;  %1097 = vmatpush1.msra.mxu1 %v4648_v10  ;;  %v6992_v9 = vld [vmem:[#allocation21_spill] sm:$0xff]  ;;  %v6993_v10 = vld [vmem:[#allocation22_spill] sm:$0xff] }
 0x26c   :  { %1027 = vmatprep.subr.mxu0 %v4657_v12  ;;  %1098 = vmatprep.subr.mxu1 %v4659_v13  ;;  %v6994_v12 = vld [vmem:[#allocation23_spill] sm:$0xff]  ;;  %v6995_v13 = vld [vmem:[#allocation24_spill] sm:$0xff] }
 0x26d   :  { %1028 = vmatpush1.msra.mxu0 %v4663_v14  ;;  %1099 = vmatpush1.msra.mxu1 %v4665_v15  ;;  %v6996_v14 = vld [vmem:[#allocation25_spill] sm:$0xff]  ;;  %v6997_v15 = vld [vmem:[#allocation26_spill] sm:$0xff] }
 0x26e   :  { %1029 = vmatprep.subr.mxu0 %v4667_v16  ;;  %1100 = vmatprep.subr.mxu1 %v4669_v17  ;;  %v6998_v16 = vld [vmem:[#allocation27_spill] sm:$0xff]  ;;  %v6999_v17 = vld [vmem:[#allocation28_spill] sm:$0xff] }
 0x26f   :  { %1030 = vmatpush1.msra.mxu0 %v4675_v18  ;;  %1101 = vmatpush1.msra.mxu1 %v4677_v19  ;;  %v7000_v18 = vld [vmem:[#allocation29_spill] sm:$0xff]  ;;  %v7001_v19 = vld [vmem:[#allocation30_spill] sm:$0xff] }
 0x270   :  { %1031 = vmatprep.subr.mxu0 %v4686_v21  ;;  %1102 = vmatprep.subr.mxu1 %v4688_v22  ;;  %v7002_v21 = vld [vmem:[#allocation31_spill] sm:$0xff]  ;;  %v7003_v22 = vld [vmem:[#allocation32_spill] sm:$0xff] }
 0x271   :  { %1032 = vmatpush1.msra.mxu0 %v4692_v23  ;;  %1103 = vmatpush1.msra.mxu1 %v4694_v24  ;;  %v7004_v23 = vmov 0.0   ;;  %v7005_v24 = vld [vmem:[#allocation33_spill] sm:$0xff] }
 0x272   :  { %1033 = vmatprep.subr.mxu0 %v4696_v25  ;;  %1104 = vmatprep.subr.mxu1 %v4698_v26  ;;  %v5183_v25 = vld [vmem:[#allocation6 + $0x1e8] sm:$0xff]  ;;  %v5186_v26 = vld [vmem:[#allocation6 + $0x1f8] sm:$0xff] }
 0x273   :  { %1034 = vmatpush1.msra.mxu0 %v4704_v27  ;;  %1105 = vmatpush1.msra.mxu1 %v4706_v28  ;;  %7006 = vst [vmem:[#allocation14_spill] sm:$0xff] %v5183_v25  ;;  %7007 = vst [vmem:[#allocation15_spill] sm:$0xff] %v5186_v26  ;;  %v7008_v28 = vld [vmem:[#allocation38_spill] sm:$0xff] }
 0x274   :  { %1035 = vmatprep.subr.mxu0 %v4715_v30  ;;  %1106 = vmatprep.subr.mxu1 %v4717_v31 }
 0x275   :  { %1036 = vmatpush1.msra.mxu0 %v4721_v32  ;;  %1107 = vmatpush1.msra.mxu1 %v4723_v33 }
 0x276   :  { %1037 = vmatprep.subr.mxu0 %v4725_v34  ;;  %1108 = vmatprep.subr.mxu1 %v4727_v35 }
 0x277   :  { %1038 = vmatpush1.msra.mxu0 %v4733_v36  ;;  %1109 = vmatpush1.msra.mxu1 %v4735_v37 }
 0x278   :  { %1039 = vmatprep.subr.mxu0 %v4744_v39  ;;  %1110 = vmatprep.subr.mxu1 %v4746_v40 }
 0x279   :  { %1040 = vmatpush1.msra.mxu0 %v4750_v41  ;;  %1111 = vmatpush1.msra.mxu1 %v4752_v42 }
 0x27a   :  { %1041 = vmatprep.subr.mxu0 %v4754_v43  ;;  %1112 = vmatprep.subr.mxu1 %v4756_v44 }
 0x27b   :  { %1042 = vmatpush1.msra.mxu0 %v4762_v45  ;;  %1113 = vmatpush1.msra.mxu1 %v4764_v46 }
 0x27c   :  { %1043 = vmatprep.subr.mxu0 %v4773_v48  ;;  %1114 = vmatprep.subr.mxu1 %v4775_v49 }
 0x27d   :  { %1044 = vmatpush1.msra.mxu0 %v4779_v50  ;;  %1115 = vmatpush1.msra.mxu1 %v6960_v20 }
 0x27e   :  { %1045 = vmatprep.subr.mxu0 %v6961_v62  ;;  %1116 = vmatprep.subr.mxu1 %v6962_v54 }
 0x27f   :  { %1046 = vmatpush1.msra.mxu0 %v6963_v53  ;;  %1117 = vmatpush1.msra.mxu1 %v6988_v5 }
 0x280   :  { %1047 = vmatprep.subr.mxu0 %v6989_v6  ;;  %1118 = vmatprep.subr.mxu1 %v6990_v7 }
 0x281   :  { %1048 = vmatpush1.msra.mxu0 %v6991_v8  ;;  %1119 = vmatpush1.msra.mxu1 %v6992_v9 }
 0x282   :  { %1049 = vmatprep.subr.mxu0 %v6993_v10  ;;  %1120 = vmatprep.subr.mxu1 %v6994_v12 }
 0x283   :  { %1050 = vmatpush1.msra.mxu0 %v6995_v13  ;;  %1121 = vmatpush1.msra.mxu1 %v6996_v14 }
 0x284   :  { %1051 = vmatprep.subr.mxu0 %v6997_v15  ;;  %1122 = vmatprep.subr.mxu1 %v6998_v16 }
 0x285   :  { %1052 = vmatpush1.msra.mxu0 %v6999_v17  ;;  %1123 = vmatpush1.msra.mxu1 %v7000_v18 }
 0x286   :  { %1053 = vmatprep.subr.mxu0 %v7001_v19  ;;  %1124 = vmatprep.subr.mxu1 %v7002_v21 }
 0x287   :  { %1054 = vmatpush1.msra.mxu0 %v7003_v22  ;;  %1087 = vmatprep.mubr.f32.mxu0 %v7004_v23 }
 0x288   :  { %1125 = vmatpush1.msra.mxu1 %v7005_v24  ;;  %1158 = vmatprep.mubr.f32.mxu1 %v7004_v23 }
 0x289   :  { %1200 = vmatprep.subr.mxu0 %v5183_v25  ;;  %1271 = vmatprep.subr.mxu1 %v5186_v26 }
 0x328   :  { %v912_v27 = vpop.f32.mrf.mxu0  ;;  %v983_v51 = vpop.f32.mrf.mxu1 }
 0x329   :  { %v988_v30 = vadd.f32 %v912_v27, %v7008_v28  ;;  %v990_v56 = vadd.f32 %v983_v51, %v7011_v57  ;;  %v5213_v57 = vld [vmem:[#allocation6 + $0x1c0] sm:$0xff] }
 0x32a   :  { %v914_v31 = vpop.f32.mrf.mxu0  ;;  %v985_v29 = vpop.f32.mrf.mxu1 }
 0x32b   :  { %v3817_v4 = vmul.f32 -1.442695, %v988_v30  ;;  %v989_v63 = vadd.f32 %v914_v31, %v7009_v1  ;;  %v991_v59 = vadd.f32 %v985_v29, %v7010_v0  ;;  %v5201_v29 = vld [vmem:[#allocation6 + $0x1e0] sm:$0xff]  ;;  %v5204_v0 = vld [vmem:[#allocation6 + $0x1f0] sm:$0xff] }
 0x32d   :  { %3951 = vpow2.f32 %v3817_v4  ;;  %v3818_v52 = vmul.f32 -1.442695, %v989_v63  ;;  %v3819_v55 = vmul.f32 -1.442695, %v991_v59  ;;  %v5210_v59 = vld [vmem:[#allocation6 + $0x1d8] sm:$0xff] }
 0x32f   :  { %3953 = vpow2.f32 %v3818_v52 }
 0x330   :  { %3955 = vtanh.f32 %v990_v56  ;;  %v5216_v56 = vld [vmem:[#allocation6 + $0x1d0] sm:$0xff] }
 0x331   :  { %3957 = vpow2.f32 %v3819_v55  ;;  %v5219_v55 = vld [vmem:[#allocation6 + $0x1a8] sm:$0xff] }
 0x33a   :  { %v3952_v3 = vpop.eup %3951 }
 0x33b   :  { %v995_v2 = vadd.f32 1.0, %v3952_v3  ;;  %v5222_v3 = vld [vmem:[#allocation6 + $0x1b8] sm:$0xff] }
 0x33c   :  { %v3954_v60 = vpop.eup %3953 }
 0x33d   :  { %3959 = vrcp.f32 %v995_v2  ;;  %v1001_v58 = vadd.f32 1.0, %v3954_v60  ;;  %v3956_v11 = vpop.eup %3955  ;;  %v5225_v2 = vld [vmem:[#allocation6 + $0x1a0] sm:$0xff]  ;;  %v5228_v60 = vld [vmem:[#allocation6 + $0x1b0] sm:$0xff] }
 0x33e   :  { %v3958_v47 = vpop.eup %3957 }
 0x33f   :  { %3961 = vrcp.f32 %v1001_v58  ;;  %v1008_v31 = vadd.f32 1.0, %v3958_v47  ;;  %v5231_v58 = vld [vmem:[#allocation6 + $0x188] sm:$0xff]  ;;  %v5237_v47 = vld [vmem:[#allocation6 + $0x180] sm:$0xff] }
 0x341   :  { %3963 = vrcp.f32 %v1008_v31  ;;  %v5249_v31 = vld [vmem:[#allocation6 + $0x160] sm:$0xff] }
 0x342   :  { %7013 = vst [vmem:[#allocation11_spill] sm:$0xff] %v5249_v31 }
 0x34a   :  { %v3960_v27 = vpop.eup %3959 }
 0x34b   :  { %v1012_v28 = vmul.f32 %v3960_v27, %v3956_v11  ;;  %v5234_v11 = vld [vmem:[#allocation6 + $0x198] sm:$0xff]  ;;  %v5240_v27 = vld [vmem:[#allocation6 + $0x190] sm:$0xff] }
 0x34c   :  { %v3962_v30 = vpop.eup %3961 }
 0x34d   :  { %v1011_v4 = vmul.f32 %v3962_v30, %v5112_v38  ;;  %v5207_v38 = vld [vmem:[#allocation6 + $0x1c8] sm:$0xff]  ;;  %v5246_v30 = vld [vmem:[#allocation6 + $0x178] sm:$0xff] }
 0x34e   :  { %v3964_v63 = vpop.eup %3963 }
 0x34f   :  { %v5194_v1 = vadd.f32 %v1012_v28, %v1011_v4  ;;  %v5243_v28 = vld [vmem:[#allocation6 + $0x168] sm:$0xff]  ;;  %v5252_v4 = vld [vmem:[#allocation6 + $0x170] sm:$0xff] }
 0x350   :  { %7014 = vst [vmem:[#allocation12_spill] sm:$0xff] %v5252_v4 }
 0x351   :  { %3965 = vtanh.f32 %v5194_v1 }
 0x35e   :  { %v3966_v51 = vpop.eup %3965 }
 0x35f   :  { %v5197_v52 = vmul.f32 %v3966_v51, %v3964_v63  ;;  %v5255_v63 = vld [vmem:[#allocation6 + $0x148] sm:$0xff]  ;;  %v5258_v51 = vld [vmem:[#allocation6 + $0x158] sm:$0xff] }
 0x361   :  { %7012 = vst [vmem:[#allocation16_spill] sm:$0xff] %v5197_v52  ;;  %1088 = vmatmul.mubr.f32.vlgmr.msra.gmra.mxu0 %v5197_v52  ;;  %1159 = vmatmul.mubr.f32.vlgmr.msra.gmra.mxu1 %v5197_v52  ;;  %v5261_v52 = vld [vmem:[#allocation6 + $0x140] sm:$0xff] }
 0x362   :  { %1201 = vmatpush1.msra.mxu0 %v5201_v29  ;;  %1272 = vmatpush1.msra.mxu1 %v5204_v0 }
 0x363   :  { %1202 = vmatprep.subr.mxu0 %v5207_v38  ;;  %1273 = vmatprep.subr.mxu1 %v5210_v59 }
 0x364   :  { %1203 = vmatpush1.msra.mxu0 %v5213_v57  ;;  %1274 = vmatpush1.msra.mxu1 %v5216_v56 }
 0x365   :  { %1204 = vmatprep.subr.mxu0 %v5219_v55  ;;  %1275 = vmatprep.subr.mxu1 %v5222_v3 }
 0x366   :  { %1205 = vmatpush1.msra.mxu0 %v5225_v2  ;;  %1276 = vmatpush1.msra.mxu1 %v5228_v60 }
 0x367   :  { %1206 = vmatprep.subr.mxu0 %v5231_v58  ;;  %1277 = vmatprep.subr.mxu1 %v5234_v11 }
 0x368   :  { %1207 = vmatpush1.msra.mxu0 %v5237_v47  ;;  %1278 = vmatpush1.msra.mxu1 %v5240_v27 }
 0x369   :  { %1208 = vmatprep.subr.mxu0 %v5243_v28  ;;  %1279 = vmatprep.subr.mxu1 %v5246_v30 }
 0x36a   :  { %1209 = vmatpush1.msra.mxu0 %v5249_v31  ;;  %1280 = vmatpush1.msra.mxu1 %v5252_v4  ;;  %v5267_v31 = vld [vmem:[#allocation6 + $0x128] sm:$0xff]  ;;  %v5270_v4 = vld [vmem:[#allocation6 + $0x138] sm:$0xff] }
 0x36b   :  { %1210 = vmatprep.subr.mxu0 %v5255_v63  ;;  %1281 = vmatprep.subr.mxu1 %v5258_v51 }
 0x36c   :  { %1211 = vmatpush1.msra.mxu0 %v5261_v52  ;;  %1282 = vmatpush1.msra.mxu1 %v5264_v61 }
 0x36d   :  { %1212 = vmatprep.subr.mxu0 %v5267_v31  ;;  %1283 = vmatprep.subr.mxu1 %v5270_v4 }
 0x36e   :  { %1213 = vmatpush1.msra.mxu0 %v4721_v32  ;;  %1284 = vmatpush1.msra.mxu1 %v4723_v33  ;;  %v7015_v33 = vld [vmem:[#allocation42_spill] sm:$0xff] }
 0x36f   :  { %1214 = vmatprep.subr.mxu0 %v4725_v34  ;;  %1285 = vmatprep.subr.mxu1 %v4727_v35 }
 0x370   :  { %1215 = vmatpush1.msra.mxu0 %v4733_v36  ;;  %1286 = vmatpush1.msra.mxu1 %v4735_v37  ;;  %v7016_v37 = vld [vmem:[#allocation44_spill] sm:$0xff] }
 0x371   :  { %1216 = vmatprep.subr.mxu0 %v4744_v39  ;;  %1287 = vmatprep.subr.mxu1 %v4746_v40 }
 0x372   :  { %1217 = vmatpush1.msra.mxu0 %v4750_v41  ;;  %1288 = vmatpush1.msra.mxu1 %v4752_v42 }
 0x373   :  { %1218 = vmatprep.subr.mxu0 %v4754_v43  ;;  %1289 = vmatprep.subr.mxu1 %v4756_v44  ;;  %v7017_v43 = vld [vmem:[#allocation45_spill] sm:$0xff] }
 0x374   :  { %1219 = vmatpush1.msra.mxu0 %v4762_v45  ;;  %1290 = vmatpush1.msra.mxu1 %v4764_v46  ;;  %v7018_v45 = vld [vmem:[#allocation43_spill] sm:$0xff] }
 0x375   :  { %1220 = vmatprep.subr.mxu0 %v4773_v48  ;;  %1291 = vmatprep.subr.mxu1 %v4775_v49 }
 0x376   :  { %1221 = vmatpush1.msra.mxu0 %v4779_v50  ;;  %1292 = vmatpush1.msra.mxu1 %v6960_v20 }
 0x377   :  { %1222 = vmatprep.subr.mxu0 %v6961_v62  ;;  %1293 = vmatprep.subr.mxu1 %v6962_v54 }
 0x378   :  { %1223 = vmatpush1.msra.mxu0 %v6963_v53  ;;  %1294 = vmatpush1.msra.mxu1 %v6988_v5 }
 0x379   :  { %1224 = vmatprep.subr.mxu0 %v6989_v6  ;;  %1295 = vmatprep.subr.mxu1 %v6990_v7 }
 0x37a   :  { %1225 = vmatpush1.msra.mxu0 %v6991_v8  ;;  %1296 = vmatpush1.msra.mxu1 %v6992_v9 }
 0x37b   :  { %1226 = vmatprep.subr.mxu0 %v6993_v10  ;;  %1297 = vmatprep.subr.mxu1 %v6994_v12 }
 0x37c   :  { %1227 = vmatpush1.msra.mxu0 %v6995_v13  ;;  %1298 = vmatpush1.msra.mxu1 %v6996_v14 }
 0x37d   :  { %1228 = vmatprep.subr.mxu0 %v6997_v15  ;;  %1299 = vmatprep.subr.mxu1 %v6998_v16  ;;  %v7020_v15 = vld [vmem:[#allocation11_spill] sm:$0xff]  ;;  %v7021_v16 = vld [vmem:[#allocation12_spill] sm:$0xff] }
 0x37e   :  { %1229 = vmatpush1.msra.mxu0 %v6999_v17  ;;  %1300 = vmatpush1.msra.mxu1 %v7000_v18  ;;  %v5351_v17 = vld [vmem:[#allocation6 + $0x120] sm:$0xff]  ;;  %v5354_v18 = vld [vmem:[#allocation6 + $0x130] sm:$0xff] }
 0x37f   :  { %1230 = vmatprep.subr.mxu0 %v7001_v19  ;;  %1301 = vmatprep.subr.mxu1 %v7002_v21  ;;  %v5357_v19 = vld [vmem:[#allocation6 + $0x108] sm:$0xff]  ;;  %v5360_v21 = vld [vmem:[#allocation6 + $0x118] sm:$0xff] }
 0x380   :  { %1231 = vmatpush1.msra.mxu0 %v7003_v22  ;;  %1264 = vmatprep.mubr.f32.mxu0 %v7004_v23  ;;  %v5363_v22 = vld [vmem:[#allocation6 + $0x100] sm:$0xff] }
 0x381   :  { %1302 = vmatpush1.msra.mxu1 %v7005_v24  ;;  %1335 = vmatprep.mubr.f32.mxu1 %v7004_v23  ;;  %v5366_v24 = vld [vmem:[#allocation6 + $0x110] sm:$0xff] }
 0x382   :  { %1377 = vmatprep.subr.mxu0 %v5183_v25  ;;  %1448 = vmatprep.subr.mxu1 %v5186_v26 }
 0x421   :  { %v1089_v32 = vpop.f32.mrf.mxu0  ;;  %v1160_v40 = vpop.f32.mrf.mxu1 }
 0x422   :  { %v1165_v34 = vadd.f32 %v1089_v32, %v7015_v33  ;;  %v1167_v46 = vadd.f32 %v1160_v40, %v7018_v45  ;;  %v5372_v32 = vld [vmem:[#allocation6 + $0xf8] sm:$0xff]  ;;  %v5375_v33 = vld [vmem:[#allocation6 + $0xe0] sm:$0xff]  ;;  %v5393_v40 = vld [vmem:[#allocation6 + $0xa8] sm:$0xff] }
 0x423   :  { %v1091_v35 = vpop.f32.mrf.mxu0  ;;  %v1162_v42 = vpop.f32.mrf.mxu1  ;;  %v5408_v45 = vld [vmem:[#allocation6 + $0x98] sm:$0xff] }
 0x424   :  { %v3820_v36 = vmul.f32 -1.442695, %v1165_v34  ;;  %v1166_v39 = vadd.f32 %v1091_v35, %v7016_v37  ;;  %v1168_v44 = vadd.f32 %v1162_v42, %v7017_v43  ;;  %v5378_v34 = vld [vmem:[#allocation6 + $0xf0] sm:$0xff]  ;;  %v5381_v35 = vld [vmem:[#allocation6 + $0xc8] sm:$0xff]  ;;  %v5387_v37 = vld [vmem:[#allocation6 + $0xc0] sm:$0xff] }
 0x425   :  { %v5399_v42 = vld [vmem:[#allocation6 + $0xa0] sm:$0xff]  ;;  %v5402_v43 = vld [vmem:[#allocation6 + $0xb0] sm:$0xff] }
 0x426   :  { %3967 = vpow2.f32 %v3820_v36  ;;  %v3821_v41 = vmul.f32 -1.442695, %v1166_v39  ;;  %v3822_v48 = vmul.f32 -1.442695, %v1168_v44  ;;  %v5384_v36 = vld [vmem:[#allocation6 + $0xd8] sm:$0xff]  ;;  %v5390_v39 = vld [vmem:[#allocation6 + $0xd0] sm:$0xff] }
 0x427   :  { %v5405_v44 = vld [vmem:[#allocation6 + $0x88] sm:$0xff] }
 0x428   :  { %3969 = vpow2.f32 %v3821_v41  ;;  %v5396_v41 = vld [vmem:[#allocation6 + $0xb8] sm:$0xff] }
 0x429   :  { %3971 = vtanh.f32 %v1167_v46  ;;  %v5411_v46 = vld [vmem:[#allocation6 + $0x80] sm:$0xff] }
 0x42a   :  { %3973 = vpow2.f32 %v3822_v48  ;;  %v5414_v48 = vld [vmem:[#allocation6 + $0x90] sm:$0xff] }
 0x42b   :  { %7022 = vst [vmem:[#allocation37_spill] sm:$0xff] %v5414_v48 }
 0x433   :  { %v3968_v49 = vpop.eup %3967 }
 0x434   :  { %v1172_v50 = vadd.f32 1.0, %v3968_v49  ;;  %v5417_v49 = vld [vmem:[#allocation6 + $0x68] sm:$0xff] }
 0x435   :  { %v3970_v20 = vpop.eup %3969  ;;  %7023 = vst [vmem:[#allocation35_spill] sm:$0xff] %v5417_v49 }
 0x436   :  { %3975 = vrcp.f32 %v1172_v50  ;;  %v1178_v62 = vadd.f32 1.0, %v3970_v20  ;;  %v3972_v54 = vpop.eup %3971  ;;  %v5420_v50 = vld [vmem:[#allocation6 + $0x78] sm:$0xff]  ;;  %v5423_v20 = vld [vmem:[#allocation6 + $0x60] sm:$0xff] }
 0x437   :  { %v3974_v53 = vpop.eup %3973  ;;  %7024 = vst [vmem:[#allocation17_spill] sm:$0xff] %v5420_v50  ;;  %7025 = vst [vmem:[#allocation18_spill] sm:$0xff] %v5423_v20 }
 0x438   :  { %3977 = vrcp.f32 %v1178_v62  ;;  %v1185_v8 = vadd.f32 1.0, %v3974_v53  ;;  %v5426_v62 = vld [vmem:[#allocation6 + $0x70] sm:$0xff]  ;;  %v5432_v53 = vld [vmem:[#allocation6 + $0x58] sm:$0xff] }
 0x439   :  { %7026 = vst [vmem:[#allocation19_spill] sm:$0xff] %v5426_v62  ;;  %7028 = vst [vmem:[#allocation21_spill] sm:$0xff] %v5432_v53 }
 0x43a   :  { %3979 = vrcp.f32 %v1185_v8  ;;  %v5444_v8 = vld [vmem:[#allocation6 + $0x38] sm:$0xff] }
 0x43b   :  { %7032 = vst [vmem:[#allocation25_spill] sm:$0xff] %v5444_v8 }
 0x443   :  { %v3976_v5 = vpop.eup %3975 }
 0x444   :  { %v1189_v6 = vmul.f32 %v3976_v5, %v3972_v54  ;;  %v5429_v54 = vld [vmem:[#allocation6 + $0x48] sm:$0xff]  ;;  %v5435_v5 = vld [vmem:[#allocation6 + $0x40] sm:$0xff] }
 0x445   :  { %v3978_v7 = vpop.eup %3977  ;;  %7027 = vst [vmem:[#allocation20_spill] sm:$0xff] %v5429_v54  ;;  %7029 = vst [vmem:[#allocation22_spill] sm:$0xff] %v5435_v5 }
 0x446   :  { %v1188_v9 = vmul.f32 %v3978_v7, %v5194_v1  ;;  %v5369_v1 = vld [vmem:[#allocation6 + $0xe8] sm:$0xff] }
 0x447   :  { %v3980_v12 = vpop.eup %3979  ;;  %v5441_v7 = vld [vmem:[#allocation6 + $0x28] sm:$0xff] }
 0x448   :  { %v5320_v10 = vadd.f32 %v1189_v6, %v1188_v9  ;;  %v5438_v6 = vld [vmem:[#allocation6 + $0x50] sm:$0xff]  ;;  %7031 = vst [vmem:[#allocation24_spill] sm:$0xff] %v5441_v7  ;;  %v5447_v9 = vld [vmem:[#allocation6 + $0x20] sm:$0xff] }
 0x449   :  { %7030 = vst [vmem:[#allocation23_spill] sm:$0xff] %v5438_v6  ;;  %7033 = vst [vmem:[#allocation26_spill] sm:$0xff] %v5447_v9 }
 0x44a   :  { %3981 = vtanh.f32 %v5320_v10 }
 0x457   :  { %v3982_v13 = vpop.eup %3981 }
 0x458   :  { %v5323_v14 = vmul.f32 %v3982_v13, %v3980_v12  ;;  %v5450_v12 = vld [vmem:[#allocation6 + $0x30] sm:$0xff]  ;;  %v5453_v13 = vld [vmem:[#allocation6 + $0x8] sm:$0xff] }
 0x459   :  { %7034 = vst [vmem:[#allocation27_spill] sm:$0xff] %v5450_v12  ;;  %7035 = vst [vmem:[#allocation28_spill] sm:$0xff] %v5453_v13 }
 0x45a   :  { %7019 = vst [vmem:[#allocation36_spill] sm:$0xff] %v5323_v14  ;;  %1265 = vmatmul.mubr.f32.vlgmr.msra.gmra.mxu0 %v5323_v14  ;;  %1336 = vmatmul.mubr.f32.vlgmr.msra.gmra.mxu1 %v5323_v14  ;;  %v5456_v14 = vld [vmem:[#allocation6 + $0x18] sm:$0xff] }
 0x45b   :  { %1378 = vmatpush1.msra.mxu0 %v5201_v29  ;;  %1449 = vmatpush1.msra.mxu1 %v5204_v0  ;;  %7036 = vst [vmem:[#allocation29_spill] sm:$0xff] %v5456_v14 }
 0x45c   :  { %1379 = vmatprep.subr.mxu0 %v5207_v38  ;;  %1450 = vmatprep.subr.mxu1 %v5210_v59 }
 0x45d   :  { %1380 = vmatpush1.msra.mxu0 %v5213_v57  ;;  %1451 = vmatpush1.msra.mxu1 %v5216_v56 }
 0x45e   :  { %1381 = vmatprep.subr.mxu0 %v5219_v55  ;;  %1452 = vmatprep.subr.mxu1 %v5222_v3 }
 0x45f   :  { %1382 = vmatpush1.msra.mxu0 %v5225_v2  ;;  %1453 = vmatpush1.msra.mxu1 %v5228_v60 }
 0x460   :  { %1383 = vmatprep.subr.mxu0 %v5231_v58  ;;  %1454 = vmatprep.subr.mxu1 %v5234_v11 }
 0x461   :  { %1384 = vmatpush1.msra.mxu0 %v5237_v47  ;;  %1455 = vmatpush1.msra.mxu1 %v5240_v27 }
 0x462   :  { %1385 = vmatprep.subr.mxu0 %v5243_v28  ;;  %1456 = vmatprep.subr.mxu1 %v5246_v30 }
 0x463   :  { %1386 = vmatpush1.msra.mxu0 %v7020_v15  ;;  %1457 = vmatpush1.msra.mxu1 %v7021_v16 }
 0x464   :  { %1387 = vmatprep.subr.mxu0 %v5255_v63  ;;  %1458 = vmatprep.subr.mxu1 %v5258_v51 }
 0x465   :  { %1388 = vmatpush1.msra.mxu0 %v5261_v52  ;;  %1459 = vmatpush1.msra.mxu1 %v5264_v61 }
 0x466   :  { %1389 = vmatprep.subr.mxu0 %v5267_v31  ;;  %1460 = vmatprep.subr.mxu1 %v5270_v4 }
 0x467   :  { %1390 = vmatpush1.msra.mxu0 %v5351_v17  ;;  %1461 = vmatpush1.msra.mxu1 %v5354_v18 }
 0x468   :  { %1391 = vmatprep.subr.mxu0 %v5357_v19  ;;  %1462 = vmatprep.subr.mxu1 %v5360_v21 }
 0x469   :  { %1392 = vmatpush1.msra.mxu0 %v5363_v22  ;;  %1463 = vmatpush1.msra.mxu1 %v5366_v24 }
 0x46a   :  { %1393 = vmatprep.subr.mxu0 %v5369_v1  ;;  %1464 = vmatprep.subr.mxu1 %v5372_v32 }
 0x46b   :  { %1394 = vmatpush1.msra.mxu0 %v5375_v33  ;;  %1465 = vmatpush1.msra.mxu1 %v5378_v34 }
 0x46c   :  { %1395 = vmatprep.subr.mxu0 %v5381_v35  ;;  %1466 = vmatprep.subr.mxu1 %v5384_v36 }
 0x46d   :  { %1396 = vmatpush1.msra.mxu0 %v5387_v37  ;;  %1467 = vmatpush1.msra.mxu1 %v5390_v39 }
 0x46e   :  { %1397 = vmatprep.subr.mxu0 %v5393_v40  ;;  %1468 = vmatprep.subr.mxu1 %v5396_v41 }
 0x46f   :  { %1398 = vmatpush1.msra.mxu0 %v5399_v42  ;;  %1469 = vmatpush1.msra.mxu1 %v5402_v43 }
 0x470   :  { %1399 = vmatprep.subr.mxu0 %v5405_v44  ;;  %1470 = vmatprep.subr.mxu1 %v5408_v45 }
 0x471   :  { %1400 = vmatpush1.msra.mxu0 %v5411_v46  ;;  %1471 = vmatpush1.msra.mxu1 %v5414_v48 }
 0x472   :  { %1401 = vmatprep.subr.mxu0 %v5417_v49  ;;  %1472 = vmatprep.subr.mxu1 %v5420_v50  ;;  %v7042_v50 = vld [vmem:[#allocation47_spill] sm:$0xff] }
 0x473   :  { %1402 = vmatpush1.msra.mxu0 %v5423_v20  ;;  %1473 = vmatpush1.msra.mxu1 %v5426_v62  ;;  %v7041_v20 = vld [vmem:[#allocation49_spill] sm:$0xff] }
 0x474   :  { %1403 = vmatprep.subr.mxu0 %v5429_v54  ;;  %1474 = vmatprep.subr.mxu1 %v5432_v53 }
 0x475   :  { %1404 = vmatpush1.msra.mxu0 %v5435_v5  ;;  %1475 = vmatpush1.msra.mxu1 %v5438_v6  ;;  %v7040_v5 = vld [vmem:[#allocation48_spill] sm:$0xff] }
 0x476   :  { %1405 = vmatprep.subr.mxu0 %v5441_v7  ;;  %1476 = vmatprep.subr.mxu1 %v5444_v8  ;;  %v5459_v7 = vld [vmem:[#allocation6] sm:$0xff]  ;;  %v5463_v8 = vld [vmem:[#allocation6 + $0x10] sm:$0xff] }
 0x477   :  { %1406 = vmatpush1.msra.mxu0 %v5447_v9  ;;  %1477 = vmatpush1.msra.mxu1 %v5450_v12  ;;  %7037 = vst [vmem:[#allocation30_spill] sm:$0xff] %v5459_v7  ;;  %7038 = vst [vmem:[#allocation31_spill] sm:$0xff] %v5463_v8  ;;  %v7039_v12 = vld [vmem:[#allocation46_spill] sm:$0xff] }
 0x478   :  { %1407 = vmatprep.subr.mxu0 %v5453_v13  ;;  %1478 = vmatprep.subr.mxu1 %v5456_v14 }
 0x479   :  { %1408 = vmatpush1.msra.mxu0 %v5459_v7  ;;  %1441 = vmatprep.mubr.f32.mxu0 %v7004_v23 }
 0x47a   :  { %1479 = vmatpush1.msra.mxu1 %v5463_v8  ;;  %1512 = vmatprep.mubr.f32.mxu1 %v7004_v23 }
 0x47b   :  { %1554 = vmatprep.subr.mxu0 %v5183_v25  ;;  %1625 = vmatprep.subr.mxu1 %v5186_v26 }
 0x51a   :  { %v1266_v13 = vpop.f32.mrf.mxu0  ;;  %v1337_v7 = vpop.f32.mrf.mxu1 }
 0x51b   :  { %v1342_v9 = vadd.f32 %v1266_v13, %v7039_v12  ;;  %v1344_v23 = vadd.f32 %v1337_v7, %v7042_v50  ;;  %v7049_v7 = vld [vmem:[#allocation20_spill] sm:$0xff] }
 0x51c   :  { %v1268_v14 = vpop.f32.mrf.mxu0  ;;  %v1339_v62 = vpop.f32.mrf.mxu1 }
 0x51d   :  { %v3823_v6 = vmul.f32 -1.442695, %v1342_v9  ;;  %v1343_v53 = vadd.f32 %v1268_v14, %v7040_v5  ;;  %v1345_v8 = vadd.f32 %v1339_v62, %v7041_v20  ;;  %v7048_v62 = vld [vmem:[#allocation19_spill] sm:$0xff] }
 0x51f   :  { %3983 = vpow2.f32 %v3823_v6  ;;  %v3824_v54 = vmul.f32 -1.442695, %v1343_v53  ;;  %v3825_v49 = vmul.f32 -1.442695, %v1345_v8  ;;  %v7050_v8 = vld [vmem:[#allocation21_spill] sm:$0xff] }
 0x521   :  { %3985 = vpow2.f32 %v3824_v54 }
 0x522   :  { %3987 = vtanh.f32 %v1344_v23 }
 0x523   :  { %3989 = vpow2.f32 %v3825_v49  ;;  %v7047_v49 = vld [vmem:[#allocation18_spill] sm:$0xff] }
 0x52c   :  { %v3984_v25 = vpop.eup %3983 }
 0x52d   :  { %v1349_v48 = vadd.f32 1.0, %v3984_v25 }
 0x52e   :  { %v3986_v26 = vpop.eup %3985 }
 0x52f   :  { %3991 = vrcp.f32 %v1349_v48  ;;  %v1355_v12 = vadd.f32 1.0, %v3986_v26  ;;  %v3988_v9 = vpop.eup %3987  ;;  %v7044_v26 = vld [vmem:[#allocation37_spill] sm:$0xff] }
 0x530   :  { %v3990_v14 = vpop.eup %3989  ;;  %v7046_v48 = vld [vmem:[#allocation17_spill] sm:$0xff] }
 0x531   :  { %3993 = vrcp.f32 %v1355_v12  ;;  %v1362_v54 = vadd.f32 1.0, %v3990_v14  ;;  %v7051_v12 = vld [vmem:[#allocation22_spill] sm:$0xff]  ;;  %v7053_v14 = vld [vmem:[#allocation24_spill] sm:$0xff] }
 0x533   :  { %3995 = vrcp.f32 %v1362_v54  ;;  %v7057_v54 = vld [vmem:[#allocation28_spill] sm:$0xff] }
 0x53c   :  { %v3992_v5 = vpop.eup %3991 }
 0x53d   :  { %v1366_v6 = vmul.f32 %v3992_v5, %v3988_v9  ;;  %v7052_v9 = vld [vmem:[#allocation23_spill] sm:$0xff]  ;;  %v7054_v5 = vld [vmem:[#allocation25_spill] sm:$0xff] }
 0x53e   :  { %v3994_v53 = vpop.eup %3993 }
 0x53f   :  { %v1365_v13 = vmul.f32 %v3994_v53, %v5320_v10  ;;  %v7045_v10 = vld [vmem:[#allocation35_spill] sm:$0xff] }
 0x540   :  { %v3996_v25 = vpop.eup %3995  ;;  %v7056_v53 = vld [vmem:[#allocation27_spill] sm:$0xff] }
 0x541   :  { %v5474_v20 = vadd.f32 %v1366_v6, %v1365_v13  ;;  %v7055_v6 = vld [vmem:[#allocation26_spill] sm:$0xff]  ;;  %v7058_v13 = vld [vmem:[#allocation29_spill] sm:$0xff] }
 0x543   :  { %3997 = vtanh.f32 %v5474_v20 }
 0x550   :  { %v3998_v23 = vpop.eup %3997 }
 0x551   :  { %v5477_v50 = vmul.f32 %v3998_v23, %v3996_v25  ;;  %v7059_v25 = vld [vmem:[#allocation30_spill] sm:$0xff]  ;;  %v7060_v23 = vmov 0.0  }
 0x553   :  { %7043 = vst [vmem:[#allocation32_spill] sm:$0xff] %v5477_v50  ;;  %1442 = vmatmul.mubr.f32.vlgmr.msra.gmra.mxu0 %v5477_v50  ;;  %1513 = vmatmul.mubr.f32.vlgmr.msra.gmra.mxu1 %v5477_v50  ;;  %v7061_v50 = vld [vmem:[#allocation31_spill] sm:$0xff] }
 0x554   :  { %1555 = vmatpush1.msra.mxu0 %v5201_v29  ;;  %1626 = vmatpush1.msra.mxu1 %v5204_v0 }
 0x555   :  { %1556 = vmatprep.subr.mxu0 %v5207_v38  ;;  %1627 = vmatprep.subr.mxu1 %v5210_v59 }
 0x556   :  { %1557 = vmatpush1.msra.mxu0 %v5213_v57  ;;  %1628 = vmatpush1.msra.mxu1 %v5216_v56 }
 0x557   :  { %1558 = vmatprep.subr.mxu0 %v5219_v55  ;;  %1629 = vmatprep.subr.mxu1 %v5222_v3 }
 0x558   :  { %1559 = vmatpush1.msra.mxu0 %v5225_v2  ;;  %1630 = vmatpush1.msra.mxu1 %v5228_v60 }
 0x559   :  { %1560 = vmatprep.subr.mxu0 %v5231_v58  ;;  %1631 = vmatprep.subr.mxu1 %v5234_v11 }
 0x55a   :  { %1561 = vmatpush1.msra.mxu0 %v5237_v47  ;;  %1632 = vmatpush1.msra.mxu1 %v5240_v27 }
 0x55b   :  { %1562 = vmatprep.subr.mxu0 %v5243_v28  ;;  %1633 = vmatprep.subr.mxu1 %v5246_v30 }
 0x55c   :  { %1563 = vmatpush1.msra.mxu0 %v7020_v15  ;;  %1634 = vmatpush1.msra.mxu1 %v7021_v16 }
 0x55d   :  { %1564 = vmatprep.subr.mxu0 %v5255_v63  ;;  %1635 = vmatprep.subr.mxu1 %v5258_v51 }
 0x55e   :  { %1565 = vmatpush1.msra.mxu0 %v5261_v52  ;;  %1636 = vmatpush1.msra.mxu1 %v5264_v61 }
 0x55f   :  { %1566 = vmatprep.subr.mxu0 %v5267_v31  ;;  %1637 = vmatprep.subr.mxu1 %v5270_v4 }
 0x560   :  { %1567 = vmatpush1.msra.mxu0 %v5351_v17  ;;  %1638 = vmatpush1.msra.mxu1 %v5354_v18 }
 0x561   :  { %1568 = vmatprep.subr.mxu0 %v5357_v19  ;;  %1639 = vmatprep.subr.mxu1 %v5360_v21 }
 0x562   :  { %1569 = vmatpush1.msra.mxu0 %v5363_v22  ;;  %1640 = vmatpush1.msra.mxu1 %v5366_v24 }
 0x563   :  { %1570 = vmatprep.subr.mxu0 %v5369_v1  ;;  %1641 = vmatprep.subr.mxu1 %v5372_v32 }
 0x564   :  { %1571 = vmatpush1.msra.mxu0 %v5375_v33  ;;  %1642 = vmatpush1.msra.mxu1 %v5378_v34 }
 0x565   :  { %1572 = vmatprep.subr.mxu0 %v5381_v35  ;;  %1643 = vmatprep.subr.mxu1 %v5384_v36 }
 0x566   :  { %1573 = vmatpush1.msra.mxu0 %v5387_v37  ;;  %1644 = vmatpush1.msra.mxu1 %v5390_v39 }
 0x567   :  { %1574 = vmatprep.subr.mxu0 %v5393_v40  ;;  %1645 = vmatprep.subr.mxu1 %v5396_v41 }
 0x568   :  { %1575 = vmatpush1.msra.mxu0 %v5399_v42  ;;  %1646 = vmatpush1.msra.mxu1 %v5402_v43 }
 0x569   :  { %1576 = vmatprep.subr.mxu0 %v5405_v44  ;;  %1647 = vmatprep.subr.mxu1 %v5408_v45 }
 0x56a   :  { %1577 = vmatpush1.msra.mxu0 %v5411_v46  ;;  %1648 = vmatpush1.msra.mxu1 %v7044_v26 }
 0x56b   :  { %1578 = vmatprep.subr.mxu0 %v7045_v10  ;;  %1649 = vmatprep.subr.mxu1 %v7046_v48  ;;  %v7067_v48 = vld [vmem:[#allocation51_spill] sm:$0xff] }
 0x56c   :  { %1579 = vmatpush1.msra.mxu0 %v7047_v49  ;;  %1650 = vmatpush1.msra.mxu1 %v7048_v62  ;;  %v7066_v49 = vld [vmem:[#allocation53_spill] sm:$0xff] }
 0x56d   :  { %1580 = vmatprep.subr.mxu0 %v7049_v7  ;;  %1651 = vmatprep.subr.mxu1 %v7050_v8 }
 0x56e   :  { %1581 = vmatpush1.msra.mxu0 %v7051_v12  ;;  %1652 = vmatpush1.msra.mxu1 %v7052_v9  ;;  %v7062_v9 = vld [vmem:[#allocation14_spill] sm:$0xff] }
 0x56f   :  { %1582 = vmatprep.subr.mxu0 %v7053_v14  ;;  %1653 = vmatprep.subr.mxu1 %v7054_v5  ;;  %v7063_v14 = vld [vmem:[#allocation15_spill] sm:$0xff] }
 0x570   :  { %1583 = vmatpush1.msra.mxu0 %v7055_v6  ;;  %1654 = vmatpush1.msra.mxu1 %v7056_v53  ;;  %v7064_v6 = vld [vmem:[#allocation50_spill] sm:$0xff] }
 0x571   :  { %1584 = vmatprep.subr.mxu0 %v7057_v54  ;;  %1655 = vmatprep.subr.mxu1 %v7058_v13  ;;  %v7065_v54 = vld [vmem:[#allocation52_spill] sm:$0xff] }
 0x572   :  { %1585 = vmatpush1.msra.mxu0 %v7059_v25  ;;  %1618 = vmatprep.mubr.f32.mxu0 %v7060_v23 }
 0x573   :  { %1656 = vmatpush1.msra.mxu1 %v7061_v50  ;;  %1689 = vmatprep.mubr.f32.mxu1 %v7060_v23 }
 0x574   :  { %1731 = vmatprep.subr.mxu0 %v7062_v9  ;;  %1802 = vmatprep.subr.mxu1 %v7063_v14 }
 0x613   :  { %v1443_v5 = vpop.f32.mrf.mxu0  ;;  %v1514_v13 = vpop.f32.mrf.mxu1 }
 0x614   :  { %v1519_v12 = vadd.f32 %v1443_v5, %v7064_v6  ;;  %v1521_v23 = vadd.f32 %v1514_v13, %v7067_v48 }
 0x615   :  { %v1445_v53 = vpop.f32.mrf.mxu0  ;;  %v1516_v62 = vpop.f32.mrf.mxu1 }
 0x616   :  { %v3826_v8 = vmul.f32 -1.442695, %v1519_v12  ;;  %v1520_v7 = vadd.f32 %v1445_v53, %v7065_v54  ;;  %v1522_v50 = vadd.f32 %v1516_v62, %v7066_v49 }
 0x618   :  { %3999 = vpow2.f32 %v3826_v8  ;;  %v3827_v25 = vmul.f32 -1.442695, %v1520_v7  ;;  %v3828_v10 = vmul.f32 -1.442695, %v1522_v50 }
 0x61a   :  { %4001 = vpow2.f32 %v3827_v25 }
 0x61b   :  { %4003 = vtanh.f32 %v1521_v23 }
 0x61c   :  { %4005 = vpow2.f32 %v3828_v10 }
 0x625   :  { %v4000_v9 = vpop.eup %3999 }
 0x626   :  { %v1526_v26 = vadd.f32 1.0, %v4000_v9  ;;  %v1971_v9 = vld [vmem:[#allocation4 + $0x1e0] sm:$0xff] }
 0x627   :  { %v4002_v14 = vpop.eup %4001 }
 0x628   :  { %4007 = vrcp.f32 %v1526_v26  ;;  %v1532_v5 = vadd.f32 1.0, %v4002_v14  ;;  %v4004_v12 = vpop.eup %4003  ;;  %v1973_v14 = vld [vmem:[#allocation4 + $0x1f0] sm:$0xff] }
 0x629   :  { %v4006_v6 = vpop.eup %4005 }
 0x62a   :  { %4009 = vrcp.f32 %v1532_v5  ;;  %v1539_v54 = vadd.f32 1.0, %v4006_v6  ;;  %v1968_v5 = vld [vmem:[#allocation4 + $0x1c8] sm:$0xff]  ;;  %v1967_v6 = vld [vmem:[#allocation4 + $0x1c0] sm:$0xff] }
 0x62c   :  { %4011 = vrcp.f32 %v1539_v54  ;;  %v1963_v54 = vld [vmem:[#allocation4 + $0x1a0] sm:$0xff] }
 0x635   :  { %v4008_v8 = vpop.eup %4007 }
 0x636   :  { %v1543_v53 = vmul.f32 %v4008_v8, %v4004_v12  ;;  %v1970_v12 = vld [vmem:[#allocation4 + $0x1d8] sm:$0xff]  ;;  %v1969_v8 = vld [vmem:[#allocation4 + $0x1d0] sm:$0xff] }
 0x637   :  { %v4010_v7 = vpop.eup %4009 }
 0x638   :  { %v1542_v25 = vmul.f32 %v4010_v7, %v5474_v20  ;;  %v1966_v7 = vld [vmem:[#allocation4 + $0x1b8] sm:$0xff] }
 0x639   :  { %v4012_v50 = vpop.eup %4011 }
 0x63a   :  { %v5552_v49 = vadd.f32 %v1543_v53, %v1542_v25  ;;  %v1964_v53 = vld [vmem:[#allocation4 + $0x1a8] sm:$0xff]  ;;  %v1965_v25 = vld [vmem:[#allocation4 + $0x1b0] sm:$0xff] }
 0x63c   :  { %4013 = vtanh.f32 %v5552_v49 }
 0x649   :  { %v4014_v48 = vpop.eup %4013 }
 0x64a   :  { %v5555_v62 = vmul.f32 %v4014_v48, %v4012_v50  ;;  %v1962_v50 = vld [vmem:[#allocation4 + $0x198] sm:$0xff]  ;;  %v1959_v48 = vld [vmem:[#allocation4 + $0x180] sm:$0xff] }
 0x64c   :  { %1619 = vmatmul.mubr.f32.vlgmr.msra.gmra.mxu0 %v5555_v62  ;;  %1690 = vmatmul.mubr.f32.vlgmr.msra.gmra.mxu1 %v5555_v62 }
 0x64d   :  { %1732 = vmatpush1.msra.mxu0 %v5201_v29  ;;  %1803 = vmatpush1.msra.mxu1 %v5204_v0  ;;  %v7070_v29 = vld [vmem:[#allocation17_spill] sm:$0xff]  ;;  %v7071_v0 = vld [vmem:[#allocation18_spill] sm:$0xff] }
 0x64e   :  { %1733 = vmatprep.subr.mxu0 %v5207_v38  ;;  %1804 = vmatprep.subr.mxu1 %v5210_v59  ;;  %v7072_v38 = vld [vmem:[#allocation19_spill] sm:$0xff]  ;;  %v7073_v59 = vld [vmem:[#allocation20_spill] sm:$0xff] }
 0x64f   :  { %1734 = vmatpush1.msra.mxu0 %v5213_v57  ;;  %1805 = vmatpush1.msra.mxu1 %v5216_v56  ;;  %v7074_v57 = vld [vmem:[#allocation21_spill] sm:$0xff]  ;;  %v7075_v56 = vld [vmem:[#allocation22_spill] sm:$0xff] }
 0x650   :  { %1735 = vmatprep.subr.mxu0 %v5219_v55  ;;  %1806 = vmatprep.subr.mxu1 %v5222_v3  ;;  %v7076_v55 = vld [vmem:[#allocation23_spill] sm:$0xff]  ;;  %v7077_v3 = vld [vmem:[#allocation24_spill] sm:$0xff] }
 0x651   :  { %1736 = vmatpush1.msra.mxu0 %v5225_v2  ;;  %1807 = vmatpush1.msra.mxu1 %v5228_v60  ;;  %v7078_v2 = vld [vmem:[#allocation25_spill] sm:$0xff]  ;;  %v7079_v60 = vld [vmem:[#allocation26_spill] sm:$0xff] }
 0x652   :  { %1737 = vmatprep.subr.mxu0 %v5231_v58  ;;  %1808 = vmatprep.subr.mxu1 %v5234_v11  ;;  %v7080_v58 = vld [vmem:[#allocation27_spill] sm:$0xff]  ;;  %v7081_v11 = vld [vmem:[#allocation28_spill] sm:$0xff] }
 0x653   :  { %1738 = vmatpush1.msra.mxu0 %v5237_v47  ;;  %1809 = vmatpush1.msra.mxu1 %v5240_v27  ;;  %v7082_v47 = vld [vmem:[#allocation29_spill] sm:$0xff]  ;;  %v7083_v27 = vld [vmem:[#allocation30_spill] sm:$0xff] }
 0x654   :  { %1739 = vmatprep.subr.mxu0 %v5243_v28  ;;  %1810 = vmatprep.subr.mxu1 %v5246_v30  ;;  %v7084_v28 = vld [vmem:[#allocation31_spill] sm:$0xff]  ;;  %v7085_v30 = vmov 0.0  }
 0x655   :  { %1740 = vmatpush1.msra.mxu0 %v7020_v15  ;;  %1811 = vmatpush1.msra.mxu1 %v7021_v16 }
 0x656   :  { %1741 = vmatprep.subr.mxu0 %v5255_v63  ;;  %1812 = vmatprep.subr.mxu1 %v5258_v51  ;;  %v7086_v51 = vld [vmem:[#allocation54_spill] sm:$0xff] }
 0x657   :  { %1742 = vmatpush1.msra.mxu0 %v5261_v52  ;;  %1813 = vmatpush1.msra.mxu1 %v5264_v61  ;;  %v7068_v61 = vld [vmem:[#allocation37_spill] sm:$0xff]  ;;  %v7069_v52 = vld [vmem:[#allocation35_spill] sm:$0xff] }
 0x658   :  { %1743 = vmatprep.subr.mxu0 %v5267_v31  ;;  %1814 = vmatprep.subr.mxu1 %v5270_v4  ;;  %v1972_v31 = vld [vmem:[#allocation4 + $0x1e8] sm:$0xff]  ;;  %v1974_v4 = vld [vmem:[#allocation4 + $0x1f8] sm:$0xff] }
 0x659   :  { %1744 = vmatpush1.msra.mxu0 %v5351_v17  ;;  %1815 = vmatpush1.msra.mxu1 %v5354_v18  ;;  %v7087_v18 = vld [vmem:[#allocation56_spill] sm:$0xff] }
 0x65a   :  { %1745 = vmatprep.subr.mxu0 %v5357_v19  ;;  %1816 = vmatprep.subr.mxu1 %v5360_v21 }
 0x65b   :  { %1746 = vmatpush1.msra.mxu0 %v5363_v22  ;;  %1817 = vmatpush1.msra.mxu1 %v5366_v24 }
 0x65c   :  { %1747 = vmatprep.subr.mxu0 %v5369_v1  ;;  %1818 = vmatprep.subr.mxu1 %v5372_v32  ;;  %v7088_v1 = vld [vmem:[#allocation57_spill] sm:$0xff] }
 0x65d   :  { %1748 = vmatpush1.msra.mxu0 %v5375_v33  ;;  %1819 = vmatpush1.msra.mxu1 %v5378_v34  ;;  %v7089_v33 = vld [vmem:[#allocation55_spill] sm:$0xff] }
 0x65e   :  { %1749 = vmatprep.subr.mxu0 %v5381_v35  ;;  %1820 = vmatprep.subr.mxu1 %v5384_v36 }
 0x65f   :  { %1750 = vmatpush1.msra.mxu0 %v5387_v37  ;;  %1821 = vmatpush1.msra.mxu1 %v5390_v39 }
 0x660   :  { %1751 = vmatprep.subr.mxu0 %v5393_v40  ;;  %1822 = vmatprep.subr.mxu1 %v5396_v41 }
 0x661   :  { %1752 = vmatpush1.msra.mxu0 %v5399_v42  ;;  %1823 = vmatpush1.msra.mxu1 %v5402_v43 }
 0x662   :  { %1753 = vmatprep.subr.mxu0 %v5405_v44  ;;  %1824 = vmatprep.subr.mxu1 %v5408_v45 }
 0x663   :  { %1754 = vmatpush1.msra.mxu0 %v5411_v46  ;;  %1825 = vmatpush1.msra.mxu1 %v7068_v61  ;;  %v1961_v61 = vld [vmem:[#allocation4 + $0x190] sm:$0xff] }
 0x664   :  { %1755 = vmatprep.subr.mxu0 %v7069_v52  ;;  %1826 = vmatprep.subr.mxu1 %v7070_v29  ;;  %v1956_v52 = vld [vmem:[#allocation4 + $0x168] sm:$0xff]  ;;  %v1958_v29 = vld [vmem:[#allocation4 + $0x178] sm:$0xff] }
 0x665   :  { %1756 = vmatpush1.msra.mxu0 %v7071_v0  ;;  %1827 = vmatpush1.msra.mxu1 %v7072_v38  ;;  %v1955_v0 = vld [vmem:[#allocation4 + $0x160] sm:$0xff]  ;;  %v1957_v38 = vld [vmem:[#allocation4 + $0x170] sm:$0xff] }
 0x666   :  { %1757 = vmatprep.subr.mxu0 %v7073_v59  ;;  %1828 = vmatprep.subr.mxu1 %v7074_v57  ;;  %v1952_v59 = vld [vmem:[#allocation4 + $0x148] sm:$0xff]  ;;  %v1954_v57 = vld [vmem:[#allocation4 + $0x158] sm:$0xff] }
 0x667   :  { %1758 = vmatpush1.msra.mxu0 %v7075_v56  ;;  %1829 = vmatpush1.msra.mxu1 %v7076_v55  ;;  %v1951_v56 = vld [vmem:[#allocation4 + $0x140] sm:$0xff]  ;;  %v1953_v55 = vld [vmem:[#allocation4 + $0x150] sm:$0xff] }
 0x668   :  { %1759 = vmatprep.subr.mxu0 %v7077_v3  ;;  %1830 = vmatprep.subr.mxu1 %v7078_v2  ;;  %v1948_v3 = vld [vmem:[#allocation4 + $0x128] sm:$0xff]  ;;  %v1950_v2 = vld [vmem:[#allocation4 + $0x138] sm:$0xff] }
 0x669   :  { %1760 = vmatpush1.msra.mxu0 %v7079_v60  ;;  %1831 = vmatpush1.msra.mxu1 %v7080_v58  ;;  %v1947_v60 = vld [vmem:[#allocation4 + $0x120] sm:$0xff]  ;;  %v1949_v58 = vld [vmem:[#allocation4 + $0x130] sm:$0xff] }
 0x66a   :  { %1761 = vmatprep.subr.mxu0 %v7081_v11  ;;  %1832 = vmatprep.subr.mxu1 %v7082_v47  ;;  %v1944_v11 = vld [vmem:[#allocation4 + $0x108] sm:$0xff]  ;;  %v1946_v47 = vld [vmem:[#allocation4 + $0x118] sm:$0xff] }
 0x66b   :  { %1762 = vmatpush1.msra.mxu0 %v7083_v27  ;;  %1833 = vmatpush1.msra.mxu1 %v7084_v28  ;;  %v1943_v27 = vld [vmem:[#allocation4 + $0x100] sm:$0xff]  ;;  %v1945_v28 = vld [vmem:[#allocation4 + $0x110] sm:$0xff] }
 0x66c   :  { %1795 = vmatprep.mubr.f32.mxu0 %v7085_v30  ;;  %1866 = vmatprep.mubr.f32.mxu1 %v7085_v30 }
 0x66d   :  { %1997 = vmatprep.subr.mxu0 %v1972_v31  ;;  %2110 = vmatprep.subr.mxu1 %v1974_v4  ;;  %v1940_v31 = vld [vmem:[#allocation4 + $0xe8] sm:$0xff]  ;;  %v1942_v4 = vld [vmem:[#allocation4 + $0xf8] sm:$0xff] }
 0x70c   :  { %v1620_v63 = vpop.f32.mrf.mxu0  ;;  %v1691_v21 = vpop.f32.mrf.mxu1 }
 0x70d   :  { %v1696_v15 = vadd.f32 %v1620_v63, %v7086_v51  ;;  %v1698_v34 = vadd.f32 %v1691_v21, %v7089_v33  ;;  %v1939_v63 = vld [vmem:[#allocation4 + $0xe0] sm:$0xff]  ;;  %v1941_v51 = vld [vmem:[#allocation4 + $0xf0] sm:$0xff]  ;;  %v1934_v21 = vld [vmem:[#allocation4 + $0xb8] sm:$0xff] }
 0x70e   :  { %v1622_v16 = vpop.f32.mrf.mxu0  ;;  %v1693_v24 = vpop.f32.mrf.mxu1  ;;  %v1927_v33 = vld [vmem:[#allocation4 + $0x80] sm:$0xff] }
 0x70f   :  { %v3829_v17 = vmul.f32 -1.442695, %v1696_v15  ;;  %v1697_v19 = vadd.f32 %v1622_v16, %v7087_v18  ;;  %v1699_v32 = vadd.f32 %v1693_v24, %v7088_v1  ;;  %v1936_v15 = vld [vmem:[#allocation4 + $0xc8] sm:$0xff]  ;;  %v1938_v16 = vld [vmem:[#allocation4 + $0xd8] sm:$0xff]  ;;  %v1937_v18 = vld [vmem:[#allocation4 + $0xd0] sm:$0xff] }
 0x710   :  { %v1933_v24 = vld [vmem:[#allocation4 + $0xb0] sm:$0xff]  ;;  %v1928_v1 = vld [vmem:[#allocation4 + $0x88] sm:$0xff] }
 0x711   :  { %4015 = vpow2.f32 %v3829_v17  ;;  %v3830_v22 = vmul.f32 -1.442695, %v1697_v19  ;;  %v3831_v35 = vmul.f32 -1.442695, %v1699_v32  ;;  %v1935_v17 = vld [vmem:[#allocation4 + $0xc0] sm:$0xff]  ;;  %v1932_v19 = vld [vmem:[#allocation4 + $0xa8] sm:$0xff] }
 0x712   :  { %v1930_v32 = vld [vmem:[#allocation4 + $0x98] sm:$0xff] }
 0x713   :  { %4017 = vpow2.f32 %v3830_v22  ;;  %v1931_v22 = vld [vmem:[#allocation4 + $0xa0] sm:$0xff] }
 0x714   :  { %4019 = vtanh.f32 %v1698_v34  ;;  %v1929_v34 = vld [vmem:[#allocation4 + $0x90] sm:$0xff] }
 0x715   :  { %4021 = vpow2.f32 %v3831_v35  ;;  %v1924_v35 = vld [vmem:[#allocation4 + $0x68] sm:$0xff] }
 0x71e   :  { %v4016_v36 = vpop.eup %4015 }
 0x71f   :  { %v1703_v37 = vadd.f32 1.0, %v4016_v36  ;;  %v1926_v36 = vld [vmem:[#allocation4 + $0x78] sm:$0xff] }
 0x720   :  { %v4018_v39 = vpop.eup %4017 }
 0x721   :  { %4023 = vrcp.f32 %v1703_v37  ;;  %v1709_v40 = vadd.f32 1.0, %v4018_v39  ;;  %v4020_v41 = vpop.eup %4019  ;;  %v1923_v37 = vld [vmem:[#allocation4 + $0x60] sm:$0xff]  ;;  %v1925_v39 = vld [vmem:[#allocation4 + $0x70] sm:$0xff] }
 0x722   :  { %v4022_v42 = vpop.eup %4021 }
 0x723   :  { %4025 = vrcp.f32 %v1709_v40  ;;  %v1716_v46 = vadd.f32 1.0, %v4022_v42  ;;  %v1920_v40 = vld [vmem:[#allocation4 + $0x48] sm:$0xff]  ;;  %v1919_v42 = vld [vmem:[#allocation4 + $0x40] sm:$0xff] }
 0x725   :  { %4027 = vrcp.f32 %v1716_v46  ;;  %v1915_v46 = vld [vmem:[#allocation4 + $0x20] sm:$0xff] }
 0x72e   :  { %v4024_v43 = vpop.eup %4023 }
 0x72f   :  { %v1720_v44 = vmul.f32 %v4024_v43, %v4020_v41  ;;  %v1922_v41 = vld [vmem:[#allocation4 + $0x58] sm:$0xff]  ;;  %v1921_v43 = vld [vmem:[#allocation4 + $0x50] sm:$0xff] }
 0x730   :  { %v4026_v45 = vpop.eup %4025 }
 0x731   :  { %v1719_v20 = vmul.f32 %v4026_v45, %v5552_v49  ;;  %v1960_v49 = vld [vmem:[#allocation4 + $0x188] sm:$0xff]  ;;  %v1918_v45 = vld [vmem:[#allocation4 + $0x38] sm:$0xff] }
 0x732   :  { %v4028_v10 = vpop.eup %4027 }
 0x733   :  { %v5628_v26 = vadd.f32 %v1720_v44, %v1719_v20  ;;  %v1916_v44 = vld [vmem:[#allocation4 + $0x28] sm:$0xff]  ;;  %v1917_v20 = vld [vmem:[#allocation4 + $0x30] sm:$0xff] }
 0x735   :  { %4029 = vtanh.f32 %v5628_v26 }
 0x742   :  { %v4030_v13 = vpop.eup %4029 }
 0x743   :  { %v5631_v23 = vmul.f32 %v4030_v13, %v4028_v10  ;;  %v1912_v10 = vld [vmem:[#allocation4 + $0x8] sm:$0xff]  ;;  %v1914_v13 = vld [vmem:[#allocation4 + $0x18] sm:$0xff] }
 0x745   :  { %1796 = vmatmul.mubr.f32.vlgmr.msra.gmra.mxu0 %v5631_v23  ;;  %1867 = vmatmul.mubr.f32.vlgmr.msra.gmra.mxu1 %v5631_v23 }
 0x746   :  { %1998 = vmatpush1.msra.mxu0 %v1971_v9  ;;  %2111 = vmatpush1.msra.mxu1 %v1973_v14  ;;  %v1911_v9 = vld [vmem:[#allocation4] sm:$0xff]  ;;  %v1913_v14 = vld [vmem:[#allocation4 + $0x10] sm:$0xff] }
 0x747   :  { %1999 = vmatprep.subr.mxu0 %v1968_v5  ;;  %2112 = vmatprep.subr.mxu1 %v1970_v12  ;;  %v7090_v5 = vld [vmem:[#allocation62_spill] sm:$0xff]  ;;  %v7091_v12 = vld [vmem:[#allocation13_spill] sm:$0xff] }
 0x748   :  { %2000 = vmatpush1.msra.mxu0 %v1967_v6  ;;  %2113 = vmatpush1.msra.mxu1 %v1969_v8  ;;  %v7092_v6 = vld [vmem:[#allocation16_spill] sm:$0xff] }
 0x749   :  { %2001 = vmatprep.subr.mxu0 %v1964_v53  ;;  %2114 = vmatprep.subr.mxu1 %v1966_v7  ;;  %v7093_v8 = vld [vmem:[#allocation36_spill] sm:$0xff] }
 0x74a   :  { %2002 = vmatpush1.msra.mxu0 %v1963_v54  ;;  %2115 = vmatpush1.msra.mxu1 %v1965_v25  ;;  %v7094_v53 = vld [vmem:[#allocation32_spill] sm:$0xff]  ;;  %v5667_v54 = vld [vmem:[#allocation8 + $0x1f8] sm:$0xff]  ;;  %v5673_v25 = vld [vmem:[#allocation8 + $0x1f0] sm:$0xff] }
 0x74b   :  { %2003 = vmatprep.subr.mxu0 %v1960_v49  ;;  %2116 = vmatprep.subr.mxu1 %v1962_v50  ;;  %v5665_v7 = vld [vmem:[#allocation8 + $0x1e8] sm:$0xff]  ;;  %7096 = vst [vmem:[#allocation38_spill] sm:$0xff] %v5667_v54  ;;  %v5679_v49 = vld [vmem:[#allocation8 + $0x1d8] sm:$0xff]  ;;  %v5683_v50 = vld [vmem:[#allocation8 + $0x1c0] sm:$0xff] }
 0x74c   :  { %2004 = vmatpush1.msra.mxu0 %v1959_v48  ;;  %2117 = vmatpush1.msra.mxu1 %v1961_v61  ;;  %7095 = vst [vmem:[#allocation33_spill] sm:$0xff] %v5665_v7  ;;  %v5685_v48 = vld [vmem:[#allocation8 + $0x1d0] sm:$0xff]  ;;  %v5689_v61 = vld [vmem:[#allocation8 + $0x1a8] sm:$0xff] }
 0x74d   :  { %2005 = vmatprep.subr.mxu0 %v1956_v52  ;;  %2118 = vmatprep.subr.mxu1 %v1958_v29  ;;  %v5691_v52 = vld [vmem:[#allocation8 + $0x1b8] sm:$0xff]  ;;  %v5695_v29 = vld [vmem:[#allocation8 + $0x1a0] sm:$0xff] }
 0x74e   :  { %2006 = vmatpush1.msra.mxu0 %v1955_v0  ;;  %2119 = vmatpush1.msra.mxu1 %v1957_v38  ;;  %v5697_v0 = vld [vmem:[#allocation8 + $0x1b0] sm:$0xff]  ;;  %v5701_v38 = vld [vmem:[#allocation8 + $0x188] sm:$0xff] }
 0x74f   :  { %2007 = vmatprep.subr.mxu0 %v1952_v59  ;;  %2120 = vmatprep.subr.mxu1 %v1954_v57  ;;  %v5703_v59 = vld [vmem:[#allocation8 + $0x198] sm:$0xff]  ;;  %v5707_v57 = vld [vmem:[#allocation8 + $0x180] sm:$0xff] }
 0x750   :  { %2008 = vmatpush1.msra.mxu0 %v1951_v56  ;;  %2121 = vmatpush1.msra.mxu1 %v1953_v55  ;;  %v5709_v56 = vld [vmem:[#allocation8 + $0x190] sm:$0xff]  ;;  %v5713_v55 = vld [vmem:[#allocation8 + $0x168] sm:$0xff] }
 0x751   :  { %2009 = vmatprep.subr.mxu0 %v1948_v3  ;;  %2122 = vmatprep.subr.mxu1 %v1950_v2  ;;  %v5715_v3 = vld [vmem:[#allocation8 + $0x178] sm:$0xff]  ;;  %v5719_v2 = vld [vmem:[#allocation8 + $0x160] sm:$0xff] }
 0x752   :  { %2010 = vmatpush1.msra.mxu0 %v1947_v60  ;;  %2123 = vmatpush1.msra.mxu1 %v1949_v58  ;;  %v5721_v60 = vld [vmem:[#allocation8 + $0x170] sm:$0xff]  ;;  %v5725_v58 = vld [vmem:[#allocation8 + $0x148] sm:$0xff] }
 0x753   :  { %2011 = vmatprep.subr.mxu0 %v1944_v11  ;;  %2124 = vmatprep.subr.mxu1 %v1946_v47  ;;  %v5727_v11 = vld [vmem:[#allocation8 + $0x158] sm:$0xff]  ;;  %v5731_v47 = vld [vmem:[#allocation8 + $0x140] sm:$0xff] }
 0x754   :  { %2012 = vmatpush1.msra.mxu0 %v1943_v27  ;;  %2125 = vmatpush1.msra.mxu1 %v1945_v28  ;;  %v5733_v27 = vld [vmem:[#allocation8 + $0x150] sm:$0xff]  ;;  %v5737_v28 = vld [vmem:[#allocation8 + $0x128] sm:$0xff] }
 0x755   :  { %2013 = vmatprep.subr.mxu0 %v1940_v31  ;;  %2126 = vmatprep.subr.mxu1 %v1942_v4  ;;  %v5739_v31 = vld [vmem:[#allocation8 + $0x138] sm:$0xff]  ;;  %v5743_v4 = vld [vmem:[#allocation8 + $0x120] sm:$0xff] }
 0x756   :  { %2014 = vmatpush1.msra.mxu0 %v1939_v63  ;;  %2127 = vmatpush1.msra.mxu1 %v1941_v51  ;;  %v5745_v63 = vld [vmem:[#allocation8 + $0x130] sm:$0xff]  ;;  %v5749_v51 = vld [vmem:[#allocation8 + $0x108] sm:$0xff] }
 0x757   :  { %2015 = vmatprep.subr.mxu0 %v1936_v15  ;;  %2128 = vmatprep.subr.mxu1 %v1938_v16  ;;  %v5751_v15 = vld [vmem:[#allocation8 + $0x118] sm:$0xff]  ;;  %v5755_v16 = vld [vmem:[#allocation8 + $0x100] sm:$0xff] }
 0x758   :  { %2016 = vmatpush1.msra.mxu0 %v1935_v17  ;;  %2129 = vmatpush1.msra.mxu1 %v1937_v18  ;;  %v5757_v17 = vld [vmem:[#allocation8 + $0x110] sm:$0xff]  ;;  %v5761_v18 = vld [vmem:[#allocation8 + $0xe8] sm:$0xff] }
 0x759   :  { %2017 = vmatprep.subr.mxu0 %v1932_v19  ;;  %2130 = vmatprep.subr.mxu1 %v1934_v21  ;;  %v5763_v19 = vld [vmem:[#allocation8 + $0xf8] sm:$0xff]  ;;  %v5767_v21 = vld [vmem:[#allocation8 + $0xe0] sm:$0xff] }
 0x75a   :  { %2018 = vmatpush1.msra.mxu0 %v1931_v22  ;;  %2131 = vmatpush1.msra.mxu1 %v1933_v24  ;;  %v5769_v22 = vld [vmem:[#allocation8 + $0xf0] sm:$0xff]  ;;  %v5773_v24 = vld [vmem:[#allocation8 + $0xc8] sm:$0xff] }
 0x75b   :  { %2019 = vmatprep.subr.mxu0 %v1928_v1  ;;  %2132 = vmatprep.subr.mxu1 %v1930_v32  ;;  %v5775_v1 = vld [vmem:[#allocation8 + $0xd8] sm:$0xff]  ;;  %v5779_v32 = vld [vmem:[#allocation8 + $0xc0] sm:$0xff] }
 0x75c   :  { %2020 = vmatpush1.msra.mxu0 %v1927_v33  ;;  %2133 = vmatpush1.msra.mxu1 %v1929_v34  ;;  %v5781_v33 = vld [vmem:[#allocation8 + $0xd0] sm:$0xff]  ;;  %v5785_v34 = vld [vmem:[#allocation8 + $0xa8] sm:$0xff] }
 0x75d   :  { %2021 = vmatprep.subr.mxu0 %v1924_v35  ;;  %2134 = vmatprep.subr.mxu1 %v1926_v36  ;;  %v5787_v35 = vld [vmem:[#allocation8 + $0xb8] sm:$0xff]  ;;  %v5791_v36 = vld [vmem:[#allocation8 + $0xa0] sm:$0xff] }
 0x75e   :  { %2022 = vmatpush1.msra.mxu0 %v1923_v37  ;;  %2135 = vmatpush1.msra.mxu1 %v1925_v39  ;;  %v5793_v37 = vld [vmem:[#allocation8 + $0xb0] sm:$0xff]  ;;  %v5797_v39 = vld [vmem:[#allocation8 + $0x88] sm:$0xff] }
 0x75f   :  { %2023 = vmatprep.subr.mxu0 %v1920_v40  ;;  %2136 = vmatprep.subr.mxu1 %v1922_v41  ;;  %7097 = vst [vmem:[#allocation40_spill] sm:$0xff] %v5793_v37  ;;  %7098 = vst [vmem:[#allocation41_spill] sm:$0xff] %v5797_v39  ;;  %v5799_v40 = vld [vmem:[#allocation8 + $0x98] sm:$0xff]  ;;  %v5803_v41 = vld [vmem:[#allocation8 + $0x80] sm:$0xff] }
 0x760   :  { %2024 = vmatpush1.msra.mxu0 %v1919_v42  ;;  %2137 = vmatpush1.msra.mxu1 %v1921_v43  ;;  %7099 = vst [vmem:[#allocation39_spill] sm:$0xff] %v5799_v40  ;;  %7100 = vst [vmem:[#allocation42_spill] sm:$0xff] %v5803_v41  ;;  %v5805_v42 = vld [vmem:[#allocation8 + $0x90] sm:$0xff]  ;;  %v5809_v43 = vld [vmem:[#allocation8 + $0x68] sm:$0xff] }
 0x761   :  { %2025 = vmatprep.subr.mxu0 %v1916_v44  ;;  %2138 = vmatprep.subr.mxu1 %v1918_v45  ;;  %7101 = vst [vmem:[#allocation44_spill] sm:$0xff] %v5805_v42  ;;  %7102 = vst [vmem:[#allocation45_spill] sm:$0xff] %v5809_v43  ;;  %v5811_v44 = vld [vmem:[#allocation8 + $0x78] sm:$0xff]  ;;  %v5815_v45 = vld [vmem:[#allocation8 + $0x60] sm:$0xff] }
 0x762   :  { %2026 = vmatpush1.msra.mxu0 %v1915_v46  ;;  %2139 = vmatpush1.msra.mxu1 %v1917_v20  ;;  %7103 = vst [vmem:[#allocation43_spill] sm:$0xff] %v5811_v44  ;;  %7104 = vst [vmem:[#allocation11_spill] sm:$0xff] %v5815_v45  ;;  %v5817_v46 = vld [vmem:[#allocation8 + $0x70] sm:$0xff]  ;;  %v5821_v20 = vld [vmem:[#allocation8 + $0x48] sm:$0xff] }
 0x763   :  { %2027 = vmatprep.subr.mxu0 %v1912_v10  ;;  %2140 = vmatprep.subr.mxu1 %v1914_v13  ;;  %7105 = vst [vmem:[#allocation12_spill] sm:$0xff] %v5817_v46  ;;  %7106 = vst [vmem:[#allocation46_spill] sm:$0xff] %v5821_v20  ;;  %v5823_v10 = vld [vmem:[#allocation8 + $0x58] sm:$0xff]  ;;  %v5827_v13 = vld [vmem:[#allocation8 + $0x40] sm:$0xff] }
 0x764   :  { %2028 = vmatpush1.msra.mxu0 %v1911_v9  ;;  %2061 = vmatprep.mubr.f32.mxu0 %v7085_v30  ;;  %7107 = vst [vmem:[#allocation48_spill] sm:$0xff] %v5823_v10  ;;  %7108 = vst [vmem:[#allocation49_spill] sm:$0xff] %v5827_v13  ;;  %v5829_v9 = vld [vmem:[#allocation8 + $0x50] sm:$0xff] }
 0x765   :  { %2141 = vmatpush1.msra.mxu1 %v1913_v14  ;;  %2174 = vmatprep.mubr.f32.mxu1 %v7085_v30  ;;  %7109 = vst [vmem:[#allocation47_spill] sm:$0xff] %v5829_v9  ;;  %v5833_v14 = vld [vmem:[#allocation8 + $0x28] sm:$0xff] }
 0x766   :  { %2062 = vmatmul.mubr.f32.vlgmr.msra.gmra.mxu0 %v7090_v5  ;;  %2175 = vmatmul.mubr.f32.vlgmr.msra.gmra.mxu1 %v7090_v5  ;;  %7110 = vst [vmem:[#allocation14_spill] sm:$0xff] %v5833_v14  ;;  %v5835_v5 = vld [vmem:[#allocation8 + $0x38] sm:$0xff] }
 0x767   :  { %2067 = vmatprep.mubr.f32.mxu0 %v7085_v30  ;;  %2180 = vmatprep.mubr.f32.mxu1 %v7085_v30  ;;  %7111 = vst [vmem:[#allocation15_spill] sm:$0xff] %v5835_v5 }
 0x768   :  { %2323 = vmatprep.subr.mxu0 %v5665_v7  ;;  %2394 = vmatprep.subr.mxu1 %v5667_v54 }
 0x769   :  { %2395 = vmatpush1.msra.mxu1 %v5673_v25 }
 0x76a   :  { %2068 = vmatmul.mubr.f32.gmra.mxu0 %v7091_v12  ;;  %2181 = vmatmul.mubr.f32.gmra.mxu1 %v7091_v12  ;;  %v5839_v12 = vld [vmem:[#allocation8 + $0x20] sm:$0xff] }
 0x76b   :  { %2073 = vmatprep.mubr.f32.mxu0 %v7085_v30  ;;  %2186 = vmatprep.mubr.f32.mxu1 %v7085_v30  ;;  %7112 = vst [vmem:[#allocation50_spill] sm:$0xff] %v5839_v12 }
 0x76c   :  { %2396 = vmatprep.subr.mxu1 %v5679_v49 }
 0x76d   :  { %2397 = vmatpush1.msra.mxu1 %v5685_v48 }
 0x76e   :  { %2074 = vmatmul.mubr.f32.gmra.mxu0 %v7092_v6  ;;  %2187 = vmatmul.mubr.f32.gmra.mxu1 %v7092_v6  ;;  %v5841_v6 = vld [vmem:[#allocation8 + $0x30] sm:$0xff] }
 0x76f   :  { %2079 = vmatprep.mubr.f32.mxu0 %v7085_v30  ;;  %2192 = vmatprep.mubr.f32.mxu1 %v7085_v30  ;;  %7113 = vst [vmem:[#allocation52_spill] sm:$0xff] %v5841_v6 }
 0x770   :  { %2398 = vmatprep.subr.mxu1 %v5691_v52 }
 0x771   :  { %2399 = vmatpush1.msra.mxu1 %v5697_v0 }
 0x772   :  { %2080 = vmatmul.mubr.f32.gmra.mxu0 %v7093_v8  ;;  %2193 = vmatmul.mubr.f32.gmra.mxu1 %v7093_v8  ;;  %v5845_v8 = vld [vmem:[#allocation8 + $0x8] sm:$0xff] }
 0x773   :  { %2085 = vmatprep.mubr.f32.mxu0 %v7085_v30  ;;  %2198 = vmatprep.mubr.f32.mxu1 %v7085_v30  ;;  %7114 = vst [vmem:[#allocation53_spill] sm:$0xff] %v5845_v8 }
 0x774   :  { %2400 = vmatprep.subr.mxu1 %v5703_v59 }
 0x775   :  { %2401 = vmatpush1.msra.mxu1 %v5709_v56 }
 0x776   :  { %2086 = vmatmul.mubr.f32.gmra.mxu0 %v7094_v53  ;;  %2199 = vmatmul.mubr.f32.gmra.mxu1 %v7094_v53  ;;  %v5847_v53 = vld [vmem:[#allocation8 + $0x18] sm:$0xff] }
 0x777   :  { %2091 = vmatprep.mubr.f32.mxu0 %v7085_v30  ;;  %2204 = vmatprep.mubr.f32.mxu1 %v7085_v30  ;;  %7115 = vst [vmem:[#allocation51_spill] sm:$0xff] %v5847_v53 }
 0x778   :  { %2402 = vmatprep.subr.mxu1 %v5715_v3 }
 0x779   :  { %2403 = vmatpush1.msra.mxu1 %v5721_v60 }
 0x77a   :  { %2092 = vmatmul.mubr.f32.gmra.mxu0 %v5555_v62  ;;  %2205 = vmatmul.mubr.f32.gmra.mxu1 %v5555_v62  ;;  %v5671_v62 = vld [vmem:[#allocation8 + $0x1e0] sm:$0xff] }
 0x77b   :  { %2097 = vmatprep.mubr.f32.mxu0 %v7085_v30  ;;  %2210 = vmatprep.mubr.f32.mxu1 %v7085_v30 }
 0x77c   :  { %2324 = vmatpush1.msra.mxu0 %v5671_v62  ;;  %2404 = vmatprep.subr.mxu1 %v5727_v11 }
 0x77d   :  { %2405 = vmatpush1.msra.mxu1 %v5733_v27 }
 0x77e   :  { %2098 = vmatmul.mubr.f32.gmra.mxu0 %v5631_v23  ;;  %2211 = vmatmul.mubr.f32.gmra.mxu1 %v5631_v23  ;;  %v5677_v23 = vld [vmem:[#allocation8 + $0x1c8] sm:$0xff] }
 0x77f   :  { %2103 = vmatprep.mubr.f32.mxu0 %v7085_v30  ;;  %2216 = vmatprep.mubr.f32.mxu1 %v7085_v30 }
 0x780   :  { %2325 = vmatprep.subr.mxu0 %v5677_v23  ;;  %2406 = vmatprep.subr.mxu1 %v5739_v31 }
 0x781   :  { %2326 = vmatpush1.msra.mxu0 %v5683_v50  ;;  %2407 = vmatpush1.msra.mxu1 %v5745_v63 }
 0x782   :  { %2327 = vmatprep.subr.mxu0 %v5689_v61  ;;  %2408 = vmatprep.subr.mxu1 %v5751_v15 }
 0x783   :  { %2328 = vmatpush1.msra.mxu0 %v5695_v29  ;;  %2409 = vmatpush1.msra.mxu1 %v5757_v17 }
 0x784   :  { %2329 = vmatprep.subr.mxu0 %v5701_v38  ;;  %2410 = vmatprep.subr.mxu1 %v5763_v19 }
 0x785   :  { %2330 = vmatpush1.msra.mxu0 %v5707_v57  ;;  %2411 = vmatpush1.msra.mxu1 %v5769_v22 }
 0x786   :  { %2331 = vmatprep.subr.mxu0 %v5713_v55  ;;  %2412 = vmatprep.subr.mxu1 %v5775_v1 }
 0x787   :  { %2332 = vmatpush1.msra.mxu0 %v5719_v2  ;;  %2413 = vmatpush1.msra.mxu1 %v5781_v33 }
 0x788   :  { %2333 = vmatprep.subr.mxu0 %v5725_v58  ;;  %2414 = vmatprep.subr.mxu1 %v5787_v35 }
 0x789   :  { %2334 = vmatpush1.msra.mxu0 %v5731_v47  ;;  %2415 = vmatpush1.msra.mxu1 %v5793_v37 }
 0x78a   :  { %2335 = vmatprep.subr.mxu0 %v5737_v28  ;;  %2416 = vmatprep.subr.mxu1 %v5799_v40 }
 0x78b   :  { %2336 = vmatpush1.msra.mxu0 %v5743_v4  ;;  %2417 = vmatpush1.msra.mxu1 %v5805_v42 }
 0x78c   :  { %2337 = vmatprep.subr.mxu0 %v5749_v51  ;;  %2418 = vmatprep.subr.mxu1 %v5811_v44  ;;  %v7120_v44 = vld [vmem:[#allocation61_spill] sm:$0xff] }
 0x78d   :  { %2338 = vmatpush1.msra.mxu0 %v5755_v16  ;;  %2419 = vmatpush1.msra.mxu1 %v5817_v46 }
 0x78e   :  { %2339 = vmatprep.subr.mxu0 %v5761_v18  ;;  %2420 = vmatprep.subr.mxu1 %v5823_v10 }
 0x78f   :  { %2340 = vmatpush1.msra.mxu0 %v5767_v21  ;;  %2421 = vmatpush1.msra.mxu1 %v5829_v9  ;;  %v5849_v9 = vld [vmem:[#allocation8] sm:$0xff] }
 0x790   :  { %2341 = vmatprep.subr.mxu0 %v5773_v24  ;;  %2422 = vmatprep.subr.mxu1 %v5835_v5  ;;  %7116 = vst [vmem:[#allocation37_spill] sm:$0xff] %v5849_v9 }
 0x791   :  { %2342 = vmatpush1.msra.mxu0 %v5779_v32  ;;  %2423 = vmatpush1.msra.mxu1 %v5841_v6 }
 0x792   :  { %2343 = vmatprep.subr.mxu0 %v5785_v34  ;;  %2424 = vmatprep.subr.mxu1 %v5847_v53 }
 0x793   :  { %2344 = vmatpush1.msra.mxu0 %v5791_v36 }
 0x794   :  { %2345 = vmatprep.subr.mxu0 %v5797_v39 }
 0x795   :  { %2346 = vmatpush1.msra.mxu0 %v5803_v41 }
 0x796   :  { %2347 = vmatprep.subr.mxu0 %v5809_v43  ;;  %v7121_v43 = vld [vmem:[#allocation59_spill] sm:$0xff] }
 0x797   :  { %2348 = vmatpush1.msra.mxu0 %v5815_v45 }
 0x798   :  { %2349 = vmatprep.subr.mxu0 %v5821_v20  ;;  %v7119_v20 = vld [vmem:[#allocation60_spill] sm:$0xff] }
 0x799   :  { %2350 = vmatpush1.msra.mxu0 %v5827_v13 }
 0x79a   :  { %2351 = vmatprep.subr.mxu0 %v5833_v14  ;;  %v5853_v14 = vld [vmem:[#allocation8 + $0x10] sm:$0xff] }
 0x79b   :  { %2352 = vmatpush1.msra.mxu0 %v5839_v12  ;;  %7117 = vst [vmem:[#allocation35_spill] sm:$0xff] %v5853_v14  ;;  %2425 = vmatpush1.msra.mxu1 %v5853_v14  ;;  %v7118_v12 = vld [vmem:[#allocation58_spill] sm:$0xff] }
 0x79c   :  { %2353 = vmatprep.subr.mxu0 %v5845_v8  ;;  %2568 = vmatprep.subr.mxu1 %v5667_v54 }
 0x79d   :  { %2354 = vmatpush1.msra.mxu0 %v5849_v9 }
 0x79e   :  { %2497 = vmatprep.subr.mxu0 %v5665_v7 }
 0x805   :  { %v1797_v6 = vpop.f32.mrf.mxu0  ;;  %v1868_v8 = vpop.f32.mrf.mxu1 }
 0x806   :  { %v1873_v5 = vadd.f32 %v1797_v6, %v7118_v12  ;;  %v1875_v14 = vadd.f32 %v1868_v8, %v7121_v43  ;;  %v7128_v8 = vld [vmem:[#allocation46_spill] sm:$0xff] }
 0x807   :  { %v1799_v13 = vpop.f32.mrf.mxu0  ;;  %v1870_v45 = vpop.f32.mrf.mxu1 }
 0x808   :  { %v3832_v10 = vmul.f32 -1.442695, %v1873_v5  ;;  %v1874_v46 = vadd.f32 %v1799_v13, %v7119_v20  ;;  %v1876_v9 = vadd.f32 %v1870_v45, %v7120_v44 }
 0x80a   :  { %4031 = vpow2.f32 %v3832_v10  ;;  %v3833_v53 = vmul.f32 -1.442695, %v1874_v46  ;;  %v3834_v42 = vmul.f32 -1.442695, %v1876_v9  ;;  %v7126_v9 = vld [vmem:[#allocation11_spill] sm:$0xff] }
 0x80c   :  { %4033 = vpow2.f32 %v3833_v53 }
 0x80d   :  { %4035 = vtanh.f32 %v1875_v14  ;;  %v7127_v14 = vld [vmem:[#allocation12_spill] sm:$0xff] }
 0x80e   :  { %4037 = vpow2.f32 %v3834_v42  ;;  %v7125_v42 = vld [vmem:[#allocation43_spill] sm:$0xff] }
 0x817   :  { %v4032_v7 = vpop.eup %4031 }
 0x818   :  { %v1880_v41 = vadd.f32 1.0, %v4032_v7 }
 0x819   :  { %v4034_v54 = vpop.eup %4033 }
 0x81a   :  { %4039 = vrcp.f32 %v1880_v41  ;;  %v1886_v12 = vadd.f32 1.0, %v4034_v54  ;;  %v4036_v5 = vpop.eup %4035  ;;  %v7123_v54 = vld [vmem:[#allocation44_spill] sm:$0xff]  ;;  %v7124_v41 = vld [vmem:[#allocation45_spill] sm:$0xff] }
 0x81b   :  { %v4038_v20 = vpop.eup %4037 }
 0x81c   :  { %4041 = vrcp.f32 %v1886_v12  ;;  %v1893_v6 = vadd.f32 1.0, %v4038_v20  ;;  %v7129_v12 = vld [vmem:[#allocation48_spill] sm:$0xff]  ;;  %v7131_v20 = vld [vmem:[#allocation47_spill] sm:$0xff] }
 0x81e   :  { %4043 = vrcp.f32 %v1893_v6  ;;  %v7135_v6 = vld [vmem:[#allocation52_spill] sm:$0xff] }
 0x827   :  { %v4040_v10 = vpop.eup %4039 }
 0x828   :  { %v1897_v13 = vmul.f32 %v4040_v10, %v4036_v5  ;;  %v7130_v5 = vld [vmem:[#allocation49_spill] sm:$0xff]  ;;  %v7132_v10 = vld [vmem:[#allocation14_spill] sm:$0xff] }
 0x829   :  { %v4042_v46 = vpop.eup %4041 }
 0x82a   :  { %v1896_v53 = vmul.f32 %v4042_v46, %v5628_v26  ;;  %v7122_v26 = vld [vmem:[#allocation42_spill] sm:$0xff] }
 0x82b   :  { %v4044_v43 = vpop.eup %4043  ;;  %v7134_v46 = vld [vmem:[#allocation50_spill] sm:$0xff] }
 0x82c   :  { %v1898_v44 = vadd.f32 %v1897_v13, %v1896_v53  ;;  %v7133_v13 = vld [vmem:[#allocation15_spill] sm:$0xff]  ;;  %v7136_v53 = vld [vmem:[#allocation53_spill] sm:$0xff] }
 0x82e   :  { %4045 = vtanh.f32 %v1898_v44  ;;  %v7137_v44 = vld [vmem:[#allocation51_spill] sm:$0xff] }
 0x83b   :  { %v4046_v45 = vpop.eup %4045 }
 0x83c   :  { %v1900_v7 = vmul.f32 %v4046_v45, %v4044_v43  ;;  %v7138_v43 = vld [vmem:[#allocation37_spill] sm:$0xff]  ;;  %v7139_v45 = vld [vmem:[#allocation35_spill] sm:$0xff] }
 0x83e   :  { %2104 = vmatmul.mubr.f32.gmra.mxu0 %v1900_v7  ;;  %2217 = vmatmul.mubr.f32.gmra.mxu1 %v1900_v7  ;;  %v7140_v7 = vld [vmem:[#allocation33_spill] sm:$0xff] }
 0x83f   :  { %2387 = vmatprep.mubr.f32.mxu0 %v7085_v30  ;;  %2458 = vmatprep.mubr.f32.mxu1 %v7085_v30 }
 0x842   :  { %2388 = vmatmul.mubr.f32.vlgmr.msra.gmra.mxu0 %v7085_v30  ;;  %2459 = vmatmul.mubr.f32.vlgmr.msra.gmra.mxu1 %v7085_v30 }
 0x843   :  { %2498 = vmatpush1.msra.mxu0 %v5671_v62  ;;  %2569 = vmatpush1.msra.mxu1 %v5673_v25 }
 0x844   :  { %2499 = vmatprep.subr.mxu0 %v5677_v23  ;;  %2570 = vmatprep.subr.mxu1 %v5679_v49 }
 0x845   :  { %2500 = vmatpush1.msra.mxu0 %v5683_v50  ;;  %2571 = vmatpush1.msra.mxu1 %v5685_v48 }
 0x846   :  { %2501 = vmatprep.subr.mxu0 %v5689_v61  ;;  %2572 = vmatprep.subr.mxu1 %v5691_v52 }
 0x847   :  { %2502 = vmatpush1.msra.mxu0 %v5695_v29  ;;  %2573 = vmatpush1.msra.mxu1 %v5697_v0 }
 0x848   :  { %2503 = vmatprep.subr.mxu0 %v5701_v38  ;;  %2574 = vmatprep.subr.mxu1 %v5703_v59 }
 0x849   :  { %2504 = vmatpush1.msra.mxu0 %v5707_v57  ;;  %2575 = vmatpush1.msra.mxu1 %v5709_v56 }
 0x84a   :  { %2505 = vmatprep.subr.mxu0 %v5713_v55  ;;  %2576 = vmatprep.subr.mxu1 %v5715_v3 }
 0x84b   :  { %2506 = vmatpush1.msra.mxu0 %v5719_v2  ;;  %2577 = vmatpush1.msra.mxu1 %v5721_v60 }
 0x84c   :  { %2507 = vmatprep.subr.mxu0 %v5725_v58  ;;  %2578 = vmatprep.subr.mxu1 %v5727_v11 }
 0x84d   :  { %2508 = vmatpush1.msra.mxu0 %v5731_v47  ;;  %2579 = vmatpush1.msra.mxu1 %v5733_v27 }
 0x84e   :  { %2509 = vmatprep.subr.mxu0 %v5737_v28  ;;  %2580 = vmatprep.subr.mxu1 %v5739_v31 }
 0x84f   :  { %2510 = vmatpush1.msra.mxu0 %v5743_v4  ;;  %2581 = vmatpush1.msra.mxu1 %v5745_v63 }
 0x850   :  { %2511 = vmatprep.subr.mxu0 %v5749_v51  ;;  %2582 = vmatprep.subr.mxu1 %v5751_v15 }
 0x851   :  { %2512 = vmatpush1.msra.mxu0 %v5755_v16  ;;  %2583 = vmatpush1.msra.mxu1 %v5757_v17 }
 0x852   :  { %2513 = vmatprep.subr.mxu0 %v5761_v18  ;;  %2584 = vmatprep.subr.mxu1 %v5763_v19 }
 0x853   :  { %2514 = vmatpush1.msra.mxu0 %v5767_v21  ;;  %2585 = vmatpush1.msra.mxu1 %v5769_v22 }
 0x854   :  { %2515 = vmatprep.subr.mxu0 %v5773_v24  ;;  %2586 = vmatprep.subr.mxu1 %v5775_v1 }
 0x855   :  { %2516 = vmatpush1.msra.mxu0 %v5779_v32  ;;  %2587 = vmatpush1.msra.mxu1 %v5781_v33 }
 0x856   :  { %2517 = vmatprep.subr.mxu0 %v5785_v34  ;;  %2588 = vmatprep.subr.mxu1 %v5787_v35 }
 0x857   :  { %2518 = vmatpush1.msra.mxu0 %v5791_v36  ;;  %2589 = vmatpush1.msra.mxu1 %v5793_v37 }
 0x858   :  { %2519 = vmatprep.subr.mxu0 %v5797_v39  ;;  %2590 = vmatprep.subr.mxu1 %v5799_v40 }
 0x859   :  { %2520 = vmatpush1.msra.mxu0 %v7122_v26  ;;  %2591 = vmatpush1.msra.mxu1 %v7123_v54 }
 0x85a   :  { %2521 = vmatprep.subr.mxu0 %v7124_v41  ;;  %2592 = vmatprep.subr.mxu1 %v7125_v42 }
 0x85b   :  { %2522 = vmatpush1.msra.mxu0 %v7126_v9  ;;  %2593 = vmatpush1.msra.mxu1 %v7127_v14 }
 0x85c   :  { %2523 = vmatprep.subr.mxu0 %v7128_v8  ;;  %2594 = vmatprep.subr.mxu1 %v7129_v12 }
 0x85d   :  { %2524 = vmatpush1.msra.mxu0 %v7130_v5  ;;  %2595 = vmatpush1.msra.mxu1 %v7131_v20 }
 0x85e   :  { %2525 = vmatprep.subr.mxu0 %v7132_v10  ;;  %2596 = vmatprep.subr.mxu1 %v7133_v13  ;;  %v7141_v10 = vld [vmem:[#allocation38_spill] sm:$0xff]  ;;  %v2063_v13 = vpop.f32.mrf.mxu0 }
 0x85f   :  { %2526 = vmatpush1.msra.mxu0 %v7134_v46  ;;  %2597 = vmatpush1.msra.mxu1 %v7135_v6  ;;  %v2176_v46 = vpop.f32.mrf.mxu1 }
 0x860   :  { %2527 = vmatprep.subr.mxu0 %v7136_v53  ;;  %2598 = vmatprep.subr.mxu1 %v7137_v44  ;;  %v2065_v20 = vpop.f32.mrf.mxu0 }
 0x861   :  { %2528 = vmatpush1.msra.mxu0 %v7138_v43  ;;  %2561 = vmatprep.mubr.f32.mxu0 %v7085_v30  ;;  %v2178_v6 = vpop.f32.mrf.mxu1 }
 0x862   :  { %2599 = vmatpush1.msra.mxu1 %v7139_v45  ;;  %2632 = vmatprep.mubr.f32.mxu1 %v7085_v30  ;;  %v5934_v5 = vpop.f32.mrf.mxu0 }
 0x863   :  { %2671 = vmatprep.subr.mxu0 %v7140_v7  ;;  %2742 = vmatprep.subr.mxu1 %v7141_v10  ;;  %7142 = vst [vmem:[#allocation17_spill] sm:$0xff] %v5934_v5  ;;  %v5936_v53 = vpop.f32.mrf.mxu1 }
 0x864   :  { %7143 = vst [vmem:[#allocation18_spill] sm:$0xff] %v5936_v53  ;;  %v5938_v44 = vpop.f32.mrf.mxu0 }
 0x865   :  { %7144 = vst [vmem:[#allocation19_spill] sm:$0xff] %v5938_v44  ;;  %v5940_v43 = vpop.f32.mrf.mxu1 }
 0x866   :  { %7145 = vst [vmem:[#allocation20_spill] sm:$0xff] %v5940_v43  ;;  %v5942_v12 = vpop.f32.mrf.mxu0 }
 0x867   :  { %7146 = vst [vmem:[#allocation21_spill] sm:$0xff] %v5942_v12  ;;  %v5944_v45 = vpop.f32.mrf.mxu1 }
 0x868   :  { %7147 = vst [vmem:[#allocation22_spill] sm:$0xff] %v5944_v45  ;;  %v5946_v30 = vpop.f32.mrf.mxu0 }
 0x869   :  { %7148 = vst [vmem:[#allocation23_spill] sm:$0xff] %v5946_v30  ;;  %v5948_v7 = vpop.f32.mrf.mxu1 }
 0x86a   :  { %7149 = vst [vmem:[#allocation24_spill] sm:$0xff] %v5948_v7  ;;  %v5950_v10 = vpop.f32.mrf.mxu0 }
 0x86b   :  { %7150 = vst [vmem:[#allocation25_spill] sm:$0xff] %v5950_v10  ;;  %v5952_v8 = vpop.f32.mrf.mxu1 }
 0x86c   :  { %7151 = vst [vmem:[#allocation26_spill] sm:$0xff] %v5952_v8  ;;  %v5954_v14 = vpop.f32.mrf.mxu0 }
 0x86d   :  { %7152 = vst [vmem:[#allocation27_spill] sm:$0xff] %v5954_v14  ;;  %v5956_v5 = vpop.f32.mrf.mxu1 }
 0x86e   :  { %7153 = vst [vmem:[#allocation28_spill] sm:$0xff] %v5956_v5  ;;  %v5958_v53 = vpop.f32.mrf.mxu0 }
 0x86f   :  { %7154 = vst [vmem:[#allocation29_spill] sm:$0xff] %v5958_v53  ;;  %v5960_v44 = vpop.f32.mrf.mxu1 }
 0x870   :  { %7155 = vst [vmem:[#allocation30_spill] sm:$0xff] %v5960_v44  ;;  %v5962_v43 = vpop.f32.mrf.mxu0  ;;  %v1975_v44 = vld [vmem:[%s6696_s6] sm:$0xf] }
 0x871   :  { %7156 = vst [vmem:[#allocation31_spill] sm:$0xff] %v5962_v43  ;;  %v5964_v12 = vpop.f32.mrf.mxu1  ;;  %v7165_v43 = vld [vmem:[#allocation34_spill] sm:$0xff] }
 0x872   :  { %7157 = vst [vmem:[#allocation54_spill] sm:$0xff] %v5964_v12  ;;  %v5966_v45 = vpop.f32.mrf.mxu0  ;;  %v7166_v12 = vsub.s32 0, %v7165_v43 }
 0x873   :  { %7158 = vst [vmem:[#allocation56_spill] sm:$0xff] %v5966_v45  ;;  %v5968_v30 = vpop.f32.mrf.mxu1 }
 0x874   :  { %7159 = vst [vmem:[#allocation57_spill] sm:$0xff] %v5968_v30  ;;  %v5970_v7 = vpop.f32.mrf.mxu0  ;;  %v5985_v5 = vrot.slane %v1975_v44, %v7166_v12 }
 0x875   :  { %7160 = vst [vmem:[#allocation55_spill] sm:$0xff] %v5970_v7  ;;  %v5972_v10 = vpop.f32.mrf.mxu1 }
 0x876   :  { %7161 = vst [vmem:[#allocation62_spill] sm:$0xff] %v5972_v10  ;;  %v5974_v8 = vpop.f32.mrf.mxu0  ;;  %7167 = vst [vmem:[#allocation32_spill] sm:$0xff] %v5985_v5  ;;  %v7170_v10 = vsub.s32 1, %v7165_v43  ;;  %v2064_v9 = vadd.f32 %v2063_v13, %v5985_v5 }
 0x877   :  { %7162 = vst [vmem:[#allocation13_spill] sm:$0xff] %v5974_v8  ;;  %v5976_v14 = vpop.f32.mrf.mxu1 }
 0x878   :  { %7163 = vst [vmem:[#allocation16_spill] sm:$0xff] %v5976_v14  ;;  %v5981_v53 = vpop.f32.mrf.mxu0  ;;  %v5993_v7 = vrot.slane %v1975_v44, %v7170_v10  ;;  %v7174_v10 = vsub.s32 3, %v7165_v43 }
 0x879   :  { %7164 = vst [vmem:[#allocation36_spill] sm:$0xff] %v5981_v53  ;;  %v5987_v45 = vpop.f32.mrf.mxu1 }
 0x87a   :  { %7168 = vst [vmem:[#allocation58_spill] sm:$0xff] %v5987_v45  ;;  %v2066_v53 = vadd.f32 %v2065_v20, %v5993_v7  ;;  %v6005_v39 = vrot.slane %v1975_v44, %v7174_v10 }
 0x87c   :  { %7175 = vst [vmem:[#allocation63_spill] sm:$0xff] %v6005_v39  ;;  %v2179_v13 = vadd.f32 %v2178_v6, %v6005_v39 }
 0x8fe   :  { %v5989_v30 = vpop.f32.mrf.mxu0  ;;  %v5995_v8 = vpop.f32.mrf.mxu1 }
 0x8ff   :  { %7169 = vst [vmem:[#allocation60_spill] sm:$0xff] %v5989_v30  ;;  %7171 = vst [vmem:[#allocation61_spill] sm:$0xff] %v5995_v8 }
 0x900   :  { %v5997_v14 = vpop.f32.mrf.mxu0  ;;  %v6001_v41 = vpop.f32.mrf.mxu1 }
 0x901   :  { %7172 = vst [vmem:[#allocation59_spill] sm:$0xff] %v5997_v14  ;;  %7173 = vst [vmem:[#allocation34_spill] sm:$0xff] %v6001_v41  ;;  %v7176_v14 = vsub.s32 2, %v7165_v43 }
 0x902   :  { %v2389_v42 = vpop.f32.mrf.mxu0  ;;  %v2460_v30 = vpop.f32.mrf.mxu1 }
 0x903   :  { %v2465_v12 = vadd.f32 %v2389_v42, %v2064_v9  ;;  %v6010_v20 = vrot.slane %v1975_v44, %v7176_v14 }
 0x904   :  { %v2391_v54 = vpop.f32.mrf.mxu0  ;;  %v2462_v8 = vpop.f32.mrf.mxu1 }
 0x905   :  { %v3835_v45 = vmul.f32 -1.442695, %v2465_v12  ;;  %v2466_v26 = vadd.f32 %v2391_v54, %v2066_v53  ;;  %v2468_v41 = vadd.f32 %v2462_v8, %v2179_v13  ;;  %v2177_v42 = vadd.f32 %v2176_v46, %v6010_v20  ;;  %v7178_v13 = vld [vmem:[#allocation39_spill] sm:$0xff] }
 0x907   :  { %4047 = vpow2.f32 %v3835_v45  ;;  %v3836_v40 = vmul.f32 -1.442695, %v2466_v26  ;;  %v3837_v9 = vmul.f32 -1.442695, %v2468_v41  ;;  %v2467_v53 = vadd.f32 %v2460_v30, %v2177_v42  ;;  %v7179_v42 = vld [vmem:[#allocation42_spill] sm:$0xff] }
 0x909   :  { %4049 = vpow2.f32 %v3836_v40 }
 0x90a   :  { %4051 = vpow2.f32 %v3837_v9  ;;  %v7180_v9 = vld [vmem:[#allocation44_spill] sm:$0xff] }
 0x914   :  { %v4048_v54 = vpop.eup %4047 }
 0x915   :  { %v2472_v45 = vadd.f32 1.0, %v4048_v54  ;;  %v7181_v54 = vld [vmem:[#allocation45_spill] sm:$0xff] }
 0x916   :  { %v4050_v26 = vpop.eup %4049 }
 0x917   :  { %4053 = vrcp.f32 %v2472_v45  ;;  %v2478_v12 = vadd.f32 1.0, %v4050_v26  ;;  %v4052_v40 = vpop.eup %4051  ;;  %v7183_v45 = vld [vmem:[#allocation11_spill] sm:$0xff]  ;;  %v7184_v26 = vld [vmem:[#allocation12_spill] sm:$0xff] }
 0x918   :  { %4055 = vtanh.f32 %v2467_v53  ;;  %v2485_v43 = vadd.f32 1.0, %v4052_v40  ;;  %v7182_v53 = vld [vmem:[#allocation43_spill] sm:$0xff]  ;;  %v7186_v40 = vld [vmem:[#allocation48_spill] sm:$0xff] }
 0x919   :  { %4057 = vrcp.f32 %v2478_v12  ;;  %v7185_v12 = vld [vmem:[#allocation46_spill] sm:$0xff] }
 0x91a   :  { %4059 = vrcp.f32 %v2485_v43  ;;  %v7189_v43 = vld [vmem:[#allocation14_spill] sm:$0xff] }
 0x924   :  { %v4054_v10 = vpop.eup %4053 }
 0x925   :  { %v4056_v6 = vpop.eup %4055 }
 0x926   :  { %v4058_v39 = vpop.eup %4057  ;;  %v2489_v44 = vmul.f32 %v4056_v6, %v4054_v10  ;;  %v7187_v10 = vld [vmem:[#allocation49_spill] sm:$0xff]  ;;  %v7188_v6 = vld [vmem:[#allocation47_spill] sm:$0xff] }
 0x927   :  { %v2488_v14 = vmul.f32 0.0, %v4058_v39  ;;  %v4060_v30 = vpop.eup %4059  ;;  %v7177_v39 = vld [vmem:[#allocation41_spill] sm:$0xff] }
 0x929   :  { %v6013_v8 = vadd.f32 %v2489_v44, %v2488_v14  ;;  %v7190_v14 = vld [vmem:[#allocation15_spill] sm:$0xff]  ;;  %v7191_v44 = vld [vmem:[#allocation50_spill] sm:$0xff] }
 0x92b   :  { %4061 = vtanh.f32 %v6013_v8 }
 0x938   :  { %v4062_v41 = vpop.eup %4061 }
 0x939   :  { %v2492_v46 = vmul.f32 %v4062_v41, %v4060_v30  ;;  %v7192_v30 = vld [vmem:[#allocation52_spill] sm:$0xff]  ;;  %v7193_v41 = vld [vmem:[#allocation53_spill] sm:$0xff] }
 0x93b   :  { %2562 = vmatmul.mubr.f32.vlgmr.msra.gmra.mxu0 %v2492_v46  ;;  %2633 = vmatmul.mubr.f32.vlgmr.msra.gmra.mxu1 %v2492_v46  ;;  %v7194_v46 = vld [vmem:[#allocation51_spill] sm:$0xff] }
 0x93c   :  { %2672 = vmatpush1.msra.mxu0 %v5671_v62  ;;  %2743 = vmatpush1.msra.mxu1 %v5673_v25 }
 0x93d   :  { %2673 = vmatprep.subr.mxu0 %v5677_v23  ;;  %2744 = vmatprep.subr.mxu1 %v5679_v49 }
 0x93e   :  { %2674 = vmatpush1.msra.mxu0 %v5683_v50  ;;  %2745 = vmatpush1.msra.mxu1 %v5685_v48 }
 0x93f   :  { %2675 = vmatprep.subr.mxu0 %v5689_v61  ;;  %2746 = vmatprep.subr.mxu1 %v5691_v52 }
 0x940   :  { %2676 = vmatpush1.msra.mxu0 %v5695_v29  ;;  %2747 = vmatpush1.msra.mxu1 %v5697_v0 }
 0x941   :  { %2677 = vmatprep.subr.mxu0 %v5701_v38  ;;  %2748 = vmatprep.subr.mxu1 %v5703_v59 }
 0x942   :  { %2678 = vmatpush1.msra.mxu0 %v5707_v57  ;;  %2749 = vmatpush1.msra.mxu1 %v5709_v56 }
 0x943   :  { %2679 = vmatprep.subr.mxu0 %v5713_v55  ;;  %2750 = vmatprep.subr.mxu1 %v5715_v3 }
 0x944   :  { %2680 = vmatpush1.msra.mxu0 %v5719_v2  ;;  %2751 = vmatpush1.msra.mxu1 %v5721_v60 }
 0x945   :  { %2681 = vmatprep.subr.mxu0 %v5725_v58  ;;  %2752 = vmatprep.subr.mxu1 %v5727_v11 }
 0x946   :  { %2682 = vmatpush1.msra.mxu0 %v5731_v47  ;;  %2753 = vmatpush1.msra.mxu1 %v5733_v27 }
 0x947   :  { %2683 = vmatprep.subr.mxu0 %v5737_v28  ;;  %2754 = vmatprep.subr.mxu1 %v5739_v31 }
 0x948   :  { %2684 = vmatpush1.msra.mxu0 %v5743_v4  ;;  %2755 = vmatpush1.msra.mxu1 %v5745_v63 }
 0x949   :  { %2685 = vmatprep.subr.mxu0 %v5749_v51  ;;  %2756 = vmatprep.subr.mxu1 %v5751_v15 }
 0x94a   :  { %2686 = vmatpush1.msra.mxu0 %v5755_v16  ;;  %2757 = vmatpush1.msra.mxu1 %v5757_v17 }
 0x94b   :  { %2687 = vmatprep.subr.mxu0 %v5761_v18  ;;  %2758 = vmatprep.subr.mxu1 %v5763_v19 }
 0x94c   :  { %2688 = vmatpush1.msra.mxu0 %v5767_v21  ;;  %2759 = vmatpush1.msra.mxu1 %v5769_v22 }
 0x94d   :  { %2689 = vmatprep.subr.mxu0 %v5773_v24  ;;  %2760 = vmatprep.subr.mxu1 %v5775_v1 }
 0x94e   :  { %2690 = vmatpush1.msra.mxu0 %v5779_v32  ;;  %2761 = vmatpush1.msra.mxu1 %v5781_v33 }
 0x94f   :  { %2691 = vmatprep.subr.mxu0 %v5785_v34  ;;  %2762 = vmatprep.subr.mxu1 %v5787_v35 }
 0x950   :  { %2692 = vmatpush1.msra.mxu0 %v5791_v36  ;;  %2763 = vmatpush1.msra.mxu1 %v5793_v37 }
 0x951   :  { %2693 = vmatprep.subr.mxu0 %v7177_v39  ;;  %2764 = vmatprep.subr.mxu1 %v7178_v13  ;;  %v7204_v13 = vld [vmem:[#allocation18_spill] sm:$0xff] }
 0x952   :  { %2694 = vmatpush1.msra.mxu0 %v7179_v42  ;;  %2765 = vmatpush1.msra.mxu1 %v7180_v9  ;;  %v7202_v9 = vld [vmem:[#allocation63_spill] sm:$0xff] }
 0x953   :  { %2695 = vmatprep.subr.mxu0 %v7181_v54  ;;  %2766 = vmatprep.subr.mxu1 %v7182_v53 }
 0x954   :  { %2696 = vmatpush1.msra.mxu0 %v7183_v45  ;;  %2767 = vmatpush1.msra.mxu1 %v7184_v26  ;;  %v7195_v26 = vld [vmem:[#allocation37_spill] sm:$0xff] }
 0x955   :  { %2697 = vmatprep.subr.mxu0 %v7185_v12  ;;  %2768 = vmatprep.subr.mxu1 %v7186_v40  ;;  %v7196_v12 = vmov 0.0   ;;  %v7197_v40 = vld [vmem:[#allocation35_spill] sm:$0xff] }
 0x956   :  { %2698 = vmatpush1.msra.mxu0 %v7187_v10  ;;  %2769 = vmatpush1.msra.mxu1 %v7188_v6  ;;  %v7198_v6 = vld [vmem:[#allocation33_spill] sm:$0xff] }
 0x957   :  { %2699 = vmatprep.subr.mxu0 %v7189_v43  ;;  %2770 = vmatprep.subr.mxu1 %v7190_v14  ;;  %v7199_v43 = vld [vmem:[#allocation38_spill] sm:$0xff] }
 0x958   :  { %2700 = vmatpush1.msra.mxu0 %v7191_v44  ;;  %2771 = vmatpush1.msra.mxu1 %v7192_v30  ;;  %v7200_v44 = vld [vmem:[#allocation17_spill] sm:$0xff] }
 0x959   :  { %2701 = vmatprep.subr.mxu0 %v7193_v41  ;;  %2772 = vmatprep.subr.mxu1 %v7194_v46  ;;  %v2070_v14 = vadd.f32 %v7200_v44, %v5985_v5  ;;  %v7201_v41 = vld [vmem:[#allocation19_spill] sm:$0xff]  ;;  %v2183_v44 = vadd.f32 %v7204_v13, %v6010_v20 }
 0x95a   :  { %2702 = vmatpush1.msra.mxu0 %v7195_v26  ;;  %2735 = vmatprep.mubr.f32.mxu0 %v7196_v12  ;;  %v2072_v10 = vadd.f32 %v7201_v41, %v5993_v7 }
 0x95b   :  { %2773 = vmatpush1.msra.mxu1 %v7197_v40  ;;  %2806 = vmatprep.mubr.f32.mxu1 %v7196_v12 }
 0x95c   :  { %2845 = vmatprep.subr.mxu0 %v7198_v6  ;;  %2916 = vmatprep.subr.mxu1 %v7199_v43  ;;  %v7203_v6 = vld [vmem:[#allocation20_spill] sm:$0xff] }
 0x95d   :  { %v2185_v42 = vadd.f32 %v7203_v6, %v7202_v9 }
 0x9fb   :  { %v2563_v30 = vpop.f32.mrf.mxu0  ;;  %v2634_v54 = vpop.f32.mrf.mxu1 }
 0x9fc   :  { %v2639_v46 = vadd.f32 %v2563_v30, %v2070_v14  ;;  %v2641_v5 = vadd.f32 %v2634_v54, %v2183_v44  ;;  %v7217_v54 = vld [vmem:[#allocation47_spill] sm:$0xff]  ;;  %v7220_v44 = vld [vmem:[#allocation50_spill] sm:$0xff] }
 0x9fd   :  { %v2565_v45 = vpop.f32.mrf.mxu0  ;;  %v2636_v12 = vpop.f32.mrf.mxu1 }
 0x9fe   :  { %v3838_v26 = vmul.f32 -1.442695, %v2639_v46  ;;  %v2640_v53 = vadd.f32 %v2565_v45, %v2072_v10  ;;  %v2642_v43 = vadd.f32 %v2636_v12, %v2185_v42  ;;  %v7219_v46 = vld [vmem:[#allocation15_spill] sm:$0xff] }
 0xa00   :  { %4063 = vpow2.f32 %v3838_v26  ;;  %v3839_v40 = vmul.f32 -1.442695, %v2640_v53  ;;  %v3840_v39 = vmul.f32 -1.442695, %v2642_v43  ;;  %v7218_v43 = vld [vmem:[#allocation14_spill] sm:$0xff] }
 0xa02   :  { %4065 = vpow2.f32 %v3839_v40 }
 0xa03   :  { %4067 = vtanh.f32 %v2641_v5 }
 0xa04   :  { %4069 = vpow2.f32 %v3840_v39  ;;  %v7216_v39 = vld [vmem:[#allocation49_spill] sm:$0xff] }
 0xa0d   :  { %v4064_v37 = vpop.eup %4063 }
 0xa0e   :  { %v2646_v41 = vadd.f32 1.0, %v4064_v37 }
 0xa0f   :  { %v4066_v14 = vpop.eup %4065 }
 0xa10   :  { %4071 = vrcp.f32 %v2646_v41  ;;  %v2652_v45 = vadd.f32 1.0, %v4066_v14  ;;  %v4068_v53 = vpop.eup %4067  ;;  %v7221_v41 = vld [vmem:[#allocation52_spill] sm:$0xff]  ;;  %v7222_v14 = vld [vmem:[#allocation53_spill] sm:$0xff] }
 0xa11   :  { %v4070_v26 = vpop.eup %4069 }
 0xa12   :  { %4073 = vrcp.f32 %v2652_v45  ;;  %v2659_v6 = vadd.f32 1.0, %v4070_v26  ;;  %v7223_v45 = vld [vmem:[#allocation51_spill] sm:$0xff]  ;;  %v7225_v26 = vmov 0.0  }
 0xa14   :  { %4075 = vrcp.f32 %v2659_v6  ;;  %v7229_v6 = vld [vmem:[#allocation32_spill] sm:$0xff] }
 0xa1d   :  { %v4072_v40 = vpop.eup %4071 }
 0xa1e   :  { %v2663_v10 = vmul.f32 %v4072_v40, %v4068_v53  ;;  %v7224_v53 = vld [vmem:[#allocation37_spill] sm:$0xff]  ;;  %v7226_v40 = vld [vmem:[#allocation35_spill] sm:$0xff] }
 0xa1f   :  { %v4074_v30 = vpop.eup %4073 }
 0xa20   :  { %v2662_v42 = vmul.f32 %v4074_v30, %v6013_v8  ;;  %v7215_v8 = vld [vmem:[#allocation48_spill] sm:$0xff]  ;;  %v7228_v30 = vld [vmem:[#allocation38_spill] sm:$0xff] }
 0xa21   :  { %v4076_v37 = vpop.eup %4075 }
 0xa22   :  { %v6091_v12 = vadd.f32 %v2663_v10, %v2662_v42  ;;  %v7227_v10 = vld [vmem:[#allocation33_spill] sm:$0xff] }
 0xa23   :  { %v7230_v42 = vld [vmem:[#allocation21_spill] sm:$0xff] }
 0xa24   :  { %4077 = vtanh.f32 %v6091_v12 }
 0xa31   :  { %v4078_v5 = vpop.eup %4077 }
 0xa32   :  { %v2666_v13 = vmul.f32 %v4078_v5, %v4076_v37  ;;  %v2076_v37 = vadd.f32 %v7230_v42, %v7229_v6 }
 0xa34   :  { %2736 = vmatmul.mubr.f32.vlgmr.msra.gmra.mxu0 %v2666_v13  ;;  %2807 = vmatmul.mubr.f32.vlgmr.msra.gmra.mxu1 %v2666_v13  ;;  %v7231_v13 = vld [vmem:[#allocation23_spill] sm:$0xff] }
 0xa35   :  { %2846 = vmatpush1.msra.mxu0 %v5671_v62  ;;  %2917 = vmatpush1.msra.mxu1 %v5673_v25  ;;  %v7205_v62 = vld [vmem:[#allocation40_spill] sm:$0xff]  ;;  %v7206_v25 = vld [vmem:[#allocation41_spill] sm:$0xff] }
 0xa36   :  { %2847 = vmatprep.subr.mxu0 %v5677_v23  ;;  %2918 = vmatprep.subr.mxu1 %v5679_v49  ;;  %v7207_v23 = vld [vmem:[#allocation39_spill] sm:$0xff]  ;;  %v7208_v49 = vld [vmem:[#allocation42_spill] sm:$0xff] }
 0xa37   :  { %2848 = vmatpush1.msra.mxu0 %v5683_v50  ;;  %2919 = vmatpush1.msra.mxu1 %v5685_v48  ;;  %v7209_v50 = vld [vmem:[#allocation44_spill] sm:$0xff]  ;;  %v7210_v48 = vld [vmem:[#allocation45_spill] sm:$0xff] }
 0xa38   :  { %2849 = vmatprep.subr.mxu0 %v5689_v61  ;;  %2920 = vmatprep.subr.mxu1 %v5691_v52  ;;  %v7211_v61 = vld [vmem:[#allocation43_spill] sm:$0xff] }
 0xa39   :  { %2850 = vmatpush1.msra.mxu0 %v5695_v29  ;;  %2921 = vmatpush1.msra.mxu1 %v5697_v0  ;;  %v7212_v52 = vld [vmem:[#allocation11_spill] sm:$0xff]  ;;  %v7213_v29 = vld [vmem:[#allocation12_spill] sm:$0xff]  ;;  %v7214_v0 = vld [vmem:[#allocation46_spill] sm:$0xff] }
 0xa3a   :  { %2851 = vmatprep.subr.mxu0 %v5701_v38  ;;  %2922 = vmatprep.subr.mxu1 %v5703_v59 }
 0xa3b   :  { %2852 = vmatpush1.msra.mxu0 %v5707_v57  ;;  %2923 = vmatpush1.msra.mxu1 %v5709_v56 }
 0xa3c   :  { %2853 = vmatprep.subr.mxu0 %v5713_v55  ;;  %2924 = vmatprep.subr.mxu1 %v5715_v3 }
 0xa3d   :  { %2854 = vmatpush1.msra.mxu0 %v5719_v2  ;;  %2925 = vmatpush1.msra.mxu1 %v5721_v60 }
 0xa3e   :  { %2855 = vmatprep.subr.mxu0 %v5725_v58  ;;  %2926 = vmatprep.subr.mxu1 %v5727_v11 }
 0xa3f   :  { %2856 = vmatpush1.msra.mxu0 %v5731_v47  ;;  %2927 = vmatpush1.msra.mxu1 %v5733_v27 }
 0xa40   :  { %2857 = vmatprep.subr.mxu0 %v5737_v28  ;;  %2928 = vmatprep.subr.mxu1 %v5739_v31 }
 0xa41   :  { %2858 = vmatpush1.msra.mxu0 %v5743_v4  ;;  %2929 = vmatpush1.msra.mxu1 %v5745_v63 }
 0xa42   :  { %2859 = vmatprep.subr.mxu0 %v5749_v51  ;;  %2930 = vmatprep.subr.mxu1 %v5751_v15 }
 0xa43   :  { %2860 = vmatpush1.msra.mxu0 %v5755_v16  ;;  %2931 = vmatpush1.msra.mxu1 %v5757_v17 }
 0xa44   :  { %2861 = vmatprep.subr.mxu0 %v5761_v18  ;;  %2932 = vmatprep.subr.mxu1 %v5763_v19 }
 0xa45   :  { %2862 = vmatpush1.msra.mxu0 %v5767_v21  ;;  %2933 = vmatpush1.msra.mxu1 %v5769_v22 }
 0xa46   :  { %2863 = vmatprep.subr.mxu0 %v5773_v24  ;;  %2934 = vmatprep.subr.mxu1 %v5775_v1 }
 0xa47   :  { %2864 = vmatpush1.msra.mxu0 %v5779_v32  ;;  %2935 = vmatpush1.msra.mxu1 %v5781_v33 }
 0xa48   :  { %2865 = vmatprep.subr.mxu0 %v5785_v34  ;;  %2936 = vmatprep.subr.mxu1 %v5787_v35 }
 0xa49   :  { %2866 = vmatpush1.msra.mxu0 %v5791_v36  ;;  %2937 = vmatpush1.msra.mxu1 %v7205_v62 }
 0xa4a   :  { %2867 = vmatprep.subr.mxu0 %v7206_v25  ;;  %2938 = vmatprep.subr.mxu1 %v7207_v23 }
 0xa4b   :  { %2868 = vmatpush1.msra.mxu0 %v7208_v49  ;;  %2939 = vmatpush1.msra.mxu1 %v7209_v50 }
 0xa4c   :  { %2869 = vmatprep.subr.mxu0 %v7210_v48  ;;  %2940 = vmatprep.subr.mxu1 %v7211_v61 }
 0xa4d   :  { %2870 = vmatpush1.msra.mxu0 %v7212_v52  ;;  %2941 = vmatpush1.msra.mxu1 %v7213_v29 }
 0xa4e   :  { %2871 = vmatprep.subr.mxu0 %v7214_v0  ;;  %2942 = vmatprep.subr.mxu1 %v7215_v8 }
 0xa4f   :  { %2872 = vmatpush1.msra.mxu0 %v7216_v39  ;;  %2943 = vmatpush1.msra.mxu1 %v7217_v54  ;;  %v7233_v54 = vld [vmem:[#allocation22_spill] sm:$0xff] }
 0xa50   :  { %2873 = vmatprep.subr.mxu0 %v7218_v43  ;;  %2944 = vmatprep.subr.mxu1 %v7219_v46  ;;  %v2189_v42 = vadd.f32 %v7233_v54, %v6010_v20 }
 0xa51   :  { %2874 = vmatpush1.msra.mxu0 %v7220_v44  ;;  %2945 = vmatpush1.msra.mxu1 %v7221_v41 }
 0xa52   :  { %2875 = vmatprep.subr.mxu0 %v7222_v14  ;;  %2946 = vmatprep.subr.mxu1 %v7223_v45  ;;  %v2078_v14 = vadd.f32 %v7231_v13, %v5993_v7 }
 0xa53   :  { %2876 = vmatpush1.msra.mxu0 %v7224_v53  ;;  %2909 = vmatprep.mubr.f32.mxu0 %v7225_v26 }
 0xa54   :  { %2947 = vmatpush1.msra.mxu1 %v7226_v40  ;;  %2980 = vmatprep.mubr.f32.mxu1 %v7225_v26 }
 0xa55   :  { %3019 = vmatprep.subr.mxu0 %v7227_v10  ;;  %3090 = vmatprep.subr.mxu1 %v7228_v30  ;;  %v7232_v10 = vld [vmem:[#allocation24_spill] sm:$0xff] }
 0xa56   :  { %v2191_v43 = vadd.f32 %v7232_v10, %v7202_v9  ;;  %v6178_v10 = vld [vmem:[#allocation8 + $0x1c8] sm:$0xff] }
 0xaf4   :  { %v2737_v5 = vpop.f32.mrf.mxu0  ;;  %v2808_v46 = vpop.f32.mrf.mxu1 }
 0xaf5   :  { %v2813_v45 = vadd.f32 %v2737_v5, %v2076_v37  ;;  %v2815_v6 = vadd.f32 %v2808_v46, %v2189_v42  ;;  %v6187_v42 = vld [vmem:[#allocation8 + $0x1d0] sm:$0xff] }
 0xaf6   :  { %v2739_v41 = vpop.f32.mrf.mxu0  ;;  %v2810_v26 = vpop.f32.mrf.mxu1 }
 0xaf7   :  { %v3841_v53 = vmul.f32 -1.442695, %v2813_v45  ;;  %v2814_v44 = vadd.f32 %v2739_v41, %v2078_v14  ;;  %v2816_v30 = vadd.f32 %v2810_v26, %v2191_v43 }
 0xaf9   :  { %4079 = vpow2.f32 %v3841_v53  ;;  %v3842_v40 = vmul.f32 -1.442695, %v2814_v44  ;;  %v3843_v39 = vmul.f32 -1.442695, %v2816_v30  ;;  %v6184_v30 = vld [vmem:[#allocation8 + $0x1c0] sm:$0xff] }
 0xafb   :  { %4081 = vpow2.f32 %v3842_v40 }
 0xafc   :  { %4083 = vtanh.f32 %v2815_v6  ;;  %v6175_v6 = vld [vmem:[#allocation8 + $0x1f0] sm:$0xff] }
 0xafd   :  { %4085 = vpow2.f32 %v3843_v39  ;;  %v6172_v39 = vld [vmem:[#allocation8 + $0x1e0] sm:$0xff] }
 0xb06   :  { %v4080_v8 = vpop.eup %4079 }
 0xb07   :  { %v2820_v13 = vadd.f32 1.0, %v4080_v8 }
 0xb08   :  { %v4082_v37 = vpop.eup %4081 }
 0xb09   :  { %4087 = vrcp.f32 %v2820_v13  ;;  %v2826_v41 = vadd.f32 1.0, %v4082_v37  ;;  %v4084_v44 = vpop.eup %4083  ;;  %v6190_v13 = vld [vmem:[#allocation8 + $0x1a8] sm:$0xff]  ;;  %v6193_v37 = vld [vmem:[#allocation8 + $0x1b8] sm:$0xff] }
 0xb0a   :  { %v4086_v14 = vpop.eup %4085 }
 0xb0b   :  { %4089 = vrcp.f32 %v2826_v41  ;;  %v2833_v5 = vadd.f32 1.0, %v4086_v14  ;;  %v6196_v41 = vld [vmem:[#allocation8 + $0x1a0] sm:$0xff] }
 0xb0d   :  { %4091 = vrcp.f32 %v2833_v5 }
 0xb16   :  { %v4088_v45 = vpop.eup %4087 }
 0xb17   :  { %v2837_v53 = vmul.f32 %v4088_v45, %v4084_v44  ;;  %v6199_v44 = vld [vmem:[#allocation8 + $0x1b0] sm:$0xff] }
 0xb18   :  { %v4090_v40 = vpop.eup %4089 }
 0xb19   :  { %v2836_v43 = vmul.f32 %v4090_v40, %v6091_v12  ;;  %v6181_v12 = vld [vmem:[#allocation8 + $0x1d8] sm:$0xff] }
 0xb1a   :  { %v4092_v8 = vpop.eup %4091 }
 0xb1b   :  { %v6169_v26 = vadd.f32 %v2837_v53, %v2836_v43 }
 0xb1d   :  { %4093 = vtanh.f32 %v6169_v26 }
 0xb2a   :  { %v4094_v54 = vpop.eup %4093 }
 0xb2b   :  { %v2840_v46 = vmul.f32 %v4094_v54, %v4092_v8 }
 0xb2d   :  { %2910 = vmatmul.mubr.f32.vlgmr.msra.gmra.mxu0 %v2840_v46  ;;  %2981 = vmatmul.mubr.f32.vlgmr.msra.gmra.mxu1 %v2840_v46  ;;  %v6287_v46 = vld [vmem:[#allocation8 + $0x198] sm:$0xff] }
 0xb2e   :  { %3020 = vmatpush1.msra.mxu0 %v6172_v39  ;;  %3091 = vmatpush1.msra.mxu1 %v6175_v6 }
 0xb2f   :  { %3021 = vmatprep.subr.mxu0 %v6178_v10  ;;  %3092 = vmatprep.subr.mxu1 %v6181_v12 }
 0xb30   :  { %3022 = vmatpush1.msra.mxu0 %v6184_v30  ;;  %3093 = vmatpush1.msra.mxu1 %v6187_v42 }
 0xb31   :  { %3023 = vmatprep.subr.mxu0 %v6190_v13  ;;  %3094 = vmatprep.subr.mxu1 %v6193_v37 }
 0xb32   :  { %3024 = vmatpush1.msra.mxu0 %v6196_v41  ;;  %3095 = vmatpush1.msra.mxu1 %v6199_v44 }
 0xb33   :  { %3025 = vmatprep.subr.mxu0 %v5701_v38  ;;  %3096 = vmatprep.subr.mxu1 %v5703_v59  ;;  %v7234_v38 = vld [vmem:[#allocation48_spill] sm:$0xff]  ;;  %v7235_v59 = vld [vmem:[#allocation49_spill] sm:$0xff] }
 0xb34   :  { %3026 = vmatpush1.msra.mxu0 %v5707_v57  ;;  %3097 = vmatpush1.msra.mxu1 %v5709_v56  ;;  %v7236_v57 = vld [vmem:[#allocation47_spill] sm:$0xff]  ;;  %v7237_v56 = vld [vmem:[#allocation14_spill] sm:$0xff] }
 0xb35   :  { %3027 = vmatprep.subr.mxu0 %v5713_v55  ;;  %3098 = vmatprep.subr.mxu1 %v5715_v3  ;;  %v7238_v55 = vld [vmem:[#allocation15_spill] sm:$0xff]  ;;  %v7239_v3 = vld [vmem:[#allocation50_spill] sm:$0xff] }
 0xb36   :  { %3028 = vmatpush1.msra.mxu0 %v5719_v2  ;;  %3099 = vmatpush1.msra.mxu1 %v5721_v60  ;;  %v7240_v2 = vld [vmem:[#allocation52_spill] sm:$0xff]  ;;  %v7241_v60 = vld [vmem:[#allocation53_spill] sm:$0xff] }
 0xb37   :  { %3029 = vmatprep.subr.mxu0 %v5725_v58  ;;  %3100 = vmatprep.subr.mxu1 %v5727_v11  ;;  %v7242_v58 = vld [vmem:[#allocation51_spill] sm:$0xff]  ;;  %v7243_v11 = vld [vmem:[#allocation37_spill] sm:$0xff] }
 0xb38   :  { %3030 = vmatpush1.msra.mxu0 %v5731_v47  ;;  %3101 = vmatpush1.msra.mxu1 %v5733_v27  ;;  %v7244_v47 = vmov 0.0   ;;  %v7245_v27 = vld [vmem:[#allocation35_spill] sm:$0xff] }
 0xb39   :  { %3031 = vmatprep.subr.mxu0 %v5737_v28  ;;  %3102 = vmatprep.subr.mxu1 %v5739_v31  ;;  %v6256_v28 = vld [vmem:[#allocation8 + $0x1e8] sm:$0xff]  ;;  %v6259_v31 = vld [vmem:[#allocation8 + $0x1f8] sm:$0xff] }
 0xb3a   :  { %3032 = vmatpush1.msra.mxu0 %v5743_v4  ;;  %3103 = vmatpush1.msra.mxu1 %v5745_v63  ;;  %7246 = vst [vmem:[#allocation17_spill] sm:$0xff] %v6256_v28  ;;  %7247 = vst [vmem:[#allocation19_spill] sm:$0xff] %v6259_v31  ;;  %v7248_v4 = vld [vmem:[#allocation32_spill] sm:$0xff]  ;;  %v7249_v63 = vld [vmem:[#allocation25_spill] sm:$0xff] }
 0xb3b   :  { %3033 = vmatprep.subr.mxu0 %v5749_v51  ;;  %3104 = vmatprep.subr.mxu1 %v5751_v15  ;;  %v2082_v51 = vadd.f32 %v7249_v63, %v7248_v4  ;;  %v6323_v63 = vld [vmem:[#allocation8 + $0x138] sm:$0xff] }
 0xb3c   :  { %3034 = vmatpush1.msra.mxu0 %v5755_v16  ;;  %3105 = vmatpush1.msra.mxu1 %v5757_v17  ;;  %v7250_v16 = vld [vmem:[#allocation27_spill] sm:$0xff] }
 0xb3d   :  { %3035 = vmatprep.subr.mxu0 %v5761_v18  ;;  %3106 = vmatprep.subr.mxu1 %v5763_v19  ;;  %v2084_v17 = vadd.f32 %v7250_v16, %v5993_v7  ;;  %v6332_v16 = vld [vmem:[#allocation8 + $0x108] sm:$0xff] }
 0xb3e   :  { %3036 = vmatpush1.msra.mxu0 %v5767_v21  ;;  %3107 = vmatpush1.msra.mxu1 %v5769_v22 }
 0xb3f   :  { %3037 = vmatprep.subr.mxu0 %v5773_v24  ;;  %3108 = vmatprep.subr.mxu1 %v5775_v1 }
 0xb40   :  { %3038 = vmatpush1.msra.mxu0 %v5779_v32  ;;  %3109 = vmatpush1.msra.mxu1 %v5781_v33  ;;  %v7251_v33 = vld [vmem:[#allocation28_spill] sm:$0xff] }
 0xb41   :  { %3039 = vmatprep.subr.mxu0 %v5785_v34  ;;  %3110 = vmatprep.subr.mxu1 %v5787_v35  ;;  %v2197_v34 = vadd.f32 %v7251_v33, %v7202_v9  ;;  %v6359_v33 = vld [vmem:[#allocation8 + $0xd8] sm:$0xff] }
 0xb42   :  { %3040 = vmatpush1.msra.mxu0 %v5791_v36  ;;  %3111 = vmatpush1.msra.mxu1 %v7205_v62  ;;  %v7252_v36 = vld [vmem:[#allocation26_spill] sm:$0xff] }
 0xb43   :  { %3041 = vmatprep.subr.mxu0 %v7206_v25  ;;  %3112 = vmatprep.subr.mxu1 %v7207_v23  ;;  %v2195_v62 = vadd.f32 %v7252_v36, %v6010_v20  ;;  %v6368_v36 = vld [vmem:[#allocation8 + $0xa8] sm:$0xff] }
 0xb44   :  { %3042 = vmatpush1.msra.mxu0 %v7208_v49  ;;  %3113 = vmatpush1.msra.mxu1 %v7209_v50 }
 0xb45   :  { %3043 = vmatprep.subr.mxu0 %v7210_v48  ;;  %3114 = vmatprep.subr.mxu1 %v7211_v61 }
 0xb46   :  { %3044 = vmatpush1.msra.mxu0 %v7212_v52  ;;  %3115 = vmatpush1.msra.mxu1 %v7213_v29 }
 0xb47   :  { %3045 = vmatprep.subr.mxu0 %v7214_v0  ;;  %3116 = vmatprep.subr.mxu1 %v7234_v38  ;;  %v6290_v38 = vld [vmem:[#allocation8 + $0x180] sm:$0xff] }
 0xb48   :  { %3046 = vmatpush1.msra.mxu0 %v7235_v59  ;;  %3117 = vmatpush1.msra.mxu1 %v7236_v57  ;;  %v6293_v59 = vld [vmem:[#allocation8 + $0x190] sm:$0xff]  ;;  %v6296_v57 = vld [vmem:[#allocation8 + $0x168] sm:$0xff] }
 0xb49   :  { %3047 = vmatprep.subr.mxu0 %v7237_v56  ;;  %3118 = vmatprep.subr.mxu1 %v7238_v55  ;;  %v6299_v56 = vld [vmem:[#allocation8 + $0x178] sm:$0xff]  ;;  %v6302_v55 = vld [vmem:[#allocation8 + $0x160] sm:$0xff] }
 0xb4a   :  { %3048 = vmatpush1.msra.mxu0 %v7239_v3  ;;  %3119 = vmatpush1.msra.mxu1 %v7240_v2  ;;  %v6305_v3 = vld [vmem:[#allocation8 + $0x170] sm:$0xff]  ;;  %v6308_v2 = vld [vmem:[#allocation8 + $0x148] sm:$0xff] }
 0xb4b   :  { %3049 = vmatprep.subr.mxu0 %v7241_v60  ;;  %3120 = vmatprep.subr.mxu1 %v7242_v58  ;;  %v6311_v60 = vld [vmem:[#allocation8 + $0x158] sm:$0xff]  ;;  %v6314_v58 = vld [vmem:[#allocation8 + $0x140] sm:$0xff] }
 0xb4c   :  { %3050 = vmatpush1.msra.mxu0 %v7243_v11  ;;  %3083 = vmatprep.mubr.f32.mxu0 %v7244_v47  ;;  %v6317_v11 = vld [vmem:[#allocation8 + $0x150] sm:$0xff] }
 0xb4d   :  { %3121 = vmatpush1.msra.mxu1 %v7245_v27  ;;  %3154 = vmatprep.mubr.f32.mxu1 %v7244_v47  ;;  %v6320_v27 = vld [vmem:[#allocation8 + $0x128] sm:$0xff] }
 0xb4e   :  { %3193 = vmatprep.subr.mxu0 %v6256_v28  ;;  %3264 = vmatprep.subr.mxu1 %v6259_v31 }
 0xbed   :  { %v2911_v15 = vpop.f32.mrf.mxu0  ;;  %v2982_v24 = vpop.f32.mrf.mxu1 }
 0xbee   :  { %v2987_v18 = vadd.f32 %v2911_v15, %v2082_v51  ;;  %v2989_v25 = vadd.f32 %v2982_v24, %v2195_v62  ;;  %v6326_v51 = vld [vmem:[#allocation8 + $0x120] sm:$0xff]  ;;  %v6329_v15 = vld [vmem:[#allocation8 + $0x130] sm:$0xff]  ;;  %v6371_v62 = vld [vmem:[#allocation8 + $0xb8] sm:$0xff] }
 0xbef   :  { %v2913_v19 = vpop.f32.mrf.mxu0  ;;  %v2984_v32 = vpop.f32.mrf.mxu1  ;;  %v6350_v24 = vld [vmem:[#allocation8 + $0xe0] sm:$0xff] }
 0xbf0   :  { %v3844_v21 = vmul.f32 -1.442695, %v2987_v18  ;;  %v2988_v22 = vadd.f32 %v2913_v19, %v2084_v17  ;;  %v2990_v35 = vadd.f32 %v2984_v32, %v2197_v34  ;;  %v6335_v17 = vld [vmem:[#allocation8 + $0x118] sm:$0xff]  ;;  %v6338_v18 = vld [vmem:[#allocation8 + $0x100] sm:$0xff]  ;;  %v6341_v19 = vld [vmem:[#allocation8 + $0x110] sm:$0xff] }
 0xbf1   :  { %v6356_v32 = vld [vmem:[#allocation8 + $0xc8] sm:$0xff]  ;;  %v6362_v34 = vld [vmem:[#allocation8 + $0xc0] sm:$0xff] }
 0xbf2   :  { %4095 = vpow2.f32 %v3844_v21  ;;  %v3845_v1 = vmul.f32 -1.442695, %v2988_v22  ;;  %v3846_v23 = vmul.f32 -1.442695, %v2990_v35  ;;  %v6344_v21 = vld [vmem:[#allocation8 + $0xe8] sm:$0xff]  ;;  %v6347_v22 = vld [vmem:[#allocation8 + $0xf8] sm:$0xff] }
 0xbf3   :  { %v6365_v35 = vld [vmem:[#allocation8 + $0xd0] sm:$0xff] }
 0xbf4   :  { %4097 = vpow2.f32 %v3845_v1  ;;  %v6353_v1 = vld [vmem:[#allocation8 + $0xf0] sm:$0xff] }
 0xbf5   :  { %4099 = vtanh.f32 %v2989_v25  ;;  %v6374_v25 = vld [vmem:[#allocation8 + $0xa0] sm:$0xff] }
 0xbf6   :  { %4101 = vpow2.f32 %v3846_v23  ;;  %v6377_v23 = vld [vmem:[#allocation8 + $0xb0] sm:$0xff] }
 0xbf7   :  { %7253 = vst [vmem:[#allocation63_spill] sm:$0xff] %v6377_v23 }
 0xbff   :  { %v4096_v49 = vpop.eup %4095 }
 0xc00   :  { %v2994_v50 = vadd.f32 1.0, %v4096_v49  ;;  %v6380_v49 = vld [vmem:[#allocation8 + $0x88] sm:$0xff] }
 0xc01   :  { %v4098_v48 = vpop.eup %4097  ;;  %7254 = vst [vmem:[#allocation20_spill] sm:$0xff] %v6380_v49 }
 0xc02   :  { %4103 = vrcp.f32 %v2994_v50  ;;  %v3000_v61 = vadd.f32 1.0, %v4098_v48  ;;  %v4100_v52 = vpop.eup %4099  ;;  %v6383_v50 = vld [vmem:[#allocation8 + $0x98] sm:$0xff]  ;;  %v6386_v48 = vld [vmem:[#allocation8 + $0x80] sm:$0xff] }
 0xc03   :  { %v4102_v29 = vpop.eup %4101  ;;  %7255 = vst [vmem:[#allocation18_spill] sm:$0xff] %v6383_v50  ;;  %7256 = vst [vmem:[#allocation40_spill] sm:$0xff] %v6386_v48 }
 0xc04   :  { %4105 = vrcp.f32 %v3000_v61  ;;  %v3007_v53 = vadd.f32 1.0, %v4102_v29  ;;  %v6389_v61 = vld [vmem:[#allocation8 + $0x90] sm:$0xff]  ;;  %v6395_v29 = vld [vmem:[#allocation8 + $0x78] sm:$0xff] }
 0xc05   :  { %7257 = vst [vmem:[#allocation41_spill] sm:$0xff] %v6389_v61  ;;  %7259 = vst [vmem:[#allocation42_spill] sm:$0xff] %v6395_v29 }
 0xc06   :  { %4107 = vrcp.f32 %v3007_v53  ;;  %v6407_v53 = vld [vmem:[#allocation8 + $0x58] sm:$0xff] }
 0xc07   :  { %7263 = vst [vmem:[#allocation11_spill] sm:$0xff] %v6407_v53 }
 0xc0f   :  { %v4104_v0 = vpop.eup %4103 }
 0xc10   :  { %v3011_v14 = vmul.f32 %v4104_v0, %v4100_v52  ;;  %v6392_v52 = vld [vmem:[#allocation8 + $0x68] sm:$0xff]  ;;  %v6398_v0 = vld [vmem:[#allocation8 + $0x60] sm:$0xff] }
 0xc11   :  { %v4106_v45 = vpop.eup %4105  ;;  %7258 = vst [vmem:[#allocation39_spill] sm:$0xff] %v6392_v52  ;;  %7260 = vst [vmem:[#allocation44_spill] sm:$0xff] %v6398_v0 }
 0xc12   :  { %v3010_v40 = vmul.f32 %v4106_v45, %v6169_v26  ;;  %v6284_v26 = vld [vmem:[#allocation8 + $0x188] sm:$0xff] }
 0xc13   :  { %v4108_v43 = vpop.eup %4107  ;;  %v6404_v45 = vld [vmem:[#allocation8 + $0x48] sm:$0xff] }
 0xc14   :  { %v6271_v5 = vadd.f32 %v3011_v14, %v3010_v40  ;;  %v6401_v14 = vld [vmem:[#allocation8 + $0x70] sm:$0xff]  ;;  %7262 = vst [vmem:[#allocation43_spill] sm:$0xff] %v6404_v45  ;;  %v6410_v40 = vld [vmem:[#allocation8 + $0x40] sm:$0xff] }
 0xc15   :  { %7261 = vst [vmem:[#allocation45_spill] sm:$0xff] %v6401_v14  ;;  %7264 = vst [vmem:[#allocation12_spill] sm:$0xff] %v6410_v40 }
 0xc16   :  { %4109 = vtanh.f32 %v6271_v5 }
 0xc23   :  { %v4110_v8 = vpop.eup %4109 }
 0xc24   :  { %v3014_v54 = vmul.f32 %v4110_v8, %v4108_v43  ;;  %v6413_v43 = vld [vmem:[#allocation8 + $0x50] sm:$0xff]  ;;  %v6416_v8 = vld [vmem:[#allocation8 + $0x28] sm:$0xff] }
 0xc25   :  { %7265 = vst [vmem:[#allocation46_spill] sm:$0xff] %v6413_v43  ;;  %7266 = vst [vmem:[#allocation33_spill] sm:$0xff] %v6416_v8 }
 0xc26   :  { %3084 = vmatmul.mubr.f32.vlgmr.msra.gmra.mxu0 %v3014_v54  ;;  %3155 = vmatmul.mubr.f32.vlgmr.msra.gmra.mxu1 %v3014_v54  ;;  %v6419_v54 = vld [vmem:[#allocation8 + $0x38] sm:$0xff] }
 0xc27   :  { %3194 = vmatpush1.msra.mxu0 %v6172_v39  ;;  %3265 = vmatpush1.msra.mxu1 %v6175_v6  ;;  %7267 = vst [vmem:[#allocation38_spill] sm:$0xff] %v6419_v54 }
 0xc28   :  { %3195 = vmatprep.subr.mxu0 %v6178_v10  ;;  %3266 = vmatprep.subr.mxu1 %v6181_v12 }
 0xc29   :  { %3196 = vmatpush1.msra.mxu0 %v6184_v30  ;;  %3267 = vmatpush1.msra.mxu1 %v6187_v42 }
 0xc2a   :  { %3197 = vmatprep.subr.mxu0 %v6190_v13  ;;  %3268 = vmatprep.subr.mxu1 %v6193_v37 }
 0xc2b   :  { %3198 = vmatpush1.msra.mxu0 %v6196_v41  ;;  %3269 = vmatpush1.msra.mxu1 %v6199_v44 }
 0xc2c   :  { %3199 = vmatprep.subr.mxu0 %v6284_v26  ;;  %3270 = vmatprep.subr.mxu1 %v6287_v46 }
 0xc2d   :  { %3200 = vmatpush1.msra.mxu0 %v6290_v38  ;;  %3271 = vmatpush1.msra.mxu1 %v6293_v59 }
 0xc2e   :  { %3201 = vmatprep.subr.mxu0 %v6296_v57  ;;  %3272 = vmatprep.subr.mxu1 %v6299_v56 }
 0xc2f   :  { %3202 = vmatpush1.msra.mxu0 %v6302_v55  ;;  %3273 = vmatpush1.msra.mxu1 %v6305_v3 }
 0xc30   :  { %3203 = vmatprep.subr.mxu0 %v6308_v2  ;;  %3274 = vmatprep.subr.mxu1 %v6311_v60 }
 0xc31   :  { %3204 = vmatpush1.msra.mxu0 %v6314_v58  ;;  %3275 = vmatpush1.msra.mxu1 %v6317_v11 }
 0xc32   :  { %3205 = vmatprep.subr.mxu0 %v6320_v27  ;;  %3276 = vmatprep.subr.mxu1 %v6323_v63 }
 0xc33   :  { %3206 = vmatpush1.msra.mxu0 %v6326_v51  ;;  %3277 = vmatpush1.msra.mxu1 %v6329_v15 }
 0xc34   :  { %3207 = vmatprep.subr.mxu0 %v6332_v16  ;;  %3278 = vmatprep.subr.mxu1 %v6335_v17 }
 0xc35   :  { %3208 = vmatpush1.msra.mxu0 %v6338_v18  ;;  %3279 = vmatpush1.msra.mxu1 %v6341_v19 }
 0xc36   :  { %3209 = vmatprep.subr.mxu0 %v6344_v21  ;;  %3280 = vmatprep.subr.mxu1 %v6347_v22 }
 0xc37   :  { %3210 = vmatpush1.msra.mxu0 %v6350_v24  ;;  %3281 = vmatpush1.msra.mxu1 %v6353_v1 }
 0xc38   :  { %3211 = vmatprep.subr.mxu0 %v6356_v32  ;;  %3282 = vmatprep.subr.mxu1 %v6359_v33 }
 0xc39   :  { %3212 = vmatpush1.msra.mxu0 %v6362_v34  ;;  %3283 = vmatpush1.msra.mxu1 %v6365_v35 }
 0xc3a   :  { %3213 = vmatprep.subr.mxu0 %v6368_v36  ;;  %3284 = vmatprep.subr.mxu1 %v6371_v62 }
 0xc3b   :  { %3214 = vmatpush1.msra.mxu0 %v6374_v25  ;;  %3285 = vmatpush1.msra.mxu1 %v6377_v23 }
 0xc3c   :  { %3215 = vmatprep.subr.mxu0 %v6380_v49  ;;  %3286 = vmatprep.subr.mxu1 %v6383_v50  ;;  %v7277_v50 = vld [vmem:[#allocation30_spill] sm:$0xff] }
 0xc3d   :  { %3216 = vmatpush1.msra.mxu0 %v6386_v48  ;;  %3287 = vmatpush1.msra.mxu1 %v6389_v61 }
 0xc3e   :  { %3217 = vmatprep.subr.mxu0 %v6392_v52  ;;  %3288 = vmatprep.subr.mxu1 %v6395_v29 }
 0xc3f   :  { %3218 = vmatpush1.msra.mxu0 %v6398_v0  ;;  %3289 = vmatpush1.msra.mxu1 %v6401_v14 }
 0xc40   :  { %3219 = vmatprep.subr.mxu0 %v6404_v45  ;;  %3290 = vmatprep.subr.mxu1 %v6407_v53  ;;  %v6422_v45 = vld [vmem:[#allocation8 + $0x20] sm:$0xff]  ;;  %v6425_v53 = vld [vmem:[#allocation8 + $0x30] sm:$0xff] }
 0xc41   :  { %3220 = vmatpush1.msra.mxu0 %v6410_v40  ;;  %3291 = vmatpush1.msra.mxu1 %v6413_v43  ;;  %7268 = vst [vmem:[#allocation21_spill] sm:$0xff] %v6422_v45  ;;  %7269 = vst [vmem:[#allocation23_spill] sm:$0xff] %v6425_v53  ;;  %v6428_v40 = vld [vmem:[#allocation8 + $0x8] sm:$0xff]  ;;  %v6431_v43 = vld [vmem:[#allocation8 + $0x18] sm:$0xff] }
 0xc42   :  { %3221 = vmatprep.subr.mxu0 %v6416_v8  ;;  %3292 = vmatprep.subr.mxu1 %v6419_v54  ;;  %7270 = vst [vmem:[#allocation24_spill] sm:$0xff] %v6428_v40  ;;  %7271 = vst [vmem:[#allocation22_spill] sm:$0xff] %v6431_v43  ;;  %v6434_v8 = vld [vmem:[#allocation8] sm:$0xff]  ;;  %v6438_v54 = vld [vmem:[#allocation8 + $0x10] sm:$0xff] }
 0xc43   :  { %3222 = vmatpush1.msra.mxu0 %v6422_v45  ;;  %3293 = vmatpush1.msra.mxu1 %v6425_v53  ;;  %7272 = vst [vmem:[#allocation48_spill] sm:$0xff] %v6434_v8  ;;  %7273 = vst [vmem:[#allocation49_spill] sm:$0xff] %v6438_v54  ;;  %v7275_v45 = vld [vmem:[#allocation31_spill] sm:$0xff] }
 0xc44   :  { %3223 = vmatprep.subr.mxu0 %v6428_v40  ;;  %3294 = vmatprep.subr.mxu1 %v6431_v43  ;;  %v7274_v40 = vld [vmem:[#allocation29_spill] sm:$0xff]  ;;  %v2090_v14 = vadd.f32 %v7275_v45, %v5993_v7 }
 0xc45   :  { %3224 = vmatpush1.msra.mxu0 %v6434_v8  ;;  %3257 = vmatprep.mubr.f32.mxu0 %v7244_v47  ;;  %v2088_v53 = vadd.f32 %v7274_v40, %v7248_v4  ;;  %v2201_v40 = vadd.f32 %v7277_v50, %v6010_v20  ;;  %v7280_v50 = vld [vmem:[#allocation18_spill] sm:$0xff] }
 0xc46   :  { %3295 = vmatpush1.msra.mxu1 %v6438_v54  ;;  %3328 = vmatprep.mubr.f32.mxu1 %v7244_v47 }
 0xc47   :  { %3367 = vmatprep.subr.mxu0 %v6256_v28  ;;  %3438 = vmatprep.subr.mxu1 %v6259_v31  ;;  %v7276_v28 = vld [vmem:[#allocation54_spill] sm:$0xff] }
 0xc48   :  { %v2203_v48 = vadd.f32 %v7276_v28, %v7202_v9 }
 0xce6   :  { %v3085_v43 = vpop.f32.mrf.mxu0  ;;  %v3156_v61 = vpop.f32.mrf.mxu1 }
 0xce7   :  { %v3161_v8 = vadd.f32 %v3085_v43, %v2088_v53  ;;  %v3163_v4 = vadd.f32 %v3156_v61, %v2201_v40  ;;  %v7281_v61 = vld [vmem:[#allocation40_spill] sm:$0xff]  ;;  %v7283_v40 = vld [vmem:[#allocation39_spill] sm:$0xff] }
 0xce8   :  { %v3087_v0 = vpop.f32.mrf.mxu0  ;;  %v3158_v47 = vpop.f32.mrf.mxu1 }
 0xce9   :  { %v3847_v29 = vmul.f32 -1.442695, %v3161_v8  ;;  %v3162_v52 = vadd.f32 %v3087_v0, %v2090_v14  ;;  %v3164_v31 = vadd.f32 %v3158_v47, %v2203_v48 }
 0xceb   :  { %4111 = vpow2.f32 %v3847_v29  ;;  %v3848_v54 = vmul.f32 -1.442695, %v3162_v52  ;;  %v3849_v49 = vmul.f32 -1.442695, %v3164_v31 }
 0xced   :  { %4113 = vpow2.f32 %v3848_v54  ;;  %v7282_v54 = vld [vmem:[#allocation41_spill] sm:$0xff] }
 0xcee   :  { %4115 = vtanh.f32 %v3163_v4 }
 0xcef   :  { %4117 = vpow2.f32 %v3849_v49  ;;  %v7279_v49 = vld [vmem:[#allocation20_spill] sm:$0xff] }
 0xcf8   :  { %v4112_v23 = vpop.eup %4111 }
 0xcf9   :  { %v3168_v45 = vadd.f32 1.0, %v4112_v23 }
 0xcfa   :  { %v4114_v53 = vpop.eup %4113 }
 0xcfb   :  { %4119 = vrcp.f32 %v3168_v45  ;;  %v3174_v29 = vadd.f32 1.0, %v4114_v53  ;;  %v4116_v52 = vpop.eup %4115  ;;  %v7284_v45 = vld [vmem:[#allocation42_spill] sm:$0xff]  ;;  %v7285_v53 = vld [vmem:[#allocation44_spill] sm:$0xff] }
 0xcfc   :  { %v4118_v0 = vpop.eup %4117 }
 0xcfd   :  { %4121 = vrcp.f32 %v3174_v29  ;;  %v3181_v28 = vadd.f32 1.0, %v4118_v0  ;;  %v7286_v29 = vld [vmem:[#allocation45_spill] sm:$0xff]  ;;  %v7288_v0 = vld [vmem:[#allocation11_spill] sm:$0xff] }
 0xcff   :  { %4123 = vrcp.f32 %v3181_v28  ;;  %v7292_v28 = vld [vmem:[#allocation38_spill] sm:$0xff] }
 0xd08   :  { %v4120_v14 = vpop.eup %4119 }
 0xd09   :  { %v3185_v43 = vmul.f32 %v4120_v14, %v4116_v52  ;;  %v7287_v52 = vld [vmem:[#allocation43_spill] sm:$0xff]  ;;  %v7289_v14 = vld [vmem:[#allocation12_spill] sm:$0xff] }
 0xd0a   :  { %v4122_v8 = vpop.eup %4121 }
 0xd0b   :  { %v3184_v47 = vmul.f32 %v4122_v8, %v6271_v5  ;;  %v7278_v5 = vld [vmem:[#allocation63_spill] sm:$0xff]  ;;  %v7291_v8 = vld [vmem:[#allocation33_spill] sm:$0xff] }
 0xd0c   :  { %v4124_v31 = vpop.eup %4123 }
 0xd0d   :  { %v6453_v48 = vadd.f32 %v3185_v43, %v3184_v47  ;;  %v7290_v43 = vld [vmem:[#allocation46_spill] sm:$0xff]  ;;  %v7293_v47 = vld [vmem:[#allocation21_spill] sm:$0xff] }
 0xd0f   :  { %4125 = vtanh.f32 %v6453_v48 }
 0xd1c   :  { %v4126_v4 = vpop.eup %4125 }
 0xd1d   :  { %v3188_v23 = vmul.f32 %v4126_v4, %v4124_v31  ;;  %v7294_v31 = vld [vmem:[#allocation23_spill] sm:$0xff]  ;;  %v7295_v4 = vld [vmem:[#allocation24_spill] sm:$0xff] }
 0xd1f   :  { %3258 = vmatmul.mubr.f32.vlgmr.msra.gmra.mxu0 %v3188_v23  ;;  %3329 = vmatmul.mubr.f32.vlgmr.msra.gmra.mxu1 %v3188_v23  ;;  %v7296_v23 = vld [vmem:[#allocation22_spill] sm:$0xff] }
 0xd20   :  { %3368 = vmatpush1.msra.mxu0 %v6172_v39  ;;  %3439 = vmatpush1.msra.mxu1 %v6175_v6 }
 0xd21   :  { %3369 = vmatprep.subr.mxu0 %v6178_v10  ;;  %3440 = vmatprep.subr.mxu1 %v6181_v12 }
 0xd22   :  { %3370 = vmatpush1.msra.mxu0 %v6184_v30  ;;  %3441 = vmatpush1.msra.mxu1 %v6187_v42 }
 0xd23   :  { %3371 = vmatprep.subr.mxu0 %v6190_v13  ;;  %3442 = vmatprep.subr.mxu1 %v6193_v37 }
 0xd24   :  { %3372 = vmatpush1.msra.mxu0 %v6196_v41  ;;  %3443 = vmatpush1.msra.mxu1 %v6199_v44 }
 0xd25   :  { %3373 = vmatprep.subr.mxu0 %v6284_v26  ;;  %3444 = vmatprep.subr.mxu1 %v6287_v46 }
 0xd26   :  { %3374 = vmatpush1.msra.mxu0 %v6290_v38  ;;  %3445 = vmatpush1.msra.mxu1 %v6293_v59 }
 0xd27   :  { %3375 = vmatprep.subr.mxu0 %v6296_v57  ;;  %3446 = vmatprep.subr.mxu1 %v6299_v56 }
 0xd28   :  { %3376 = vmatpush1.msra.mxu0 %v6302_v55  ;;  %3447 = vmatpush1.msra.mxu1 %v6305_v3 }
 0xd29   :  { %3377 = vmatprep.subr.mxu0 %v6308_v2  ;;  %3448 = vmatprep.subr.mxu1 %v6311_v60 }
 0xd2a   :  { %3378 = vmatpush1.msra.mxu0 %v6314_v58  ;;  %3449 = vmatpush1.msra.mxu1 %v6317_v11 }
 0xd2b   :  { %3379 = vmatprep.subr.mxu0 %v6320_v27  ;;  %3450 = vmatprep.subr.mxu1 %v6323_v63 }
 0xd2c   :  { %3380 = vmatpush1.msra.mxu0 %v6326_v51  ;;  %3451 = vmatpush1.msra.mxu1 %v6329_v15 }
 0xd2d   :  { %3381 = vmatprep.subr.mxu0 %v6332_v16  ;;  %3452 = vmatprep.subr.mxu1 %v6335_v17 }
 0xd2e   :  { %3382 = vmatpush1.msra.mxu0 %v6338_v18  ;;  %3453 = vmatpush1.msra.mxu1 %v6341_v19 }
 0xd2f   :  { %3383 = vmatprep.subr.mxu0 %v6344_v21  ;;  %3454 = vmatprep.subr.mxu1 %v6347_v22 }
 0xd30   :  { %3384 = vmatpush1.msra.mxu0 %v6350_v24  ;;  %3455 = vmatpush1.msra.mxu1 %v6353_v1 }
 0xd31   :  { %3385 = vmatprep.subr.mxu0 %v6356_v32  ;;  %3456 = vmatprep.subr.mxu1 %v6359_v33 }
 0xd32   :  { %3386 = vmatpush1.msra.mxu0 %v6362_v34  ;;  %3457 = vmatpush1.msra.mxu1 %v6365_v35 }
 0xd33   :  { %3387 = vmatprep.subr.mxu0 %v6368_v36  ;;  %3458 = vmatprep.subr.mxu1 %v6371_v62 }
 0xd34   :  { %3388 = vmatpush1.msra.mxu0 %v6374_v25  ;;  %3459 = vmatpush1.msra.mxu1 %v7278_v5 }
 0xd35   :  { %3389 = vmatprep.subr.mxu0 %v7279_v49  ;;  %3460 = vmatprep.subr.mxu1 %v7280_v50  ;;  %v7306_v50 = vld [vmem:[#allocation57_spill] sm:$0xff] }
 0xd36   :  { %3390 = vmatpush1.msra.mxu0 %v7281_v61  ;;  %3461 = vmatpush1.msra.mxu1 %v7282_v54 }
 0xd37   :  { %3391 = vmatprep.subr.mxu0 %v7283_v40  ;;  %3462 = vmatprep.subr.mxu1 %v7284_v45 }
 0xd38   :  { %3392 = vmatpush1.msra.mxu0 %v7285_v53  ;;  %3463 = vmatpush1.msra.mxu1 %v7286_v29  ;;  %v7297_v29 = vld [vmem:[#allocation48_spill] sm:$0xff] }
 0xd39   :  { %3393 = vmatprep.subr.mxu0 %v7287_v52  ;;  %3464 = vmatprep.subr.mxu1 %v7288_v0  ;;  %v7298_v52 = vmov 0.0   ;;  %v7299_v0 = vld [vmem:[#allocation49_spill] sm:$0xff] }
 0xd3a   :  { %3394 = vmatpush1.msra.mxu0 %v7289_v14  ;;  %3465 = vmatpush1.msra.mxu1 %v7290_v43  ;;  %v7300_v43 = vld [vmem:[#allocation17_spill] sm:$0xff] }
 0xd3b   :  { %3395 = vmatprep.subr.mxu0 %v7291_v8  ;;  %3466 = vmatprep.subr.mxu1 %v7292_v28  ;;  %v7301_v8 = vld [vmem:[#allocation19_spill] sm:$0xff]  ;;  %v7302_v28 = vld [vmem:[#allocation32_spill] sm:$0xff] }
 0xd3c   :  { %3396 = vmatpush1.msra.mxu0 %v7293_v47  ;;  %3467 = vmatpush1.msra.mxu1 %v7294_v31  ;;  %v7303_v47 = vld [vmem:[#allocation56_spill] sm:$0xff] }
 0xd3d   :  { %3397 = vmatprep.subr.mxu0 %v7295_v4  ;;  %3468 = vmatprep.subr.mxu1 %v7296_v23  ;;  %v2094_v14 = vadd.f32 %v7303_v47, %v7302_v28  ;;  %v7304_v4 = vld [vmem:[#allocation55_spill] sm:$0xff]  ;;  %v2207_v47 = vadd.f32 %v7306_v50, %v6010_v20 }
 0xd3e   :  { %3398 = vmatpush1.msra.mxu0 %v7297_v29  ;;  %3431 = vmatprep.mubr.f32.mxu0 %v7298_v52  ;;  %v2096_v53 = vadd.f32 %v7304_v4, %v5993_v7 }
 0xd3f   :  { %3469 = vmatpush1.msra.mxu1 %v7299_v0  ;;  %3502 = vmatprep.mubr.f32.mxu1 %v7298_v52 }
 0xd40   :  { %3541 = vmatprep.subr.mxu0 %v7300_v43  ;;  %3612 = vmatprep.subr.mxu1 %v7301_v8  ;;  %v7305_v43 = vld [vmem:[#allocation62_spill] sm:$0xff] }
 0xd41   :  { %v2209_v61 = vadd.f32 %v7305_v43, %v7202_v9 }
 0xddf   :  { %v3259_v31 = vpop.f32.mrf.mxu0  ;;  %v3330_v54 = vpop.f32.mrf.mxu1 }
 0xde0   :  { %v3335_v23 = vadd.f32 %v3259_v31, %v2094_v14  ;;  %v3337_v28 = vadd.f32 %v3330_v54, %v2207_v47 }
 0xde1   :  { %v3261_v45 = vpop.f32.mrf.mxu0  ;;  %v3332_v52 = vpop.f32.mrf.mxu1 }
 0xde2   :  { %v3850_v29 = vmul.f32 -1.442695, %v3335_v23  ;;  %v3336_v40 = vadd.f32 %v3261_v45, %v2096_v53  ;;  %v3338_v8 = vadd.f32 %v3332_v52, %v2209_v61 }
 0xde4   :  { %4127 = vpow2.f32 %v3850_v29  ;;  %v3851_v0 = vmul.f32 -1.442695, %v3336_v40  ;;  %v3852_v49 = vmul.f32 -1.442695, %v3338_v8 }
 0xde6   :  { %4129 = vpow2.f32 %v3851_v0 }
 0xde7   :  { %4131 = vtanh.f32 %v3337_v28 }
 0xde8   :  { %4133 = vpow2.f32 %v3852_v49 }
 0xdf1   :  { %v4128_v5 = vpop.eup %4127 }
 0xdf2   :  { %v3342_v4 = vadd.f32 1.0, %v4128_v5 }
 0xdf3   :  { %v4130_v14 = vpop.eup %4129 }
 0xdf4   :  { %4135 = vrcp.f32 %v3342_v4  ;;  %v3348_v45 = vadd.f32 1.0, %v4130_v14  ;;  %v4132_v40 = vpop.eup %4131 }
 0xdf5   :  { %v4134_v53 = vpop.eup %4133 }
 0xdf6   :  { %4137 = vrcp.f32 %v3348_v45  ;;  %v3355_v23 = vadd.f32 1.0, %v4134_v53 }
 0xdf8   :  { %4139 = vrcp.f32 %v3355_v23 }
 0xe01   :  { %v4136_v29 = vpop.eup %4135 }
 0xe02   :  { %v3359_v0 = vmul.f32 %v4136_v29, %v4132_v40 }
 0xe03   :  { %v4138_v31 = vpop.eup %4137 }
 0xe04   :  { %v3358_v61 = vmul.f32 %v4138_v31, %v6453_v48 }
 0xe05   :  { %v4140_v5 = vpop.eup %4139 }
 0xe06   :  { %v6531_v52 = vadd.f32 %v3359_v0, %v3358_v61 }
 0xe08   :  { %4141 = vtanh.f32 %v6531_v52 }
 0xe15   :  { %v4142_v50 = vpop.eup %4141 }
 0xe16   :  { %v3362_v54 = vmul.f32 %v4142_v50, %v4140_v5  ;;  %v3726_v5 = vld [vmem:[%s6697_s7 + $0x78] sm:$0xff]  ;;  %v3724_v50 = vld [vmem:[%s6697_s7 + $0x68] sm:$0xff] }
 0xe18   :  { %3432 = vmatmul.mubr.f32.vlgmr.msra.gmra.mxu0 %v3362_v54  ;;  %3503 = vmatmul.mubr.f32.vlgmr.msra.gmra.mxu1 %v3362_v54  ;;  %v3723_v54 = vld [vmem:[%s6697_s7 + $0x60] sm:$0xff] }
 0xe19   :  { %3542 = vmatpush1.msra.mxu0 %v6172_v39  ;;  %3613 = vmatpush1.msra.mxu1 %v6175_v6  ;;  %v7307_v39 = vld [vmem:[#allocation63_spill] sm:$0xff]  ;;  %v7308_v6 = vld [vmem:[#allocation20_spill] sm:$0xff] }
 0xe1a   :  { %3543 = vmatprep.subr.mxu0 %v6178_v10  ;;  %3614 = vmatprep.subr.mxu1 %v6181_v12  ;;  %v7309_v10 = vld [vmem:[#allocation18_spill] sm:$0xff]  ;;  %v7310_v12 = vld [vmem:[#allocation40_spill] sm:$0xff] }
 0xe1b   :  { %3544 = vmatpush1.msra.mxu0 %v6184_v30  ;;  %3615 = vmatpush1.msra.mxu1 %v6187_v42  ;;  %v7311_v30 = vld [vmem:[#allocation41_spill] sm:$0xff]  ;;  %v7312_v42 = vld [vmem:[#allocation39_spill] sm:$0xff] }
 0xe1c   :  { %3545 = vmatprep.subr.mxu0 %v6190_v13  ;;  %3616 = vmatprep.subr.mxu1 %v6193_v37  ;;  %v7313_v13 = vld [vmem:[#allocation42_spill] sm:$0xff]  ;;  %v7314_v37 = vld [vmem:[#allocation44_spill] sm:$0xff] }
 0xe1d   :  { %3546 = vmatpush1.msra.mxu0 %v6196_v41  ;;  %3617 = vmatpush1.msra.mxu1 %v6199_v44  ;;  %v7315_v41 = vld [vmem:[#allocation45_spill] sm:$0xff]  ;;  %v7316_v44 = vld [vmem:[#allocation43_spill] sm:$0xff] }
 0xe1e   :  { %3547 = vmatprep.subr.mxu0 %v6284_v26  ;;  %3618 = vmatprep.subr.mxu1 %v6287_v46  ;;  %v7317_v26 = vld [vmem:[#allocation11_spill] sm:$0xff]  ;;  %v7318_v46 = vld [vmem:[#allocation12_spill] sm:$0xff] }
 0xe1f   :  { %3548 = vmatpush1.msra.mxu0 %v6290_v38  ;;  %3619 = vmatpush1.msra.mxu1 %v6293_v59  ;;  %v7319_v38 = vld [vmem:[#allocation46_spill] sm:$0xff]  ;;  %v7320_v59 = vld [vmem:[#allocation33_spill] sm:$0xff] }
 0xe20   :  { %3549 = vmatprep.subr.mxu0 %v6296_v57  ;;  %3620 = vmatprep.subr.mxu1 %v6299_v56  ;;  %v7321_v57 = vld [vmem:[#allocation38_spill] sm:$0xff]  ;;  %v7322_v56 = vld [vmem:[#allocation21_spill] sm:$0xff] }
 0xe21   :  { %3550 = vmatpush1.msra.mxu0 %v6302_v55  ;;  %3621 = vmatpush1.msra.mxu1 %v6305_v3  ;;  %v7323_v55 = vld [vmem:[#allocation23_spill] sm:$0xff]  ;;  %v7324_v3 = vld [vmem:[#allocation24_spill] sm:$0xff] }
 0xe22   :  { %3551 = vmatprep.subr.mxu0 %v6308_v2  ;;  %3622 = vmatprep.subr.mxu1 %v6311_v60  ;;  %v7325_v2 = vld [vmem:[#allocation22_spill] sm:$0xff]  ;;  %v7326_v60 = vld [vmem:[#allocation48_spill] sm:$0xff] }
 0xe23   :  { %3552 = vmatpush1.msra.mxu0 %v6314_v58  ;;  %3623 = vmatpush1.msra.mxu1 %v6317_v11  ;;  %v7327_v58 = vmov 0.0   ;;  %v7328_v11 = vld [vmem:[#allocation49_spill] sm:$0xff] }
 0xe24   :  { %3553 = vmatprep.subr.mxu0 %v6320_v27  ;;  %3624 = vmatprep.subr.mxu1 %v6323_v63  ;;  %v7329_v27 = vld [vmem:[#allocation32_spill] sm:$0xff]  ;;  %v7330_v63 = vld [vmem:[#allocation13_spill] sm:$0xff] }
 0xe25   :  { %3554 = vmatpush1.msra.mxu0 %v6326_v51  ;;  %3625 = vmatpush1.msra.mxu1 %v6329_v15  ;;  %v2100_v51 = vadd.f32 %v7330_v63, %v7329_v27 }
 0xe26   :  { %3555 = vmatprep.subr.mxu0 %v6332_v16  ;;  %3626 = vmatprep.subr.mxu1 %v6335_v17  ;;  %v7331_v16 = vld [vmem:[#allocation36_spill] sm:$0xff] }
 0xe27   :  { %3556 = vmatpush1.msra.mxu0 %v6338_v18  ;;  %3627 = vmatpush1.msra.mxu1 %v6341_v19  ;;  %v2102_v17 = vadd.f32 %v7331_v16, %v5993_v7  ;;  %v7336_v16 = vld [vmem:[#allocation34_spill] sm:$0xff] }
 0xe28   :  { %3557 = vmatprep.subr.mxu0 %v6344_v21  ;;  %3628 = vmatprep.subr.mxu1 %v6347_v22 }
 0xe29   :  { %3558 = vmatpush1.msra.mxu0 %v6350_v24  ;;  %3629 = vmatpush1.msra.mxu1 %v6353_v1 }
 0xe2a   :  { %3559 = vmatprep.subr.mxu0 %v6356_v32  ;;  %3630 = vmatprep.subr.mxu1 %v6359_v33  ;;  %v7332_v33 = vld [vmem:[#allocation58_spill] sm:$0xff] }
 0xe2b   :  { %3560 = vmatpush1.msra.mxu0 %v6362_v34  ;;  %3631 = vmatpush1.msra.mxu1 %v6365_v35  ;;  %v2215_v34 = vadd.f32 %v7332_v33, %v7202_v9 }
 0xe2c   :  { %3561 = vmatprep.subr.mxu0 %v6368_v36  ;;  %3632 = vmatprep.subr.mxu1 %v6371_v62  ;;  %v7333_v36 = vld [vmem:[#allocation16_spill] sm:$0xff] }
 0xe2d   :  { %3562 = vmatpush1.msra.mxu0 %v6374_v25  ;;  %3633 = vmatpush1.msra.mxu1 %v7307_v39  ;;  %v2213_v62 = vadd.f32 %v7333_v36, %v6010_v20  ;;  %v3722_v39 = vld [vmem:[%s6697_s7 + $0x58] sm:$0xff] }
 0xe2e   :  { %3563 = vmatprep.subr.mxu0 %v7308_v6  ;;  %3634 = vmatprep.subr.mxu1 %v7309_v10  ;;  %v3721_v6 = vld [vmem:[%s6697_s7 + $0x50] sm:$0xff]  ;;  %v3720_v10 = vld [vmem:[%s6697_s7 + $0x48] sm:$0xff] }
 0xe2f   :  { %3564 = vmatpush1.msra.mxu0 %v7310_v12  ;;  %3635 = vmatpush1.msra.mxu1 %v7311_v30  ;;  %v3719_v12 = vld [vmem:[%s6697_s7 + $0x40] sm:$0xff]  ;;  %v3718_v30 = vld [vmem:[%s6697_s7 + $0x38] sm:$0xff] }
 0xe30   :  { %3565 = vmatprep.subr.mxu0 %v7312_v42  ;;  %3636 = vmatprep.subr.mxu1 %v7313_v13  ;;  %v3717_v42 = vld [vmem:[%s6697_s7 + $0x30] sm:$0xff]  ;;  %v3716_v13 = vld [vmem:[%s6697_s7 + $0x28] sm:$0xff] }
 0xe31   :  { %3566 = vmatpush1.msra.mxu0 %v7314_v37  ;;  %3637 = vmatpush1.msra.mxu1 %v7315_v41  ;;  %v3715_v37 = vld [vmem:[%s6697_s7 + $0x20] sm:$0xff]  ;;  %v3714_v41 = vld [vmem:[%s6697_s7 + $0x18] sm:$0xff] }
 0xe32   :  { %3567 = vmatprep.subr.mxu0 %v7316_v44  ;;  %3638 = vmatprep.subr.mxu1 %v7317_v26  ;;  %v3713_v44 = vld [vmem:[%s6697_s7 + $0x10] sm:$0xff]  ;;  %v3712_v26 = vld [vmem:[%s6697_s7 + $0x8] sm:$0xff] }
 0xe33   :  { %3568 = vmatpush1.msra.mxu0 %v7318_v46  ;;  %3639 = vmatpush1.msra.mxu1 %v7319_v38  ;;  %v3711_v46 = vld [vmem:[%s6697_s7] sm:$0xff]  ;;  %v7334_v38 = vld [vmem:[#allocation60_spill] sm:$0xff] }
 0xe34   :  { %3569 = vmatprep.subr.mxu0 %v7320_v59  ;;  %3640 = vmatprep.subr.mxu1 %v7321_v57  ;;  %v2106_v59 = vadd.f32 %v7334_v38, %v7329_v27 }
 0xe35   :  { %3570 = vmatpush1.msra.mxu0 %v7322_v56  ;;  %3641 = vmatpush1.msra.mxu1 %v7323_v55  ;;  %v7335_v56 = vld [vmem:[#allocation59_spill] sm:$0xff] }
 0xe36   :  { %3571 = vmatprep.subr.mxu0 %v7324_v3  ;;  %3642 = vmatprep.subr.mxu1 %v7325_v2  ;;  %v2108_v55 = vadd.f32 %v7335_v56, %v5993_v7 }
 0xe37   :  { %3572 = vmatpush1.msra.mxu0 %v7326_v60  ;;  %3605 = vmatprep.mubr.f32.mxu0 %v7327_v58 }
 0xe38   :  { %3643 = vmatpush1.msra.mxu1 %v7328_v11  ;;  %3676 = vmatprep.mubr.f32.mxu1 %v7327_v58 }
 0xe39   :  { %3877 = vmatprep.subr.mxu0 %v7327_v58 }
 0xed8   :  { %v3433_v15 = vpop.f32.mrf.mxu0  ;;  %v3504_v24 = vpop.f32.mrf.mxu1 }
 0xed9   :  { %v3509_v18 = vadd.f32 %v3433_v15, %v2100_v51  ;;  %v3511_v25 = vadd.f32 %v3504_v24, %v2213_v62 }
 0xeda   :  { %v3435_v19 = vpop.f32.mrf.mxu0  ;;  %v3506_v32 = vpop.f32.mrf.mxu1 }
 0xedb   :  { %v3853_v21 = vmul.f32 -1.442695, %v3509_v18  ;;  %v3510_v22 = vadd.f32 %v3435_v19, %v2102_v17  ;;  %v3512_v35 = vadd.f32 %v3506_v32, %v2215_v34  ;;  %v7337_v18 = vld [vmem:[#allocation61_spill] sm:$0xff] }
 0xedc   :  { %v2219_v27 = vadd.f32 %v7337_v18, %v6010_v20 }
 0xedd   :  { %4143 = vpow2.f32 %v3853_v21  ;;  %v3854_v1 = vmul.f32 -1.442695, %v3510_v22  ;;  %v3855_v48 = vmul.f32 -1.442695, %v3512_v35 }
 0xedf   :  { %4145 = vpow2.f32 %v3854_v1 }
 0xee0   :  { %4147 = vtanh.f32 %v3511_v25 }
 0xee1   :  { %4149 = vpow2.f32 %v3855_v48 }
 0xeea   :  { %v4144_v49 = vpop.eup %4143 }
 0xeeb   :  { %v3516_v28 = vadd.f32 1.0, %v4144_v49 }
 0xeec   :  { %v4146_v43 = vpop.eup %4145 }
 0xeed   :  { %4151 = vrcp.f32 %v3516_v28  ;;  %v3522_v8 = vadd.f32 1.0, %v4146_v43  ;;  %v4148_v47 = vpop.eup %4147  ;;  %v3859_v28 = vld [vmem:[%s6698_s8] ss:$0 sm:$0xff] }
 0xeee   :  { %v4150_v4 = vpop.eup %4149 }
 0xeef   :  { %4153 = vrcp.f32 %v3522_v8  ;;  %v3529_v53 = vadd.f32 1.0, %v4150_v4 }
 0xef1   :  { %4155 = vrcp.f32 %v3529_v53 }
 0xefa   :  { %v4152_v14 = vpop.eup %4151 }
 0xefb   :  { %v3533_v45 = vmul.f32 %v4152_v14, %v4148_v47 }
 0xefc   :  { %v4154_v40 = vpop.eup %4153 }
 0xefd   :  { %v3532_v29 = vmul.f32 %v4154_v40, %v6531_v52  ;;  %v3725_v52 = vld [vmem:[%s6697_s7 + $0x70] sm:$0xff] }
 0xefe   :  { %v4156_v31 = vpop.eup %4155 }
 0xeff   :  { %v6608_v0 = vadd.f32 %v3533_v45, %v3532_v29 }
 0xf01   :  { %4157 = vtanh.f32 %v6608_v0 }
 0xf0e   :  { %v4158_v23 = vpop.eup %4157 }
 0xf0f   :  { %v3536_v61 = vmul.f32 %v4158_v23, %v4156_v31 }
 0xf11   :  { %3606 = vmatmul.mubr.f32.vlgmr.msra.gmra.mxu0 %v3536_v61  ;;  %3677 = vmatmul.mubr.f32.vlgmr.msra.gmra.mxu1 %v3536_v61 }
 0xf12   :  { %3878 = vmatpush3.msra.mxu0 %v3726_v5  ;;  %3909 = vmatprep.mubr.msk.f32.mxu0 %vm4373_vm0, %v7327_v58 }
 0xf13   :  { %3879 = vmatprep.subr.mxu0 %v7327_v58 }
 0xf14   :  { %3880 = vmatpush3.msra.mxu0 %v3725_v52 }
 0xf15   :  { %3881 = vmatprep.subr.mxu0 %v7327_v58 }
 0xf16   :  { %3882 = vmatpush3.msra.mxu0 %v3724_v50 }
 0xf17   :  { %3883 = vmatprep.subr.mxu0 %v7327_v58 }
 0xf18   :  { %3884 = vmatpush3.msra.mxu0 %v3723_v54 }
 0xf19   :  { %3885 = vmatprep.subr.mxu0 %v7327_v58 }
 0xf1a   :  { %3886 = vmatpush3.msra.mxu0 %v3722_v39 }
 0xf1b   :  { %3887 = vmatprep.subr.mxu0 %v7327_v58 }
 0xf1c   :  { %3888 = vmatpush3.msra.mxu0 %v3721_v6 }
 0xf1d   :  { %3889 = vmatprep.subr.mxu0 %v7327_v58 }
 0xf1e   :  { %3890 = vmatpush3.msra.mxu0 %v3720_v10 }
 0xf1f   :  { %3891 = vmatprep.subr.mxu0 %v7327_v58 }
 0xf20   :  { %3892 = vmatpush3.msra.mxu0 %v3719_v12 }
 0xf21   :  { %3893 = vmatprep.subr.mxu0 %v7327_v58 }
 0xf22   :  { %3894 = vmatpush3.msra.mxu0 %v3718_v30 }
 0xf23   :  { %3895 = vmatprep.subr.mxu0 %v7327_v58 }
 0xf24   :  { %3896 = vmatpush3.msra.mxu0 %v3717_v42 }
 0xf25   :  { %3897 = vmatprep.subr.mxu0 %v7327_v58 }
 0xf26   :  { %3898 = vmatpush3.msra.mxu0 %v3716_v13 }
 0xf27   :  { %3899 = vmatprep.subr.mxu0 %v7327_v58 }
 0xf28   :  { %3900 = vmatpush3.msra.mxu0 %v3715_v37 }
 0xf29   :  { %3901 = vmatprep.subr.mxu0 %v7327_v58 }
 0xf2a   :  { %3902 = vmatpush3.msra.mxu0 %v3714_v41 }
 0xf2b   :  { %3903 = vmatprep.subr.mxu0 %v7327_v58 }
 0xf2c   :  { %3904 = vmatpush3.msra.mxu0 %v3713_v44 }
 0xf2d   :  { %3905 = vmatprep.subr.mxu0 %v7327_v58 }
 0xf2e   :  { %3906 = vmatpush3.msra.mxu0 %v3712_v26 }
 0xf2f   :  { %3907 = vmatprep.subr.mxu0 %v7327_v58  ;;  %v2221_v58 = vadd.f32 %v7336_v16, %v7202_v9 }
 0xf30   :  { %3908 = vmatpush3.msra.mxu0 %v3711_v46 }
 0xfd1   :  { %v3607_v57 = vpop.f32.mrf.mxu0  ;;  %v3678_v63 = vpop.f32.mrf.mxu1 }
 0xfd2   :  { %v3683_v3 = vadd.f32 %v3607_v57, %v2106_v59  ;;  %v3685_v19 = vadd.f32 %v3678_v63, %v2219_v27 }
 0xfd3   :  { %v3609_v2 = vpop.f32.mrf.mxu0  ;;  %v3680_v15 = vpop.f32.mrf.mxu1 }
 0xfd4   :  { %v3856_v60 = vmul.f32 -1.442695, %v3683_v3  ;;  %v3684_v11 = vadd.f32 %v3609_v2, %v2108_v55  ;;  %v3686_v17 = vadd.f32 %v3680_v15, %v2221_v58 }
 0xfd6   :  { %4159 = vpow2.f32 %v3856_v60  ;;  %v3857_v51 = vmul.f32 -1.442695, %v3684_v11  ;;  %v3858_v21 = vmul.f32 -1.442695, %v3686_v17 }
 0xfd8   :  { %4161 = vpow2.f32 %v3857_v51 }
 0xfd9   :  { %4163 = vtanh.f32 %v3685_v19 }
 0xfda   :  { %4165 = vpow2.f32 %v3858_v21 }
 0xfe3   :  { %v4160_v22 = vpop.eup %4159 }
 0xfe4   :  { %v3690_v7 = vadd.f32 1.0, %v4160_v22 }
 0xfe5   :  { %v4162_v24 = vpop.eup %4161 }
 0xfe6   :  { %4167 = vrcp.f32 %v3690_v7  ;;  %v3696_v1 = vadd.f32 1.0, %v4162_v24  ;;  %v4164_v32 = vpop.eup %4163 }
 0xfe7   :  { %v4166_v33 = vpop.eup %4165 }
 0xfe8   :  { %4169 = vrcp.f32 %v3696_v1  ;;  %v3703_v9 = vadd.f32 1.0, %v4166_v33 }
 0xfea   :  { %4171 = vrcp.f32 %v3703_v9 }
 0xff3   :  { %v4168_v34 = vpop.eup %4167 }
 0xff4   :  { %v3707_v35 = vmul.f32 %v4168_v34, %v4164_v32 }
 0xff5   :  { %v4170_v36 = vpop.eup %4169 }
 0xff6   :  { %v3706_v62 = vmul.f32 %v4170_v36, %v6608_v0 }
 0xff7   :  { %v4172_v20 = vpop.eup %4171 }
 0xff8   :  { %v3708_v25 = vadd.f32 %v3707_v35, %v3706_v62 }
 0xffa   :  { %4173 = vtanh.f32 %v3708_v25 }
0x1007   :  { %v4174_v48 = vpop.eup %4173 }
0x1008   :  { %v3710_v49 = vmul.f32 %v4174_v48, %v4172_v20 }
0x100a   :  { %3910 = vmatmul.mubr.f32.vlgmr.msra.gmra.mxu0 %v3710_v49 }
0x10ca   :  { %v3800_v43 = vpop.f32.mrf.mxu0 }
0x10cb   :  { %v3801_v8 = vadd.f32 %v3859_v28, %v3800_v43 }
0x10cc   :  { %v3911_v47 = vpop.f32.mrf.mxu0 }
0x10cd   :  { %3804 = vst [vmem:[%s6699_s9] sm:$0xff] %v3801_v8 }
0x10ce   :  { %3809 = vsyncpa [#allocation5], 1 }
0x10cf   :  { %3810 = vsyncpa [#allocation7], 1 }

</bundles_post_ra>
